<compile_context>
chip_gen: v6e
topology: v6e:2x2x1
jax: 0.10.0
libtpu: 0.0.40
codegen_flags: <defaults>
</compile_context>

<pallas_src>
import jax
import jax.numpy as jnp
from jax import lax
from jax.experimental import pallas as pl
from jax.experimental.pallas import tpu as pltpu


# --------------------------- in-kernel building blocks ---------------------- #

def _conv3x3_s2_relu(a_img, w_ref, b_ref):
    """Conv2d(k=3, stride=2, pad=1) + bias + ReLU for a batch tile.

    a_img : [H, W, B, Ci]  f32 value (H, W even; B = batch tile on sublanes)
    w_ref : [9*Ci, Co]     VMEM ref, rows ordered (kh, kw, ci)
    b_ref : [1, Co]        VMEM ref
    returns [Ho, Wo, B, Co] f32 with Ho = H//2, Wo = W//2.
    """
    H, W, Bt, Ci = a_img.shape
    Co = w_ref.shape[-1]
    Ho, Wo = H // 2, W // 2
    Hp, Wp = H + 2, W + 2

    # Explicit zero padding (1 px on every side) via leading-dim concats.
    zrow = jnp.zeros((1, W, Bt, Ci), jnp.float32)
    ap = jnp.concatenate([zrow, a_img, zrow], axis=0)            # [Hp, W,  B, Ci]
    zcol = jnp.zeros((Hp, 1, Bt, Ci), jnp.float32)
    ap = jnp.concatenate([zcol, ap, zcol], axis=1)               # [Hp, Wp, B, Ci]

    # Stride-2 tap gather via a free "row-pair" reshape of the leading dims:
    #   ap[2p + q, ...] == rH[p, q, ...]
    # so padded row 2i+dh is rH[i, dh] for dh<2 and rH[i+1, 0] for dh==2;
    # same trick along W.  Only static leading-dim slices — no strided loads,
    # no selection matmuls.
    rH = ap.reshape(Hp // 2, 2, Wp, Bt, Ci)
    slabs = []
    for dh in range(3):
        h0, hs = (0, dh) if dh < 2 else (1, 0)
        rows = rH[h0:h0 + Ho, hs]                                # [Ho, Wp, B, Ci]
        rW = rows.reshape(Ho, Wp // 2, 2, Bt, Ci)
        for dw in range(3):
            w0, ws = (0, dw) if dw < 2 else (1, 0)
            slabs.append(rW[:, w0:w0 + Wo, ws])                  # [Ho, Wo, B, Ci]

    # im2col patch matrix; K ordered (kh, kw, ci) to match the weight reshape.
    patch = jnp.concatenate(slabs, axis=-1)                      # [Ho, Wo, B, 9*Ci]
    patch = patch.reshape(Ho * Wo * Bt, 9 * Ci)                  # M = (i, j, b)

    out = jnp.dot(patch, w_ref[...], preferred_element_type=jnp.float32)
    out = jnp.maximum(out + b_ref[...], 0.0)                     # [Ho*Wo*B, Co]
    return out.reshape(Ho, Wo, Bt, Co)


def simple_cnn_kernel(x_ref, w1_ref, b1_ref, w2_ref, b2_ref, w3_ref, b3_ref,
                      wfc_ref, bfc_ref, o_ref):
    # One grid program == one batch tile; all intermediates stay on-chip and
    # each conv layer is a single MXU matmul.
    a = x_ref[...]                                   # [16, 16, B, 3]
    a = _conv3x3_s2_relu(a, w1_ref, b1_ref)          # [8, 8, B, 32]
    a = _conv3x3_s2_relu(a, w2_ref, b2_ref)          # [4, 4, B, 64]
    a = _conv3x3_s2_relu(a, w3_ref, b3_ref)          # [2, 2, B, 128]

    # AdaptiveAvgPool2d((1,1)): mean over the (leading) 2x2 spatial grid.
    inv_hw = 1.0 / float(a.shape[0] * a.shape[1])
    pooled = jnp.sum(a, axis=(0, 1)) * inv_hw        # [B, 128]

    # Linear(128 -> out_dim); the [B, 256] store is lane-dense (256 % 128 == 0).
    o_ref[...] = (jnp.dot(pooled, wfc_ref[...],
                          preferred_element_type=jnp.float32) + bfc_ref[...])


# ----------------------------- wrapper -------------------------------------- #

def _rep_spec(shape):
    nd = len(shape)
    return pl.BlockSpec(shape, lambda n, _nd=nd: (0,) * _nd)


@jax.jit
def simple_cnn_forward(params, x_nchw):
    N = x_nchw.shape[0]
    out_dim = params["w_fc"].shape[-1]

    # NCHW -> [H, W, N, C] once at the boundary (6 KiB of glue): batch lives on
    # the sublane axis in-kernel so it folds straight into the matmul M dim.
    x = jnp.transpose(x_nchw, (2, 3, 0, 1)).astype(jnp.float32)
    H, W, _, C = x.shape

    # Batch tile: 8 fills the sublanes exactly (B < 8 pads to 8 anyway, so it
    # costs no extra VMEM); larger batches become more "parallel" grid programs
    # (shard across TensorCores on v7x).  Kept conservative because the C=3
    # input stage is lane-padded; raise once the input layout is flattened.
    bt = min(N, 8)
    n_pad = ((N + bt - 1) // bt) * bt
    if n_pad != N:
        x = jnp.pad(x, ((0, 0), (0, 0), (0, n_pad - N), (0, 0)))

    # One-time weight prep: conv HWIO [3,3,Ci,Co] -> im2col [9*Ci, Co].
    w1 = params["w1"].reshape(-1, params["w1"].shape[-1])
    w2 = params["w2"].reshape(-1, params["w2"].shape[-1])
    w3 = params["w3"].reshape(-1, params["w3"].shape[-1])
    b1 = params["b1"].reshape(1, -1)
    b2 = params["b2"].reshape(1, -1)
    b3 = params["b3"].reshape(1, -1)
    wfc = params["w_fc"]
    bfc = params["b_fc"].reshape(1, -1)

    operands = (x, w1, b1, w2, b2, w3, b3, wfc, bfc)
    in_specs = [pl.BlockSpec((H, W, bt, C), lambda n: (0, 0, n, 0))]
    in_specs += [_rep_spec(op.shape) for op in operands[1:]]

    out = pl.pallas_call(
        simple_cnn_kernel,
        out_shape=jax.ShapeDtypeStruct((n_pad, out_dim), jnp.float32),
        grid=(n_pad // bt,),
        in_specs=in_specs,
        out_specs=pl.BlockSpec((bt, out_dim), lambda n: (n, 0)),
        compiler_params=pltpu.CompilerParams(
            dimension_semantics=("parallel",)),
    )(*operands)
    return out[:N]


# ----------------------------- model params --------------------------------- #

def init_params(key, output_dim=256):
    ks = jax.random.split(key, 8)
    scale = 0.05
    return {
        # HWIO conv weights (kh, kw, cin, cout)
        "w1": scale * jax.random.normal(ks[0], (3, 3, 3, 32), jnp.float32),
        "b1": scale * jax.random.normal(ks[1], (32,), jnp.float32),
        "w2": scale * jax.random.normal(ks[2], (3, 3, 32, 64), jnp.float32),
        "b2": scale * jax.random.normal(ks[3], (64,), jnp.float32),
        "w3": scale * jax.random.normal(ks[4], (3, 3, 64, 128), jnp.float32),
        "b3": scale * jax.random.normal(ks[5], (128,), jnp.float32),
        # fc: [in=128, out=output_dim]
        "w_fc": scale * jax.random.normal(ks[6], (128, output_dim), jnp.float32),
        "b_fc": scale * jax.random.normal(ks[7], (output_dim,), jnp.float32),
    }


# ----------------------------- pure-JAX reference --------------------------- #

def reference_forward(params, x_nchw):
    x = jnp.transpose(x_nchw, (0, 2, 3, 1)).astype(jnp.float32)
    dn = lax.conv_dimension_numbers(x.shape, params["w1"].shape,
                                    ("NHWC", "HWIO", "NHWC"))
    for w, b in ((params["w1"], params["b1"]),
                 (params["w2"], params["b2"]),
                 (params["w3"], params["b3"])):
        x = lax.conv_general_dilated(
            x, w, window_strides=(2, 2), padding=((1, 1), (1, 1)),
            dimension_numbers=dn, precision=lax.Precision.HIGHEST)
        x = jnp.maximum(x + b, 0.0)
    pooled = jnp.mean(x, axis=(1, 2))
    return pooled @ params["w_fc"] + params["b_fc"]


# ----------------------------- main ------------------------------------------ #

if __name__ == "__main__":
    key = jax.random.PRNGKey(0)
    k_param, k_x = jax.random.split(key)

    output_dim = 256
    params = init_params(k_param, output_dim=output_dim)

    # PyTorch NCHW convention: batch=2, channels=3 (fixed by the module), 16x16
    x = jax.random.normal(k_x, (2, 3, 16, 16), jnp.float32)

    out = simple_cnn_forward(params, x)
    out = jax.block_until_ready(out)
    assert out.shape == (2, output_dim), out.shape

    ref = reference_forward(params, x)
    # Tightened from 1e-2; leaves margin for the MXU's multi-pass f32 path.
    assert jnp.allclose(out, ref, rtol=5e-3, atol=5e-3), (
        float(jnp.max(jnp.abs(out - ref)))
    )

    print("KERNEL_OK")
</pallas_src>

<mosaic_0001>
module attributes {stable_mosaic.version = 11 : i64} {
  func.func @simple_cnn_kernel(%arg0: i32, %arg1: memref<16x16x2x3xf32, #tpu.memory_space<vmem>>, %arg2: memref<27x32xf32, #tpu.memory_space<vmem>>, %arg3: memref<1x32xf32, #tpu.memory_space<vmem>>, %arg4: memref<288x64xf32, #tpu.memory_space<vmem>>, %arg5: memref<1x64xf32, #tpu.memory_space<vmem>>, %arg6: memref<576x128xf32, #tpu.memory_space<vmem>>, %arg7: memref<1x128xf32, #tpu.memory_space<vmem>>, %arg8: memref<128x256xf32, #tpu.memory_space<vmem>>, %arg9: memref<1x256xf32, #tpu.memory_space<vmem>>, %arg10: memref<2x256xf32, #tpu.memory_space<vmem>>) attributes {dimension_semantics = [#tpu.dimension_semantics<parallel>], iteration_bounds = array<i64: 1>, scalar_prefetch = 0 : i64, scratch_operands = 0 : i64, tpu.core_type = #tpu.core_type<tc>, window_params = [{transform_indices = @transform_0, window_bounds = array<i64: 16, 16, 2, 3>}, {pipeline_mode = #tpu.pipeline_mode<synchronous>, transform_indices = @transform_1, window_bounds = array<i64: 27, 32>}, {pipeline_mode = #tpu.pipeline_mode<synchronous>, transform_indices = @transform_2, window_bounds = array<i64: 1, 32>}, {pipeline_mode = #tpu.pipeline_mode<synchronous>, transform_indices = @transform_3, window_bounds = array<i64: 288, 64>}, {pipeline_mode = #tpu.pipeline_mode<synchronous>, transform_indices = @transform_4, window_bounds = array<i64: 1, 64>}, {pipeline_mode = #tpu.pipeline_mode<synchronous>, transform_indices = @transform_5, window_bounds = array<i64: 576, 128>}, {pipeline_mode = #tpu.pipeline_mode<synchronous>, transform_indices = @transform_6, window_bounds = array<i64: 1, 128>}, {pipeline_mode = #tpu.pipeline_mode<synchronous>, transform_indices = @transform_7, window_bounds = array<i64: 128, 256>}, {pipeline_mode = #tpu.pipeline_mode<synchronous>, transform_indices = @transform_8, window_bounds = array<i64: 1, 256>}, {transform_indices = @transform_9, window_bounds = array<i64: 2, 256>}]} {
    %c0 = arith.constant 0 : index
    %c0_0 = arith.constant 0 : index
    %c0_1 = arith.constant 0 : index
    %c0_2 = arith.constant 0 : index
    %0 = vector.load %arg1[%c0, %c0_0, %c0_1, %c0_2] : memref<16x16x2x3xf32, #tpu.memory_space<vmem>>, vector<16x16x2x3xf32>
    %cst = arith.constant 0.000000e+00 : f32
    %1 = vector.broadcast %cst : f32 to vector<1x16x2x3xf32>
    %2 = tpu.concatenate %1, %0, %1 in 0 : vector<1x16x2x3xf32>, vector<16x16x2x3xf32>, vector<1x16x2x3xf32> -> vector<18x16x2x3xf32>
    %cst_3 = arith.constant 0.000000e+00 : f32
    %3 = vector.broadcast %cst_3 : f32 to vector<18x1x2x3xf32>
    %4 = tpu.concatenate %3, %2, %3 in 1 : vector<18x1x2x3xf32>, vector<18x16x2x3xf32>, vector<18x1x2x3xf32> -> vector<18x18x2x3xf32>
    %5 = vector.shape_cast %4 : vector<18x18x2x3xf32> to vector<9x2x18x2x3xf32>
    %6 = vector.extract_strided_slice %5 {offsets = [0, 0, 0, 0, 0], sizes = [8, 1, 18, 2, 3], strides = [1, 1, 1, 1, 1]} : vector<9x2x18x2x3xf32> to vector<8x1x18x2x3xf32>
    %7 = vector.shape_cast %6 : vector<8x1x18x2x3xf32> to vector<8x18x2x3xf32>
    %8 = vector.shape_cast %7 : vector<8x18x2x3xf32> to vector<8x9x2x2x3xf32>
    %9 = vector.extract_strided_slice %8 {offsets = [0, 0, 0, 0, 0], sizes = [8, 8, 1, 2, 3], strides = [1, 1, 1, 1, 1]} : vector<8x9x2x2x3xf32> to vector<8x8x1x2x3xf32>
    %10 = vector.shape_cast %9 : vector<8x8x1x2x3xf32> to vector<8x8x2x3xf32>
    %11 = vector.extract_strided_slice %8 {offsets = [0, 0, 1, 0, 0], sizes = [8, 8, 1, 2, 3], strides = [1, 1, 1, 1, 1]} : vector<8x9x2x2x3xf32> to vector<8x8x1x2x3xf32>
    %12 = vector.shape_cast %11 : vector<8x8x1x2x3xf32> to vector<8x8x2x3xf32>
    %13 = vector.extract_strided_slice %8 {offsets = [0, 1, 0, 0, 0], sizes = [8, 8, 1, 2, 3], strides = [1, 1, 1, 1, 1]} : vector<8x9x2x2x3xf32> to vector<8x8x1x2x3xf32>
    %14 = vector.shape_cast %13 : vector<8x8x1x2x3xf32> to vector<8x8x2x3xf32>
    %15 = vector.extract_strided_slice %5 {offsets = [0, 1, 0, 0, 0], sizes = [8, 1, 18, 2, 3], strides = [1, 1, 1, 1, 1]} : vector<9x2x18x2x3xf32> to vector<8x1x18x2x3xf32>
    %16 = vector.shape_cast %15 : vector<8x1x18x2x3xf32> to vector<8x18x2x3xf32>
    %17 = vector.shape_cast %16 : vector<8x18x2x3xf32> to vector<8x9x2x2x3xf32>
    %18 = vector.extract_strided_slice %17 {offsets = [0, 0, 0, 0, 0], sizes = [8, 8, 1, 2, 3], strides = [1, 1, 1, 1, 1]} : vector<8x9x2x2x3xf32> to vector<8x8x1x2x3xf32>
    %19 = vector.shape_cast %18 : vector<8x8x1x2x3xf32> to vector<8x8x2x3xf32>
    %20 = vector.extract_strided_slice %17 {offsets = [0, 0, 1, 0, 0], sizes = [8, 8, 1, 2, 3], strides = [1, 1, 1, 1, 1]} : vector<8x9x2x2x3xf32> to vector<8x8x1x2x3xf32>
    %21 = vector.shape_cast %20 : vector<8x8x1x2x3xf32> to vector<8x8x2x3xf32>
    %22 = vector.extract_strided_slice %17 {offsets = [0, 1, 0, 0, 0], sizes = [8, 8, 1, 2, 3], strides = [1, 1, 1, 1, 1]} : vector<8x9x2x2x3xf32> to vector<8x8x1x2x3xf32>
    %23 = vector.shape_cast %22 : vector<8x8x1x2x3xf32> to vector<8x8x2x3xf32>
    %24 = vector.extract_strided_slice %5 {offsets = [1, 0, 0, 0, 0], sizes = [8, 1, 18, 2, 3], strides = [1, 1, 1, 1, 1]} : vector<9x2x18x2x3xf32> to vector<8x1x18x2x3xf32>
    %25 = vector.shape_cast %24 : vector<8x1x18x2x3xf32> to vector<8x18x2x3xf32>
    %26 = vector.shape_cast %25 : vector<8x18x2x3xf32> to vector<8x9x2x2x3xf32>
    %27 = vector.extract_strided_slice %26 {offsets = [0, 0, 0, 0, 0], sizes = [8, 8, 1, 2, 3], strides = [1, 1, 1, 1, 1]} : vector<8x9x2x2x3xf32> to vector<8x8x1x2x3xf32>
    %28 = vector.shape_cast %27 : vector<8x8x1x2x3xf32> to vector<8x8x2x3xf32>
    %29 = vector.extract_strided_slice %26 {offsets = [0, 0, 1, 0, 0], sizes = [8, 8, 1, 2, 3], strides = [1, 1, 1, 1, 1]} : vector<8x9x2x2x3xf32> to vector<8x8x1x2x3xf32>
    %30 = vector.shape_cast %29 : vector<8x8x1x2x3xf32> to vector<8x8x2x3xf32>
    %31 = vector.extract_strided_slice %26 {offsets = [0, 1, 0, 0, 0], sizes = [8, 8, 1, 2, 3], strides = [1, 1, 1, 1, 1]} : vector<8x9x2x2x3xf32> to vector<8x8x1x2x3xf32>
    %32 = vector.shape_cast %31 : vector<8x8x1x2x3xf32> to vector<8x8x2x3xf32>
    %33 = tpu.concatenate %10, %12, %14, %19, %21, %23, %28, %30, %32 in 3 : vector<8x8x2x3xf32>, vector<8x8x2x3xf32>, vector<8x8x2x3xf32>, vector<8x8x2x3xf32>, vector<8x8x2x3xf32>, vector<8x8x2x3xf32>, vector<8x8x2x3xf32>, vector<8x8x2x3xf32>, vector<8x8x2x3xf32> -> vector<8x8x2x27xf32>
    %34 = vector.shape_cast %33 : vector<8x8x2x27xf32> to vector<128x27xf32>
    %c0_4 = arith.constant 0 : index
    %c0_5 = arith.constant 0 : index
    %35 = vector.load %arg2[%c0_4, %c0_5] : memref<27x32xf32, #tpu.memory_space<vmem>>, vector<27x32xf32>
    %cst_6 = arith.constant dense<0.000000e+00> : vector<128x32xf32>
    %36 = tpu.matmul %34, %35, %cst_6 {dimension_numbers = #tpu.dot_dimension_numbers<[1], [0], [0], [1], [0, 0, 1, 1], [], []>} : vector<128x27xf32>, vector<27x32xf32>, vector<128x32xf32> -> vector<128x32xf32>
    %c0_7 = arith.constant 0 : index
    %c0_8 = arith.constant 0 : index
    %37 = vector.load %arg3[%c0_7, %c0_8] : memref<1x32xf32, #tpu.memory_space<vmem>>, vector<1x32xf32>
    %38 = vector.broadcast %37 : vector<1x32xf32> to vector<128x32xf32>
    %39 = arith.addf %36, %38 : vector<128x32xf32>
    %cst_9 = arith.constant 0.000000e+00 : f32
    %40 = vector.broadcast %cst_9 : f32 to vector<128x32xf32>
    %41 = arith.maximumf %39, %40 : vector<128x32xf32>
    %42 = vector.shape_cast %41 : vector<128x32xf32> to vector<8x8x2x32xf32>
    %cst_10 = arith.constant 0.000000e+00 : f32
    %43 = vector.broadcast %cst_10 : f32 to vector<1x8x2x32xf32>
    %44 = tpu.concatenate %43, %42, %43 in 0 : vector<1x8x2x32xf32>, vector<8x8x2x32xf32>, vector<1x8x2x32xf32> -> vector<10x8x2x32xf32>
    %cst_11 = arith.constant 0.000000e+00 : f32
    %45 = vector.broadcast %cst_11 : f32 to vector<10x1x2x32xf32>
    %46 = tpu.concatenate %45, %44, %45 in 1 : vector<10x1x2x32xf32>, vector<10x8x2x32xf32>, vector<10x1x2x32xf32> -> vector<10x10x2x32xf32>
    %47 = vector.shape_cast %46 : vector<10x10x2x32xf32> to vector<5x2x10x2x32xf32>
    %48 = vector.extract_strided_slice %47 {offsets = [0, 0, 0, 0, 0], sizes = [4, 1, 10, 2, 32], strides = [1, 1, 1, 1, 1]} : vector<5x2x10x2x32xf32> to vector<4x1x10x2x32xf32>
    %49 = vector.shape_cast %48 : vector<4x1x10x2x32xf32> to vector<4x10x2x32xf32>
    %50 = vector.shape_cast %49 : vector<4x10x2x32xf32> to vector<4x5x2x2x32xf32>
    %51 = vector.extract_strided_slice %50 {offsets = [0, 0, 0, 0, 0], sizes = [4, 4, 1, 2, 32], strides = [1, 1, 1, 1, 1]} : vector<4x5x2x2x32xf32> to vector<4x4x1x2x32xf32>
    %52 = vector.shape_cast %51 : vector<4x4x1x2x32xf32> to vector<4x4x2x32xf32>
    %53 = vector.extract_strided_slice %50 {offsets = [0, 0, 1, 0, 0], sizes = [4, 4, 1, 2, 32], strides = [1, 1, 1, 1, 1]} : vector<4x5x2x2x32xf32> to vector<4x4x1x2x32xf32>
    %54 = vector.shape_cast %53 : vector<4x4x1x2x32xf32> to vector<4x4x2x32xf32>
    %55 = vector.extract_strided_slice %50 {offsets = [0, 1, 0, 0, 0], sizes = [4, 4, 1, 2, 32], strides = [1, 1, 1, 1, 1]} : vector<4x5x2x2x32xf32> to vector<4x4x1x2x32xf32>
    %56 = vector.shape_cast %55 : vector<4x4x1x2x32xf32> to vector<4x4x2x32xf32>
    %57 = vector.extract_strided_slice %47 {offsets = [0, 1, 0, 0, 0], sizes = [4, 1, 10, 2, 32], strides = [1, 1, 1, 1, 1]} : vector<5x2x10x2x32xf32> to vector<4x1x10x2x32xf32>
    %58 = vector.shape_cast %57 : vector<4x1x10x2x32xf32> to vector<4x10x2x32xf32>
    %59 = vector.shape_cast %58 : vector<4x10x2x32xf32> to vector<4x5x2x2x32xf32>
    %60 = vector.extract_strided_slice %59 {offsets = [0, 0, 0, 0, 0], sizes = [4, 4, 1, 2, 32], strides = [1, 1, 1, 1, 1]} : vector<4x5x2x2x32xf32> to vector<4x4x1x2x32xf32>
    %61 = vector.shape_cast %60 : vector<4x4x1x2x32xf32> to vector<4x4x2x32xf32>
    %62 = vector.extract_strided_slice %59 {offsets = [0, 0, 1, 0, 0], sizes = [4, 4, 1, 2, 32], strides = [1, 1, 1, 1, 1]} : vector<4x5x2x2x32xf32> to vector<4x4x1x2x32xf32>
    %63 = vector.shape_cast %62 : vector<4x4x1x2x32xf32> to vector<4x4x2x32xf32>
    %64 = vector.extract_strided_slice %59 {offsets = [0, 1, 0, 0, 0], sizes = [4, 4, 1, 2, 32], strides = [1, 1, 1, 1, 1]} : vector<4x5x2x2x32xf32> to vector<4x4x1x2x32xf32>
    %65 = vector.shape_cast %64 : vector<4x4x1x2x32xf32> to vector<4x4x2x32xf32>
    %66 = vector.extract_strided_slice %47 {offsets = [1, 0, 0, 0, 0], sizes = [4, 1, 10, 2, 32], strides = [1, 1, 1, 1, 1]} : vector<5x2x10x2x32xf32> to vector<4x1x10x2x32xf32>
    %67 = vector.shape_cast %66 : vector<4x1x10x2x32xf32> to vector<4x10x2x32xf32>
    %68 = vector.shape_cast %67 : vector<4x10x2x32xf32> to vector<4x5x2x2x32xf32>
    %69 = vector.extract_strided_slice %68 {offsets = [0, 0, 0, 0, 0], sizes = [4, 4, 1, 2, 32], strides = [1, 1, 1, 1, 1]} : vector<4x5x2x2x32xf32> to vector<4x4x1x2x32xf32>
    %70 = vector.shape_cast %69 : vector<4x4x1x2x32xf32> to vector<4x4x2x32xf32>
    %71 = vector.extract_strided_slice %68 {offsets = [0, 0, 1, 0, 0], sizes = [4, 4, 1, 2, 32], strides = [1, 1, 1, 1, 1]} : vector<4x5x2x2x32xf32> to vector<4x4x1x2x32xf32>
    %72 = vector.shape_cast %71 : vector<4x4x1x2x32xf32> to vector<4x4x2x32xf32>
    %73 = vector.extract_strided_slice %68 {offsets = [0, 1, 0, 0, 0], sizes = [4, 4, 1, 2, 32], strides = [1, 1, 1, 1, 1]} : vector<4x5x2x2x32xf32> to vector<4x4x1x2x32xf32>
    %74 = vector.shape_cast %73 : vector<4x4x1x2x32xf32> to vector<4x4x2x32xf32>
    %75 = tpu.concatenate %52, %54, %56, %61, %63, %65, %70, %72, %74 in 3 : vector<4x4x2x32xf32>, vector<4x4x2x32xf32>, vector<4x4x2x32xf32>, vector<4x4x2x32xf32>, vector<4x4x2x32xf32>, vector<4x4x2x32xf32>, vector<4x4x2x32xf32>, vector<4x4x2x32xf32>, vector<4x4x2x32xf32> -> vector<4x4x2x288xf32>
    %76 = vector.shape_cast %75 : vector<4x4x2x288xf32> to vector<32x288xf32>
    %c0_12 = arith.constant 0 : index
    %c0_13 = arith.constant 0 : index
    %77 = vector.load %arg4[%c0_12, %c0_13] : memref<288x64xf32, #tpu.memory_space<vmem>>, vector<288x64xf32>
    %cst_14 = arith.constant dense<0.000000e+00> : vector<32x64xf32>
    %78 = tpu.matmul %76, %77, %cst_14 {dimension_numbers = #tpu.dot_dimension_numbers<[1], [0], [0], [1], [0, 0, 1, 1], [], []>} : vector<32x288xf32>, vector<288x64xf32>, vector<32x64xf32> -> vector<32x64xf32>
    %c0_15 = arith.constant 0 : index
    %c0_16 = arith.constant 0 : index
    %79 = vector.load %arg5[%c0_15, %c0_16] : memref<1x64xf32, #tpu.memory_space<vmem>>, vector<1x64xf32>
    %80 = vector.broadcast %79 : vector<1x64xf32> to vector<32x64xf32>
    %81 = arith.addf %78, %80 : vector<32x64xf32>
    %cst_17 = arith.constant 0.000000e+00 : f32
    %82 = vector.broadcast %cst_17 : f32 to vector<32x64xf32>
    %83 = arith.maximumf %81, %82 : vector<32x64xf32>
    %84 = vector.shape_cast %83 : vector<32x64xf32> to vector<4x4x2x64xf32>
    %cst_18 = arith.constant 0.000000e+00 : f32
    %85 = vector.broadcast %cst_18 : f32 to vector<1x4x2x64xf32>
    %86 = tpu.concatenate %85, %84, %85 in 0 : vector<1x4x2x64xf32>, vector<4x4x2x64xf32>, vector<1x4x2x64xf32> -> vector<6x4x2x64xf32>
    %cst_19 = arith.constant 0.000000e+00 : f32
    %87 = vector.broadcast %cst_19 : f32 to vector<6x1x2x64xf32>
    %88 = tpu.concatenate %87, %86, %87 in 1 : vector<6x1x2x64xf32>, vector<6x4x2x64xf32>, vector<6x1x2x64xf32> -> vector<6x6x2x64xf32>
    %89 = vector.shape_cast %88 : vector<6x6x2x64xf32> to vector<3x2x6x2x64xf32>
    %90 = vector.extract_strided_slice %89 {offsets = [0, 0, 0, 0, 0], sizes = [2, 1, 6, 2, 64], strides = [1, 1, 1, 1, 1]} : vector<3x2x6x2x64xf32> to vector<2x1x6x2x64xf32>
    %91 = vector.shape_cast %90 : vector<2x1x6x2x64xf32> to vector<2x6x2x64xf32>
    %92 = vector.shape_cast %91 : vector<2x6x2x64xf32> to vector<2x3x2x2x64xf32>
    %93 = vector.extract_strided_slice %92 {offsets = [0, 0, 0, 0, 0], sizes = [2, 2, 1, 2, 64], strides = [1, 1, 1, 1, 1]} : vector<2x3x2x2x64xf32> to vector<2x2x1x2x64xf32>
    %94 = vector.shape_cast %93 : vector<2x2x1x2x64xf32> to vector<2x2x2x64xf32>
    %95 = vector.extract_strided_slice %92 {offsets = [0, 0, 1, 0, 0], sizes = [2, 2, 1, 2, 64], strides = [1, 1, 1, 1, 1]} : vector<2x3x2x2x64xf32> to vector<2x2x1x2x64xf32>
    %96 = vector.shape_cast %95 : vector<2x2x1x2x64xf32> to vector<2x2x2x64xf32>
    %97 = vector.extract_strided_slice %92 {offsets = [0, 1, 0, 0, 0], sizes = [2, 2, 1, 2, 64], strides = [1, 1, 1, 1, 1]} : vector<2x3x2x2x64xf32> to vector<2x2x1x2x64xf32>
    %98 = vector.shape_cast %97 : vector<2x2x1x2x64xf32> to vector<2x2x2x64xf32>
    %99 = vector.extract_strided_slice %89 {offsets = [0, 1, 0, 0, 0], sizes = [2, 1, 6, 2, 64], strides = [1, 1, 1, 1, 1]} : vector<3x2x6x2x64xf32> to vector<2x1x6x2x64xf32>
    %100 = vector.shape_cast %99 : vector<2x1x6x2x64xf32> to vector<2x6x2x64xf32>
    %101 = vector.shape_cast %100 : vector<2x6x2x64xf32> to vector<2x3x2x2x64xf32>
    %102 = vector.extract_strided_slice %101 {offsets = [0, 0, 0, 0, 0], sizes = [2, 2, 1, 2, 64], strides = [1, 1, 1, 1, 1]} : vector<2x3x2x2x64xf32> to vector<2x2x1x2x64xf32>
    %103 = vector.shape_cast %102 : vector<2x2x1x2x64xf32> to vector<2x2x2x64xf32>
    %104 = vector.extract_strided_slice %101 {offsets = [0, 0, 1, 0, 0], sizes = [2, 2, 1, 2, 64], strides = [1, 1, 1, 1, 1]} : vector<2x3x2x2x64xf32> to vector<2x2x1x2x64xf32>
    %105 = vector.shape_cast %104 : vector<2x2x1x2x64xf32> to vector<2x2x2x64xf32>
    %106 = vector.extract_strided_slice %101 {offsets = [0, 1, 0, 0, 0], sizes = [2, 2, 1, 2, 64], strides = [1, 1, 1, 1, 1]} : vector<2x3x2x2x64xf32> to vector<2x2x1x2x64xf32>
    %107 = vector.shape_cast %106 : vector<2x2x1x2x64xf32> to vector<2x2x2x64xf32>
    %108 = vector.extract_strided_slice %89 {offsets = [1, 0, 0, 0, 0], sizes = [2, 1, 6, 2, 64], strides = [1, 1, 1, 1, 1]} : vector<3x2x6x2x64xf32> to vector<2x1x6x2x64xf32>
    %109 = vector.shape_cast %108 : vector<2x1x6x2x64xf32> to vector<2x6x2x64xf32>
    %110 = vector.shape_cast %109 : vector<2x6x2x64xf32> to vector<2x3x2x2x64xf32>
    %111 = vector.extract_strided_slice %110 {offsets = [0, 0, 0, 0, 0], sizes = [2, 2, 1, 2, 64], strides = [1, 1, 1, 1, 1]} : vector<2x3x2x2x64xf32> to vector<2x2x1x2x64xf32>
    %112 = vector.shape_cast %111 : vector<2x2x1x2x64xf32> to vector<2x2x2x64xf32>
    %113 = vector.extract_strided_slice %110 {offsets = [0, 0, 1, 0, 0], sizes = [2, 2, 1, 2, 64], strides = [1, 1, 1, 1, 1]} : vector<2x3x2x2x64xf32> to vector<2x2x1x2x64xf32>
    %114 = vector.shape_cast %113 : vector<2x2x1x2x64xf32> to vector<2x2x2x64xf32>
    %115 = vector.extract_strided_slice %110 {offsets = [0, 1, 0, 0, 0], sizes = [2, 2, 1, 2, 64], strides = [1, 1, 1, 1, 1]} : vector<2x3x2x2x64xf32> to vector<2x2x1x2x64xf32>
    %116 = vector.shape_cast %115 : vector<2x2x1x2x64xf32> to vector<2x2x2x64xf32>
    %117 = tpu.concatenate %94, %96, %98, %103, %105, %107, %112, %114, %116 in 3 : vector<2x2x2x64xf32>, vector<2x2x2x64xf32>, vector<2x2x2x64xf32>, vector<2x2x2x64xf32>, vector<2x2x2x64xf32>, vector<2x2x2x64xf32>, vector<2x2x2x64xf32>, vector<2x2x2x64xf32>, vector<2x2x2x64xf32> -> vector<2x2x2x576xf32>
    %118 = vector.shape_cast %117 : vector<2x2x2x576xf32> to vector<8x576xf32>
    %c0_20 = arith.constant 0 : index
    %c0_21 = arith.constant 0 : index
    %119 = vector.load %arg6[%c0_20, %c0_21] : memref<576x128xf32, #tpu.memory_space<vmem>>, vector<576x128xf32>
    %cst_22 = arith.constant dense<0.000000e+00> : vector<8x128xf32>
    %120 = tpu.matmul %118, %119, %cst_22 {dimension_numbers = #tpu.dot_dimension_numbers<[1], [0], [0], [1], [0, 0, 1, 1], [], []>} : vector<8x576xf32>, vector<576x128xf32>, vector<8x128xf32> -> vector<8x128xf32>
    %c0_23 = arith.constant 0 : index
    %c0_24 = arith.constant 0 : index
    %121 = vector.load %arg7[%c0_23, %c0_24] : memref<1x128xf32, #tpu.memory_space<vmem>>, vector<1x128xf32>
    %122 = vector.broadcast %121 : vector<1x128xf32> to vector<8x128xf32>
    %123 = arith.addf %120, %122 : vector<8x128xf32>
    %cst_25 = arith.constant 0.000000e+00 : f32
    %124 = vector.broadcast %cst_25 : f32 to vector<8x128xf32>
    %125 = arith.maximumf %123, %124 : vector<8x128xf32>
    %126 = vector.shape_cast %125 : vector<8x128xf32> to vector<2x2x2x128xf32>
    %cst_26 = arith.constant dense<0.000000e+00> : vector<2x128xf32>
    %127 = vector.multi_reduction <add>, %126, %cst_26 [0, 1] : vector<2x2x2x128xf32> to vector<2x128xf32>
    %cst_27 = arith.constant 2.500000e-01 : f32
    %128 = vector.broadcast %cst_27 : f32 to vector<2x128xf32>
    %129 = arith.mulf %127, %128 : vector<2x128xf32>
    %c0_28 = arith.constant 0 : index
    %c0_29 = arith.constant 0 : index
    %130 = vector.load %arg8[%c0_28, %c0_29] : memref<128x256xf32, #tpu.memory_space<vmem>>, vector<128x256xf32>
    %cst_30 = arith.constant dense<0.000000e+00> : vector<2x256xf32>
    %131 = tpu.matmul %129, %130, %cst_30 {dimension_numbers = #tpu.dot_dimension_numbers<[1], [0], [0], [1], [0, 0, 1, 1], [], []>} : vector<2x128xf32>, vector<128x256xf32>, vector<2x256xf32> -> vector<2x256xf32>
    %c0_31 = arith.constant 0 : index
    %c0_32 = arith.constant 0 : index
    %132 = vector.load %arg9[%c0_31, %c0_32] : memref<1x256xf32, #tpu.memory_space<vmem>>, vector<1x256xf32>
    %133 = vector.broadcast %132 : vector<1x256xf32> to vector<2x256xf32>
    %134 = arith.addf %131, %133 : vector<2x256xf32>
    %c0_33 = arith.constant 0 : index
    %c0_34 = arith.constant 0 : index
    %135 = vector.load %arg10[%c0_33, %c0_34] : memref<2x256xf32, #tpu.memory_space<vmem>>, vector<2x256xf32>
    tpu.vector_store %arg10[%c0_33, %c0_34], %134 {strides = array<i32>} : memref<2x256xf32, #tpu.memory_space<vmem>>, vector<2x256xf32>,
    return
  }
  func.func @transform_0(%arg0: i32) -> (i32, i32, i32, i32) {
    %c0_i32 = arith.constant 0 : i32
    %c0_i32_0 = arith.constant 0 : i32
    %c0_i32_1 = arith.constant 0 : i32
    %c0_i32_2 = arith.constant 0 : i32
    return %c0_i32, %c0_i32_0, %arg0, %c0_i32_1 : i32, i32, i32, i32
  }
  func.func @transform_1(%arg0: i32) -> (i32, i32) {
    %c0_i32 = arith.constant 0 : i32
    %c0_i32_0 = arith.constant 0 : i32
    %c0_i32_1 = arith.constant 0 : i32
    return %c0_i32, %c0_i32_0 : i32, i32
  }
  func.func @transform_2(%arg0: i32) -> (i32, i32) {
    %c0_i32 = arith.constant 0 : i32
    %c0_i32_0 = arith.constant 0 : i32
    %c0_i32_1 = arith.constant 0 : i32
    return %c0_i32, %c0_i32_0 : i32, i32
  }
  func.func @transform_3(%arg0: i32) -> (i32, i32) {
    %c0_i32 = arith.constant 0 : i32
    %c0_i32_0 = arith.constant 0 : i32
    %c0_i32_1 = arith.constant 0 : i32
    return %c0_i32, %c0_i32_0 : i32, i32
  }
  func.func @transform_4(%arg0: i32) -> (i32, i32) {
    %c0_i32 = arith.constant 0 : i32
    %c0_i32_0 = arith.constant 0 : i32
    %c0_i32_1 = arith.constant 0 : i32
    return %c0_i32, %c0_i32_0 : i32, i32
  }
  func.func @transform_5(%arg0: i32) -> (i32, i32) {
    %c0_i32 = arith.constant 0 : i32
    %c0_i32_0 = arith.constant 0 : i32
    %c0_i32_1 = arith.constant 0 : i32
    return %c0_i32, %c0_i32_0 : i32, i32
  }
  func.func @transform_6(%arg0: i32) -> (i32, i32) {
    %c0_i32 = arith.constant 0 : i32
    %c0_i32_0 = arith.constant 0 : i32
    %c0_i32_1 = arith.constant 0 : i32
    return %c0_i32, %c0_i32_0 : i32, i32
  }
  func.func @transform_7(%arg0: i32) -> (i32, i32) {
    %c0_i32 = arith.constant 0 : i32
    %c0_i32_0 = arith.constant 0 : i32
    %c0_i32_1 = arith.constant 0 : i32
    return %c0_i32, %c0_i32_0 : i32, i32
  }
  func.func @transform_8(%arg0: i32) -> (i32, i32) {
    %c0_i32 = arith.constant 0 : i32
    %c0_i32_0 = arith.constant 0 : i32
    %c0_i32_1 = arith.constant 0 : i32
    return %c0_i32, %c0_i32_0 : i32, i32
  }
  func.func @transform_9(%arg0: i32) -> (i32, i32) {
    %c0_i32 = arith.constant 0 : i32
    %c0_i32_0 = arith.constant 0 : i32
    return %arg0, %c0_i32 : i32, i32
  }
}

</mosaic_0001>

<bundles_post_ra>
// kernel: simple_cnn_forward.1
= control target key start
LH: loop header
LB: loop body
LE: loop exit
PB: predicated region body
PF: predicated region fallthrough
CT: control target
= control target key end

     0   :  { %14 = vsyncpa [#allocation3], 0  ;;  %s10395_s0 = inlined_call_operand.vmem [shape: f32[16,16,2,3], index: 0, kind: input, shape index: {}]   ;;  %s10396_s1 = inlined_call_operand.vmem [shape: f32[27,32], index: 1, kind: input, shape index: {}]   ;;  %s10397_s2 = inlined_call_operand.vmem [shape: f32[1,32], index: 2, kind: input, shape index: {}]   ;;  %s10398_s3 = inlined_call_operand.hbm [shape: f32[288,64], index: 3, kind: input, shape index: {}]   ;;  %s10399_s4 = inlined_call_operand.vmem [shape: f32[1,64], index: 4, kind: input, shape index: {}]   ;;  %s10400_s5 = inlined_call_operand.vmem [shape: f32[576,128], index: 5, kind: input, shape index: {}]   ;;  %s10401_s6 = inlined_call_operand.vmem [shape: f32[1,128], index: 6, kind: input, shape index: {}]   ;;  %s10402_s7 = inlined_call_operand.hbm [shape: f32[128,256], index: 7, kind: input, shape index: {}]   ;;  %s10403_s8 = inlined_call_operand.vmem [shape: f32[1,256], index: 8, kind: input, shape index: {}]   ;;  %s10404_s9 = inlined_call_operand.hbm [shape: f32[2,256], index: 9, kind: output, shape index: {}]  }
   0x1   :  { %15 = vsyncpa [#allocation6], 0 }
   0x2   :  { %16 = vsyncpa [#allocation4], 0  ;;  %s5511_s30 = smov [#allocation2]  }
   0x3   :  { %s28_s10 = sshll.u32 %s5511_s30, 4  ;;  %s29_s10 = int_to_ptr.vmem [resolvable:$true] %s28_s10 }
   0x4   :  { %s5453_s11 = scalar_lea.vmem %s29_s10, 4608  ;;  %p5458_p1 = scmp.lt.s32.totalorder %s29_s10, %s29_s10 }
   0x5   :  { %p5454_p0 = scmp.ne.s32.totalorder %s29_s10, %s5453_s11  ;;  %p5459_p2 = scmp.lt.s32.totalorder %s5453_s11, %s5453_s11 }
   0x7   :  { %p5460_p3 = por %p5459_p2, %p5458_p1 }
   0x9   :  { %p5461_p4 = pnand %p5460_p3, %p5454_p0 }
   0xb   :  { %5464 = shalt.err (!%p5461_p4)
}
   0xc   :  { %s5512_s12 = smov 128   ;;  %s5513_s13 = smov 8  }
   0xd   :  { %34 = dma.hbm_to_vmem [thread:$0]  %s10398_s3, 4608, %s29_s10, [#allocation3], %s5512_s12, %s5512_s12, %s5513_s13  }
   0xe   :  { %s5514_s16 = smov [#allocation5]  }
   0xf   :  { %s46_s17 = sshll.u32 %s5514_s16, 4  ;;  %s47_s17 = int_to_ptr.vmem [resolvable:$true] %s46_s17 }
  0x10   :  { %s5473_s18 = scalar_lea.vmem %s47_s17, 4096  ;;  %p5478_p6 = scmp.lt.s32.totalorder %s47_s17, %s47_s17 }
  0x11   :  { %p5474_p5 = scmp.ne.s32.totalorder %s47_s17, %s5473_s18  ;;  %p5479_p7 = scmp.lt.s32.totalorder %s5473_s18, %s5473_s18 }
  0x13   :  { %p5480_p8 = por %p5479_p7, %p5478_p6 }
  0x15   :  { %p5481_p9 = pnand %p5480_p8, %p5474_p5 }
  0x17   :  { %5484 = shalt.err (!%p5481_p9)
}
  0x18   :  { %s5515_s19 = smov 256   ;;  %s5516_s20 = smov 16  }
  0x19   :  { %52 = dma.hbm_to_vmem [thread:$0]  %s10402_s7, 4096, %s47_s17, [#allocation6], %s5515_s19, %s5515_s19, %s5516_s20  }
  0x1a   :  { %5505 = dma.done.wait [#allocation3], 4608  }
  0x1b   :  { %5506 = vsyncadd [#allocation3], 4294962688 }
  0x1c   :  { %5507 = dma.done.wait [#allocation6], 4096  }
  0x1d   :  { %5508 = vsyncadd [#allocation6], 4294963200  ;;  %v10405_v0 = vmov 0.0   ;;  %s5518_s3 = smov 3   ;;  %v5593_v1 = vld [vmem:[%s10395_s0 + $0x24] sm:$0x3] }
  0x1e   :  { %374 = vrot.lane.b32.xlu0 %v10405_v0, %s5518_s3  ;;  %v5598_v2 = vld [vmem:[%s10395_s0 + $0x20] sm:$0x3]  ;;  %378 = vrot.lane.b32.xlu1 %v5593_v1, %s5518_s3  ;;  %v5607_v3 = vld [vmem:[%s10395_s0 + $0x28] sm:$0x3]  ;;  %s5519_s17 = smov 6   ;;  %s5520_s18 = smov 9  }
  0x1f   :  { %v5612_v4 = vld [vmem:[%s10395_s0 + $0x2c] sm:$0x3]  ;;  %v5621_v5 = vld [vmem:[%s10395_s0 + $0x30] sm:$0x3]  ;;  %v5626_v6 = vld [vmem:[%s10395_s0 + $0x34] sm:$0x3] }
  0x20   :  { %v5635_v7 = vld [vmem:[%s10395_s0 + $0x38] sm:$0x3]  ;;  %v5640_v8 = vld [vmem:[%s10395_s0 + $0x3c] sm:$0x3]  ;;  %v5649_v9 = vld [vmem:[%s10395_s0 + $0x60] sm:$0x3] }
  0x21   :  { %v5654_v10 = vld [vmem:[%s10395_s0 + $0x64] sm:$0x3]  ;;  %v5663_v11 = vld [vmem:[%s10395_s0 + $0x68] sm:$0x3]  ;;  %v5668_v12 = vld [vmem:[%s10395_s0 + $0x6c] sm:$0x3] }
  0x22   :  { %376 = vrot.lane.b32.xlu0 %v5598_v2, %s5518_s3  ;;  %380 = vrot.lane.b32.xlu1 %v5607_v3, %s5518_s3  ;;  %v5677_v13 = vld [vmem:[%s10395_s0 + $0x70] sm:$0x3]  ;;  %v5682_v14 = vld [vmem:[%s10395_s0 + $0x74] sm:$0x3]  ;;  %s5521_s13 = smov 12   ;;  %s5522_s29 = smov 15  }
  0x23   :  { %v5691_v15 = vld [vmem:[%s10395_s0 + $0x78] sm:$0x3]  ;;  %v5696_v16 = vld [vmem:[%s10395_s0 + $0x7c] sm:$0x3]  ;;  %v5705_v17 = vld [vmem:[%s10395_s0 + $0xa0] sm:$0x3] }
  0x24   :  { %10464 = vst [vmem:[#allocation11_spill] sm:$0xff] %v5705_v17  ;;  %v5710_v18 = vld [vmem:[%s10395_s0 + $0xa4] sm:$0x3]  ;;  %v5719_v19 = vld [vmem:[%s10395_s0 + $0xa8] sm:$0x3]  ;;  %s5523_s22 = smov 18  }
  0x25   :  { %10465 = vst [vmem:[#allocation12_spill] sm:$0xff] %v5710_v18  ;;  %10466 = vst [vmem:[#allocation13_spill] sm:$0xff] %v5719_v19  ;;  %v5724_v20 = vld [vmem:[%s10395_s0 + $0xac] sm:$0x3]  ;;  %v5733_v21 = vld [vmem:[%s10395_s0 + $0xb0] sm:$0x3] }
  0x26   :  { %382 = vrot.lane.b32.xlu0 %v5612_v4, %s5518_s3  ;;  %384 = vrot.lane.b32.xlu1 %v5621_v5, %s5518_s3  ;;  %10467 = vst [vmem:[#allocation14_spill] sm:$0xff] %v5724_v20  ;;  %10468 = vst [vmem:[#allocation15_spill] sm:$0xff] %v5733_v21  ;;  %v5738_v22 = vld [vmem:[%s10395_s0 + $0xb4] sm:$0x3]  ;;  %v5747_v23 = vld [vmem:[%s10395_s0 + $0xb8] sm:$0x3] }
  0x27   :  { %10469 = vst [vmem:[#allocation16_spill] sm:$0xff] %v5738_v22  ;;  %10470 = vst [vmem:[#allocation17_spill] sm:$0xff] %v5747_v23  ;;  %v5752_v24 = vld [vmem:[%s10395_s0 + $0xbc] sm:$0x3]  ;;  %v173_v25 = vld [vmem:[%s10395_s0 + $0xe0] sm:$0x3] }
  0x28   :  { %10471 = vst [vmem:[#allocation18_spill] sm:$0xff] %v5752_v24  ;;  %v175_v26 = vld [vmem:[%s10395_s0 + $0xe4] sm:$0x3]  ;;  %v177_v27 = vld [vmem:[%s10395_s0 + $0xe8] sm:$0x3]  ;;  %s5524_s19 = smov 21  }
  0x29   :  { %v179_v28 = vld [vmem:[%s10395_s0 + $0xec] sm:$0x3]  ;;  %v181_v29 = vld [vmem:[%s10395_s0 + $0xf0] sm:$0x3]  ;;  %v183_v30 = vld [vmem:[%s10395_s0 + $0xf4] sm:$0x3] }
  0x2a   :  { %386 = vrot.lane.b32.xlu0 %v5626_v6, %s5518_s3  ;;  %388 = vrot.lane.b32.xlu1 %v5635_v7, %s5518_s3  ;;  %v64_v31 = vld [vmem:[%s10395_s0 + $0x6] sm:$0x3]  ;;  %v62_v32 = vld [vmem:[%s10395_s0 + $0x2] sm:$0x3]  ;;  %s5525_s20 = smov 24   ;;  %vm2912_vm0 = vcmask 1042432  }
  0x2b   :  { %v68_v33 = vld [vmem:[%s10395_s0 + $0xe] sm:$0x3]  ;;  %v66_v34 = vld [vmem:[%s10395_s0 + $0xa] sm:$0x3]  ;;  %v72_v35 = vld [vmem:[%s10395_s0 + $0x16] sm:$0x3] }
  0x2c   :  { %v70_v36 = vld [vmem:[%s10395_s0 + $0x12] sm:$0x3]  ;;  %v74_v37 = vld [vmem:[%s10395_s0 + $0x1a] sm:$0x3]  ;;  %v61_v38 = vld [vmem:[%s10395_s0] sm:$0x3] }
  0x2d   :  { %v63_v39 = vld [vmem:[%s10395_s0 + $0x4] sm:$0x3]  ;;  %v65_v40 = vld [vmem:[%s10395_s0 + $0x8] sm:$0x3]  ;;  %v67_v41 = vld [vmem:[%s10395_s0 + $0xc] sm:$0x3] }
  0x2e   :  { %390 = vrot.lane.b32.xlu0 %v5640_v8, %s5518_s3  ;;  %392 = vrot.lane.b32.xlu1 %v5649_v9, %s5518_s3  ;;  %v69_v42 = vld [vmem:[%s10395_s0 + $0x10] sm:$0x3]  ;;  %v71_v43 = vld [vmem:[%s10395_s0 + $0x14] sm:$0x3]  ;;  %vm2026_vm1 = vcmask 23552   ;;  %vm2084_vm2 = vcmask 48128  }
  0x2f   :  { %v73_v44 = vld [vmem:[%s10395_s0 + $0x18] sm:$0x3]  ;;  %v75_v45 = vld [vmem:[%s10395_s0 + $0x1c] sm:$0x3]  ;;  %v5852_v46 = vld [vmem:[%s10395_s0 + $0x22] sm:$0x3] }
  0x30   :  { %10472 = vst [vmem:[#allocation19_spill] sm:$0xff] %v5852_v46  ;;  %v5860_v47 = vld [vmem:[%s10395_s0 + $0x26] sm:$0x3]  ;;  %v5865_v48 = vld [vmem:[%s10395_s0 + $0x2a] sm:$0x3]  ;;  %vm2142_vm3 = vcmask 72704  }
  0x31   :  { %10473 = vst [vmem:[#allocation20_spill] sm:$0xff] %v5860_v47  ;;  %10474 = vst [vmem:[#allocation21_spill] sm:$0xff] %v5865_v48  ;;  %v5874_v49 = vld [vmem:[%s10395_s0 + $0x2e] sm:$0x3]  ;;  %v76_v51 = vld [vmem:[%s10395_s0 + $0x1e] sm:$0x3] }
  0x32   :  { %394 = vrot.lane.b32.xlu0 %v5654_v10, %s5518_s3  ;;  %396 = vrot.lane.b32.xlu1 %v5663_v11, %s5518_s3  ;;  %10475 = vst [vmem:[#allocation22_spill] sm:$0xff] %v5874_v49  ;;  %v5904_v56 = vld [vmem:[%s10395_s0 + $0x32] sm:$0x3]  ;;  %v5917_v59 = vld [vmem:[%s10395_s0 + $0x36] sm:$0x3]  ;;  %vm2207_vm4 = vcmask 97280  }
  0x33   :  { %10480 = vst [vmem:[#allocation27_spill] sm:$0xff] %v5904_v56  ;;  %10483 = vst [vmem:[#allocation30_spill] sm:$0xff] %v5917_v59  ;;  %v5922_v60 = vld [vmem:[%s10395_s0 + $0x3a] sm:$0x3]  ;;  %v5935_v63 = vld [vmem:[%s10395_s0 + $0x3e] sm:$0x3] }
  0x34   :  { %10484 = vst [vmem:[#allocation31_spill] sm:$0xff] %v5922_v60  ;;  %vm2272_vm5 = vcmask 121856   ;;  %vm2337_vm6 = vcmask 146432   ;;  %vm2402_vm7 = vcmask 171008   ;;  %vm2467_vm8 = vcmask 195584   ;;  %s5527_s14 = smov 32  }
  0x35   :  { %vm2879_vm9 = vcmask 220160   ;;  %vm3612_vm10 = vcmask 261120   ;;  %s5529_s15 = smov 96   ;;  %vm3626_vm11 = vcmask 523264   ;;  %vm3640_vm12 = vcmask 785408   ;;  %s5531_s16 = smov [#allocation7]  }
  0x36   :  { %398 = vrot.lane.b32.xlu0 %v5668_v12, %s5518_s3  ;;  %400 = vrot.lane.b32.xlu1 %v5677_v13, %s5518_s3  ;;  %vm5530_vm13 = vmmov 0   ;;  %vm4960_vm14 = vcmask 1041408   ;;  %s5102_s21 = sshll.u32 %s5531_s16, 4  ;;  %s5103_s21 = int_to_ptr.vmem [resolvable:$true] %s5102_s21 }
  0x37   :  { %p5490_p11 = scmp.lt.s32.totalorder %s5103_s21, %s5103_s21 }
  0x3a   :  { %402 = vrot.lane.b32.xlu0 %v5682_v14, %s5518_s3  ;;  %404 = vrot.lane.b32.xlu1 %v5691_v15, %s5518_s3 }
  0x3e   :  { %406 = vrot.lane.b32.xlu0 %v5696_v16, %s5518_s3  ;;  %408 = vrot.lane.b32.xlu1 %v5705_v17, %s5518_s3 }
  0x42   :  { %410 = vrot.lane.b32.xlu0 %v5710_v18, %s5518_s3  ;;  %412 = vrot.lane.b32.xlu1 %v5719_v19, %s5518_s3  ;;  %v129_v19 = vld [vmem:[%s10395_s0 + $0x88] sm:$0x3]  ;;  %v131_v18 = vld [vmem:[%s10395_s0 + $0x8c] sm:$0x3] }
  0x46   :  { %414 = vrot.lane.b32.xlu0 %v5724_v20, %s5518_s3  ;;  %416 = vrot.lane.b32.xlu1 %v5733_v21, %s5518_s3 }
  0x4a   :  { %418 = vrot.lane.b32.xlu0 %v5738_v22, %s5518_s3  ;;  %420 = vrot.lane.b32.xlu1 %v5747_v23, %s5518_s3  ;;  %v127_v22 = vld [vmem:[%s10395_s0 + $0x84] sm:$0x3] }
  0x4e   :  { %422 = vrot.lane.b32.xlu0 %v5752_v24, %s5518_s3  ;;  %424 = vrot.lane.b32.xlu1 %v173_v25, %s5518_s3  ;;  %v5940_v25 = vld [vmem:[%s10395_s0 + $0x42] sm:$0x3] }
  0x52   :  { %426 = vrot.lane.b32.xlu0 %v175_v26, %s5518_s3  ;;  %428 = vrot.lane.b32.xlu1 %v177_v27, %s5518_s3 }
  0x56   :  { %430 = vrot.lane.b32.xlu0 %v179_v28, %s5518_s3  ;;  %432 = vrot.lane.b32.xlu1 %v181_v29, %s5518_s3  ;;  %v5953_v28 = vld [vmem:[%s10395_s0 + $0x46] sm:$0x3]  ;;  %v5958_v29 = vld [vmem:[%s10395_s0 + $0x4a] sm:$0x3] }
  0x5a   :  { %434 = vrot.lane.b32.xlu0 %v183_v30, %s5518_s3  ;;  %601 = vrot.lane.b32.xlu1 %v10405_v0, %s5519_s17 }
  0x5e   :  { %828 = vrot.lane.b32.xlu0 %v10405_v0, %s5520_s18  ;;  %830 = vrot.lane.b32.xlu1 %v62_v32, %s5520_s18 }
  0x62   :  { %832 = vrot.lane.b32.xlu0 %v64_v31, %s5520_s18  ;;  %834 = vrot.lane.b32.xlu1 %v66_v34, %s5520_s18 }
  0x66   :  { %836 = vrot.lane.b32.xlu0 %v68_v33, %s5520_s18  ;;  %838 = vrot.lane.b32.xlu1 %v70_v36, %s5520_s18 }
  0x6a   :  { %840 = vrot.lane.b32.xlu0 %v72_v35, %s5520_s18  ;;  %842 = vrot.lane.b32.xlu1 %v74_v37, %s5520_s18 }
  0x6e   :  { %1063 = vrot.lane.b32.xlu0 %v61_v38, %s5521_s13  ;;  %1065 = vrot.lane.b32.xlu1 %v63_v39, %s5521_s13 }
  0x72   :  { %1067 = vrot.lane.b32.xlu0 %v65_v40, %s5521_s13  ;;  %1069 = vrot.lane.b32.xlu1 %v67_v41, %s5521_s13  ;;  %v6003_v40 = vld [vmem:[%s10395_s0 + $0x4e] sm:$0x3] }
  0x76   :  { %1071 = vrot.lane.b32.xlu0 %v69_v42, %s5521_s13  ;;  %1073 = vrot.lane.b32.xlu1 %v71_v43, %s5521_s13 }
  0x7a   :  { %1075 = vrot.lane.b32.xlu0 %v73_v44, %s5521_s13  ;;  %1077 = vrot.lane.b32.xlu1 %v75_v45, %s5521_s13  ;;  %v93_v44 = vld [vmem:[%s10395_s0 + $0x40] sm:$0x3]  ;;  %v95_v45 = vld [vmem:[%s10395_s0 + $0x44] sm:$0x3] }
  0x7e   :  { %1263 = vrot.lane.b32.xlu0 %v62_v32, %s5522_s29  ;;  %1265 = vrot.lane.b32.xlu1 %v64_v31, %s5522_s29 }
  0x82   :  { %1267 = vrot.lane.b32.xlu0 %v66_v34, %s5522_s29  ;;  %1269 = vrot.lane.b32.xlu1 %v68_v33, %s5522_s29 }
  0x86   :  { %603 = vrot.lane.b32.xlu0 %v5852_v46, %s5519_s17  ;;  %605 = vrot.lane.b32.xlu1 %v5860_v47, %s5519_s17 }
  0x8a   :  { %607 = vrot.lane.b32.xlu0 %v5865_v48, %s5519_s17  ;;  %609 = vrot.lane.b32.xlu1 %v5874_v49, %s5519_s17 }
  0x8e   :  { %1271 = vrot.lane.b32.xlu0 %v70_v36, %s5522_s29  ;;  %1273 = vrot.lane.b32.xlu1 %v72_v35, %s5522_s29 }
  0x90   :  { %v5879_v50 = vpop.permute.xlu0 %374  ;;  %v5886_v52 = vpop.permute.xlu1 %378 }
  0x91   :  { %10476 = vst [vmem:[#allocation23_spill] sm:$0xff] %v5886_v52 }
  0x92   :  { %1275 = vrot.lane.b32.xlu0 %v74_v37, %s5522_s29  ;;  %1277 = vrot.lane.b32.xlu1 %v76_v51, %s5522_s29 }
  0x94   :  { %v5888_v53 = vpop.permute.xlu0 %376  ;;  %v5893_v54 = vpop.permute.xlu1 %380 }
  0x95   :  { %10477 = vst [vmem:[#allocation24_spill] sm:$0xff] %v5888_v53  ;;  %10478 = vst [vmem:[#allocation25_spill] sm:$0xff] %v5893_v54  ;;  %v125_v53 = vld [vmem:[%s10395_s0 + $0x80] sm:$0x3] }
  0x96   :  { %1462 = vrot.lane.b32.xlu0 %v10405_v0, %s5523_s22  ;;  %1464 = vrot.lane.b32.xlu1 %v5852_v46, %s5523_s22 }
  0x98   :  { %v5895_v55 = vpop.permute.xlu0 %382  ;;  %v5906_v57 = vpop.permute.xlu1 %384 }
  0x99   :  { %10479 = vst [vmem:[#allocation26_spill] sm:$0xff] %v5895_v55  ;;  %10481 = vst [vmem:[#allocation28_spill] sm:$0xff] %v5906_v57  ;;  %v6256_v57 = vld [vmem:[%s10395_s0 + $0x7e] sm:$0x3]  ;;  %v6274_v55 = vld [vmem:[%s10395_s0 + $0x86] sm:$0x3] }
  0x9a   :  { %1466 = vrot.lane.b32.xlu0 %v5860_v47, %s5523_s22  ;;  %1468 = vrot.lane.b32.xlu1 %v5865_v48, %s5523_s22 }
  0x9c   :  { %v5908_v58 = vpop.permute.xlu0 %386  ;;  %v5924_v61 = vpop.permute.xlu1 %388 }
  0x9d   :  { %10482 = vst [vmem:[#allocation29_spill] sm:$0xff] %v5908_v58  ;;  %10485 = vst [vmem:[#allocation32_spill] sm:$0xff] %v5924_v61  ;;  %v6242_v58 = vld [vmem:[%s10395_s0 + $0x76] sm:$0x3] }
  0x9e   :  { %611 = vrot.lane.b32.xlu0 %v5904_v56, %s5519_s17  ;;  %613 = vrot.lane.b32.xlu1 %v5917_v59, %s5519_s17 }
  0xa0   :  { %v5926_v62 = vpop.permute.xlu0 %390  ;;  %v5942_v26 = vpop.permute.xlu1 %392 }
  0xa1   :  { %10486 = vst [vmem:[#allocation33_spill] sm:$0xff] %v5926_v62  ;;  %10487 = vst [vmem:[#allocation34_spill] sm:$0xff] %v5942_v26  ;;  %v108_v26 = vld [vmem:[%s10395_s0 + $0x5e] sm:$0x3] }
  0xa2   :  { %615 = vrot.lane.b32.xlu0 %v5922_v60, %s5519_s17  ;;  %617 = vrot.lane.b32.xlu1 %v5935_v63, %s5519_s17 }
  0xa4   :  { %v5944_v27 = vpop.permute.xlu0 %394  ;;  %v5960_v30 = vpop.permute.xlu1 %396 }
  0xa5   :  { %10488 = vst [vmem:[#allocation35_spill] sm:$0xff] %v5944_v27  ;;  %10489 = vst [vmem:[#allocation36_spill] sm:$0xff] %v5960_v30 }
  0xa6   :  { %844 = vrot.lane.b32.xlu0 %v5940_v25, %s5520_s18  ;;  %846 = vrot.lane.b32.xlu1 %v5953_v28, %s5520_s18 }
  0xa8   :  { %v5962_v31 = vpop.permute.xlu0 %398  ;;  %v5968_v32 = vpop.permute.xlu1 %400 }
  0xa9   :  { %10490 = vst [vmem:[#allocation37_spill] sm:$0xff] %v5962_v31  ;;  %10491 = vst [vmem:[#allocation38_spill] sm:$0xff] %v5968_v32  ;;  %v6185_v32 = vld [vmem:[%s10395_s0 + $0x6a] sm:$0x3]  ;;  %v6190_v31 = vld [vmem:[%s10395_s0 + $0x6e] sm:$0x3] }
  0xaa   :  { %848 = vrot.lane.b32.xlu0 %v5958_v29, %s5520_s18  ;;  %1470 = vrot.lane.b32.xlu1 %v5874_v49, %s5523_s22 }
  0xac   :  { %v5970_v33 = vpop.permute.xlu0 %402  ;;  %v5976_v34 = vpop.permute.xlu1 %404 }
  0xad   :  { %10492 = vst [vmem:[#allocation39_spill] sm:$0xff] %v5970_v33  ;;  %10493 = vst [vmem:[#allocation40_spill] sm:$0xff] %v5976_v34 }
  0xae   :  { %1472 = vrot.lane.b32.xlu0 %v5904_v56, %s5523_s22  ;;  %1474 = vrot.lane.b32.xlu1 %v5917_v59, %s5523_s22 }
  0xb0   :  { %v5978_v35 = vpop.permute.xlu0 %406  ;;  %v5984_v36 = vpop.permute.xlu1 %408 }
  0xb1   :  { %10494 = vst [vmem:[#allocation41_spill] sm:$0xff] %v5978_v35  ;;  %10495 = vst [vmem:[#allocation42_spill] sm:$0xff] %v5984_v36  ;;  %v2534_v36 = vld [vmem:[%s10396_s1 + $0x10] sm:$0xff] }
  0xb2   :  { %1476 = vrot.lane.b32.xlu0 %v5922_v60, %s5523_s22  ;;  %1641 = vrot.lane.b32.xlu1 %v5598_v2, %s5524_s19  ;;  %v6008_v2 = vld [vmem:[%s10395_s0 + $0x52] sm:$0x3] }
  0xb4   :  { %v5986_v37 = vpop.permute.xlu0 %410  ;;  %v5992_v38 = vpop.permute.xlu1 %412 }
  0xb5   :  { %10496 = vst [vmem:[#allocation43_spill] sm:$0xff] %v5986_v37  ;;  %10497 = vst [vmem:[#allocation44_spill] sm:$0xff] %v5992_v38 }
  0xb6   :  { %1643 = vrot.lane.b32.xlu0 %v5593_v1, %s5524_s19  ;;  %1645 = vrot.lane.b32.xlu1 %v5607_v3, %s5524_s19  ;;  %v6021_v3 = vld [vmem:[%s10395_s0 + $0x56] sm:$0x3] }
  0xb8   :  { %v5994_v39 = vpop.permute.xlu0 %414  ;;  %v6010_v1 = vpop.permute.xlu1 %416 }
  0xb9   :  { %10498 = vst [vmem:[#allocation45_spill] sm:$0xff] %v5994_v39  ;;  %10499 = vst [vmem:[#allocation46_spill] sm:$0xff] %v6010_v1 }
  0xba   :  { %1647 = vrot.lane.b32.xlu0 %v5612_v4, %s5524_s19  ;;  %850 = vrot.lane.b32.xlu1 %v6003_v40, %s5520_s18  ;;  %v6026_v4 = vld [vmem:[%s10395_s0 + $0x5a] sm:$0x3] }
  0xbc   :  { %v6012_v41 = vpop.permute.xlu0 %418  ;;  %v6028_v42 = vpop.permute.xlu1 %420 }
  0xbd   :  { %10500 = vst [vmem:[#allocation47_spill] sm:$0xff] %v6012_v41  ;;  %10501 = vst [vmem:[#allocation48_spill] sm:$0xff] %v6028_v42  ;;  %v99_v42 = vld [vmem:[%s10395_s0 + $0x4c] sm:$0x3] }
  0xbe   :  { %852 = vrot.lane.b32.xlu0 %v6008_v2, %s5520_s18  ;;  %854 = vrot.lane.b32.xlu1 %v6021_v3, %s5520_s18 }
  0xc0   :  { %v6030_v43 = vpop.permute.xlu0 %422  ;;  %v6042_v51 = vpop.permute.xlu1 %424 }
  0xc1   :  { %10502 = vst [vmem:[#allocation49_spill] sm:$0xff] %v6030_v43  ;;  %10503 = vst [vmem:[#allocation50_spill] sm:$0xff] %v6042_v51  ;;  %v97_v43 = vld [vmem:[%s10395_s0 + $0x48] sm:$0x3] }
  0xc2   :  { %856 = vrot.lane.b32.xlu0 %v6026_v4, %s5520_s18  ;;  %1079 = vrot.lane.b32.xlu1 %v93_v44, %s5521_s13 }
  0xc4   :  { %v6044_v0 = vpop.permute.xlu0 %426  ;;  %v6054_v41 = vpop.permute.xlu1 %428 }
  0xc5   :  { %10504 = vst [vmem:[#allocation51_spill] sm:$0xff] %v6044_v0  ;;  %10505 = vst [vmem:[#allocation52_spill] sm:$0xff] %v6054_v41  ;;  %v107_v41 = vld [vmem:[%s10395_s0 + $0x5c] sm:$0x3] }
  0xc6   :  { %1081 = vrot.lane.b32.xlu0 %v95_v45, %s5521_s13  ;;  %1083 = vrot.lane.b32.xlu1 %v97_v43, %s5521_s13 }
  0xc8   :  { %v6056_v1 = vpop.permute.xlu0 %430  ;;  %v6060_v0 = vpop.permute.xlu1 %432 }
  0xc9   :  { %10506 = vst [vmem:[#allocation53_spill] sm:$0xff] %v6056_v1  ;;  %10507 = vst [vmem:[#allocation54_spill] sm:$0xff] %v6060_v0  ;;  %v105_v1 = vld [vmem:[%s10395_s0 + $0x58] sm:$0x3] }
  0xca   :  { %1085 = vrot.lane.b32.xlu0 %v99_v42, %s5521_s13  ;;  %1649 = vrot.lane.b32.xlu1 %v5621_v5, %s5524_s19 }
  0xcc   :  { %v6062_v44 = vpop.permute.xlu0 %434  ;;  %v6068_v45 = vpop.permute.xlu1 %601 }
  0xcd   :  { %10508 = vst [vmem:[#allocation55_spill] sm:$0xff] %v6062_v44 }
  0xce   :  { %1651 = vrot.lane.b32.xlu0 %v5626_v6, %s5524_s19  ;;  %1653 = vrot.lane.b32.xlu1 %v5635_v7, %s5524_s19  ;;  %v101_v7 = vld [vmem:[%s10395_s0 + $0x50] sm:$0x3] }
  0xd0   :  { %v6070_v51 = vpop.permute.xlu0 %828  ;;  %v6078_v43 = vpop.permute.xlu1 %830 }
  0xd1   :  { %10509 = vst [vmem:[#allocation56_spill] sm:$0xff] %v6070_v51 }
  0xd2   :  { %1655 = vrot.lane.b32.xlu0 %v5640_v8, %s5524_s19  ;;  %1834 = vrot.lane.b32.xlu1 %v5852_v46, %s5525_s20  ;;  %v103_v8 = vld [vmem:[%s10395_s0 + $0x54] sm:$0x3] }
  0xd4   :  { %v6076_v42 = vpop.permute.xlu0 %832  ;;  %v6086_v6 = vpop.permute.xlu1 %834 }
  0xd6   :  { %1836 = vrot.lane.b32.xlu0 %v5860_v47, %s5525_s20  ;;  %1838 = vrot.lane.b32.xlu1 %v5865_v48, %s5525_s20  ;;  %v6279_v47 = vld [vmem:[%s10395_s0 + $0x8a] sm:$0x3] }
  0xd8   :  { %v6084_v5 = vpop.permute.xlu0 %836  ;;  %v6100_v0 = vpop.permute.xlu1 %838 }
  0xda   :  { %1840 = vrot.lane.b32.xlu0 %v5874_v49, %s5525_s20  ;;  %1087 = vrot.lane.b32.xlu1 %v101_v7, %s5521_s13  ;;  %v2535_v7 = vld [vmem:[%s10396_s1 + $0x18] sm:$0x7] }
  0xdb   :  { %5309 = vmatprep.subr.msk.mxu1 %vm2912_vm0, %v2535_v7  ;;  %v6247_v49 = vld [vmem:[%s10395_s0 + $0x7a] sm:$0x3] }
  0xdc   :  { %v6098_v44 = vpop.permute.xlu0 %840  ;;  %v6110_v39 = vpop.permute.xlu1 %842  ;;  %5310 = vmatpush3.msk.msra.mxu1 %vm2912_vm0, %v2535_v7  ;;  %v2532_v7 = vld [vmem:[%s10396_s1] sm:$0xff] }
  0xdd   :  { %5311 = vmatprep.subr.mxu1 %v2534_v36 }
  0xde   :  { %1089 = vrot.lane.b32.xlu0 %v103_v8, %s5521_s13  ;;  %1091 = vrot.lane.b32.xlu1 %v105_v1, %s5521_s13  ;;  %v2533_v1 = vld [vmem:[%s10396_s1 + $0x8] sm:$0xff] }
  0xdf   :  { %5312 = vmatpush3.msra.mxu1 %v2534_v36 }
  0xe0   :  { %v6112_v38 = vpop.permute.xlu0 %1063  ;;  %v6119_v8 = vpop.permute.xlu1 %1065  ;;  %5313 = vmatprep.subr.mxu1 %v2533_v1 }
  0xe1   :  { %5314 = vmatpush3.msra.mxu1 %v2533_v1  ;;  %v6167_v1 = vld [vmem:[%s10395_s0 + $0x62] sm:$0x3] }
  0xe2   :  { %1093 = vrot.lane.b32.xlu0 %v107_v41, %s5521_s13  ;;  %1279 = vrot.lane.b32.xlu1 %v5940_v25, %s5522_s29 }
  0xe3   :  { %5315 = vmatprep.subr.mxu1 %v2532_v7 }
  0xe4   :  { %v6121_v37 = vpop.permute.xlu0 %1067  ;;  %v6133_v41 = vpop.permute.xlu1 %1069  ;;  %5316 = vmatpush3.msra.mxu1 %v2532_v7  ;;  %v6172_v7 = vld [vmem:[%s10395_s0 + $0x66] sm:$0x3] }
  0xe6   :  { %1281 = vrot.lane.b32.xlu0 %v5953_v28, %s5522_s29  ;;  %1283 = vrot.lane.b32.xlu1 %v5958_v29, %s5522_s29 }
  0xe8   :  { %v6135_v35 = vpop.permute.xlu0 %1071  ;;  %v6144_v25 = vpop.permute.xlu1 %1073 }
  0xea   :  { %1285 = vrot.lane.b32.xlu0 %v6003_v40, %s5522_s29  ;;  %1842 = vrot.lane.b32.xlu1 %v5904_v56, %s5525_s20 }
  0xec   :  { %v6146_v28 = vpop.permute.xlu0 %1075  ;;  %v6152_v36 = vpop.permute.xlu1 %1077 }
  0xee   :  { %1844 = vrot.lane.b32.xlu0 %v5917_v59, %s5525_s20  ;;  %1846 = vrot.lane.b32.xlu1 %v5922_v60, %s5525_s20 }
  0xf0   :  { %v6154_v34 = vpop.permute.xlu0 %1263  ;;  %v6160_v29 = vpop.permute.xlu1 %1265 }
  0xf2   :  { %1848 = vrot.lane.b32.xlu0 %v5935_v63, %s5525_s20  ;;  %619 = vrot.lane.b32.xlu1 %v6167_v1, %s5519_s17 }
  0xf4   :  { %v6162_v40 = vpop.permute.xlu0 %1267  ;;  %v6178_v63 = vpop.permute.xlu1 %1269 }
  0xf6   :  { %621 = vrot.lane.b32.xlu0 %v6172_v7, %s5519_s17  ;;  %623 = vrot.lane.b32.xlu1 %v6185_v32, %s5519_s17 }
  0xf8   :  { %v6180_v33 = vpop.permute.xlu0 %603  ;;  %v6196_v30 = vpop.permute.xlu1 %605 }
  0xf9   :  { %10510 = vst [vmem:[#allocation57_spill] sm:$0xff] %v6180_v33  ;;  %10511 = vst [vmem:[#allocation58_spill] sm:$0xff] %v6196_v30 }
  0xfa   :  { %625 = vrot.lane.b32.xlu0 %v6190_v31, %s5519_s17  ;;  %1287 = vrot.lane.b32.xlu1 %v6008_v2, %s5522_s29 }
  0xfc   :  { %v6198_v27 = vpop.permute.xlu0 %607  ;;  %v6207_v60 = vpop.permute.xlu1 %609 }
  0xfd   :  { %10512 = vst [vmem:[#allocation59_spill] sm:$0xff] %v6198_v27  ;;  %10513 = vst [vmem:[#allocation60_spill] sm:$0xff] %v6207_v60  ;;  %v6261_v60 = vld [vmem:[%s10395_s0 + $0x82] sm:$0x3] }
  0xfe   :  { %1289 = vrot.lane.b32.xlu0 %v6021_v3, %s5522_s29  ;;  %1291 = vrot.lane.b32.xlu1 %v6026_v4, %s5522_s29  ;;  %v6229_v4 = vld [vmem:[%s10395_s0 + $0x72] sm:$0x3] }
 0x100   :  { %v6209_v62 = vpop.permute.xlu0 %1271  ;;  %v6214_v59 = vpop.permute.xlu1 %1273 }
 0x102   :  { %1293 = vrot.lane.b32.xlu0 %v108_v26, %s5522_s29  ;;  %1478 = vrot.lane.b32.xlu1 %v6167_v1, %s5523_s22 }
 0x104   :  { %v6216_v61 = vpop.permute.xlu0 %1275  ;;  %v6222_v2 = vpop.permute.xlu1 %1277 }
 0x106   :  { %1480 = vrot.lane.b32.xlu0 %v6172_v7, %s5523_s22  ;;  %1482 = vrot.lane.b32.xlu1 %v6185_v32, %s5523_s22 }
 0x108   :  { %v6224_v3 = vpop.permute.xlu0 %1462  ;;  %v6235_v26 = vpop.permute.xlu1 %1464 }
 0x109   :  { %10514 = vst [vmem:[#allocation61_spill] sm:$0xff] %v6224_v3 }
 0x10a   :  { %627 = vrot.lane.b32.xlu0 %v6229_v4, %s5519_s17  ;;  %629 = vrot.lane.b32.xlu1 %v6242_v58, %s5519_s17 }
 0x10c   :  { %v6237_v56 = vpop.permute.xlu0 %1466  ;;  %v6263_v27 = vpop.permute.xlu1 %1468 }
 0x10e   :  { %631 = vrot.lane.b32.xlu0 %v6247_v49, %s5519_s17  ;;  %633 = vrot.lane.b32.xlu1 %v6256_v57, %s5519_s17 }
 0x110   :  { %v6265_v48 = vpop.permute.xlu0 %611  ;;  %v6281_v54 = vpop.permute.xlu1 %613 }
 0x111   :  { %10515 = vst [vmem:[#allocation62_spill] sm:$0xff] %v6265_v48  ;;  %10516 = vst [vmem:[#allocation63_spill] sm:$0xff] %v6281_v54 }
 0x112   :  { %858 = vrot.lane.b32.xlu0 %v6261_v60, %s5520_s18  ;;  %860 = vrot.lane.b32.xlu1 %v6274_v55, %s5520_s18 }
 0x114   :  { %v6283_v30 = vpop.permute.xlu0 %615  ;;  %v6289_v48 = vpop.permute.xlu1 %617 }
 0x115   :  { %10517 = vst [vmem:[#allocation64_spill] sm:$0xff] %v6283_v30  ;;  %10518 = vst [vmem:[#allocation65_spill] sm:$0xff] %v6289_v48 }
 0x116   :  { %862 = vrot.lane.b32.xlu0 %v6279_v47, %s5520_s18  ;;  %1484 = vrot.lane.b32.xlu1 %v6190_v31, %s5523_s22 }
 0x118   :  { %v6291_v46 = vpop.permute.xlu0 %844  ;;  %v6297_v52 = vpop.permute.xlu1 %846 }
 0x119   :  { %10519 = vst [vmem:[#allocation66_spill] sm:$0xff] %v6291_v46  ;;  %10520 = vst [vmem:[#allocation67_spill] sm:$0xff] %v6297_v52 }
 0x11a   :  { %1486 = vrot.lane.b32.xlu0 %v6229_v4, %s5523_s22  ;;  %1488 = vrot.lane.b32.xlu1 %v6242_v58, %s5523_s22 }
 0x11c   :  { %v6299_v54 = vpop.permute.xlu0 %848  ;;  %v6305_v30 = vpop.permute.xlu1 %1470 }
 0x11d   :  { %10521 = vst [vmem:[#allocation68_spill] sm:$0xff] %v6299_v54  ;;  %v6324_v54 = vld [vmem:[%s10395_s0 + $0x8e] sm:$0x3] }
 0x11e   :  { %1490 = vrot.lane.b32.xlu0 %v6247_v49, %s5523_s22  ;;  %1657 = vrot.lane.b32.xlu1 %v5649_v9, %s5524_s19  ;;  %v6329_v9 = vld [vmem:[%s10395_s0 + $0x92] sm:$0x3] }
 0x120   :  { %v6307_v48 = vpop.permute.xlu0 %1472  ;;  %v6313_v46 = vpop.permute.xlu1 %1474 }
 0x122   :  { %1659 = vrot.lane.b32.xlu0 %v5654_v10, %s5524_s19  ;;  %1661 = vrot.lane.b32.xlu1 %v5663_v11, %s5524_s19  ;;  %v6342_v11 = vld [vmem:[%s10395_s0 + $0x96] sm:$0x3] }
 0x124   :  { %v6315_v52 = vpop.permute.xlu0 %1476  ;;  %v6331_v10 = vpop.permute.xlu1 %1641 }
 0x126   :  { %1663 = vrot.lane.b32.xlu0 %v5668_v12, %s5524_s19  ;;  %864 = vrot.lane.b32.xlu1 %v6324_v54, %s5520_s18  ;;  %v6347_v12 = vld [vmem:[%s10395_s0 + $0x9a] sm:$0x3] }
 0x127   :  { %10522 = vst [vmem:[#allocation69_spill] sm:$0xff] %v6347_v12 }
 0x128   :  { %v6333_v33 = vpop.permute.xlu0 %1643  ;;  %v6349_v24 = vpop.permute.xlu1 %1645 }
 0x12a   :  { %866 = vrot.lane.b32.xlu0 %v6329_v9, %s5520_s18  ;;  %868 = vrot.lane.b32.xlu1 %v6342_v11, %s5520_s18 }
 0x12c   :  { %v6351_v23 = vpop.permute.xlu0 %1647  ;;  %v6363_v21 = vpop.permute.xlu1 %850 }
 0x12d   :  { %10523 = vst [vmem:[#allocation70_spill] sm:$0xff] %v6363_v21 }
 0x12e   :  { %870 = vrot.lane.b32.xlu0 %v6347_v12, %s5520_s18  ;;  %1095 = vrot.lane.b32.xlu1 %v125_v53, %s5521_s13 }
 0x130   :  { %v6365_v20 = vpop.permute.xlu0 %852  ;;  %v6375_v17 = vpop.permute.xlu1 %854 }
 0x131   :  { %10524 = vst [vmem:[#allocation71_spill] sm:$0xff] %v6365_v20  ;;  %10525 = vst [vmem:[#allocation72_spill] sm:$0xff] %v6375_v17 }
 0x132   :  { %1097 = vrot.lane.b32.xlu0 %v127_v22, %s5521_s13  ;;  %1099 = vrot.lane.b32.xlu1 %v129_v19, %s5521_s13 }
 0x134   :  { %v6377_v12 = vpop.permute.xlu0 %856  ;;  %v6381_v20 = vpop.permute.xlu1 %1079 }
 0x135   :  { %10526 = vst [vmem:[#allocation73_spill] sm:$0xff] %v6377_v12 }
 0x136   :  { %1101 = vrot.lane.b32.xlu0 %v131_v18, %s5521_s13  ;;  %1665 = vrot.lane.b32.xlu1 %v5677_v13, %s5524_s19  ;;  %v2027_v18 = vsel %vm2026_vm1, 0.0, %v5879_v50  ;;  %v2612_v50 = vlaneseq }
 0x138   :  { %v6383_v53 = vpop.permute.xlu0 %1081  ;;  %v6389_v22 = vpop.permute.xlu1 %1083 }
 0x13a   :  { %1667 = vrot.lane.b32.xlu0 %v5682_v14, %s5524_s19  ;;  %1669 = vrot.lane.b32.xlu1 %v5691_v15, %s5524_s19  ;;  %v6405_v14 = vsel %vm2084_vm2, %v2027_v18, %v6068_v45  ;;  %v5526_v15 = vmov 1983009808  }
 0x13b   :  { %v2144_v12 = vsel %vm2142_vm3, %v6405_v14, %v6078_v43  ;;  %v2143_v45 = vsel %vm2142_vm3, %v6405_v14, %v6070_v51 }
 0x13c   :  { %v6391_v21 = vpop.permute.xlu0 %1085  ;;  %v6399_v19 = vpop.permute.xlu1 %1649 }
 0x13e   :  { %1671 = vrot.lane.b32.xlu0 %v5696_v16, %s5524_s19  ;;  %1850 = vrot.lane.b32.xlu1 %v6167_v1, %s5525_s20  ;;  %v2610_v16 = vunpack.c.l.s4 %v5526_v15  ;;  %v2208_v1 = vsel %vm2207_vm4, %v2143_v45, %v6112_v38 }
 0x13f   :  { %v2273_v15 = vsel %vm2272_vm5, %v2208_v1, %v6154_v34  ;;  %v133_v34 = vld [vmem:[%s10395_s0 + $0x90] sm:$0x3] }
 0x140   :  { %v6401_v13 = vpop.permute.xlu0 %1651  ;;  %v6417_v18 = vpop.permute.xlu1 %1653 }
 0x142   :  { %1852 = vrot.lane.b32.xlu0 %v6172_v7, %s5525_s20  ;;  %v2209_v7 = vsel %vm2207_vm4, %v2144_v12, %v6119_v8  ;;  %1854 = vrot.lane.b32.xlu1 %v6185_v32, %s5525_s20  ;;  %v2338_v8 = vsel %vm2337_vm6, %v2273_v15, %v6224_v3  ;;  %v2611_v12 = vunpack.c.0.s8 %v2610_v16  ;;  %v6443_v32 = vshrl.u32 %v2612_v50, 7 }
 0x143   :  { %v2274_v43 = vsel %vm2272_vm5, %v2209_v7, %v6160_v29  ;;  %v135_v29 = vld [vmem:[%s10395_s0 + $0x94] sm:$0x3]  ;;  %v2403_v45 = vsel %vm2402_vm7, %v2338_v8, %v6331_v10 }
 0x144   :  { %v6419_v17 = vpop.permute.xlu0 %1655  ;;  %v2339_v38 = vsel %vm2337_vm6, %v2274_v43, %v6235_v26  ;;  %10527 = vst [vmem:[#allocation74_spill] sm:$0xff] %v6443_v32  ;;  %v2146_v26 = vsel %vm2142_vm3, %v6405_v14, %v6086_v6  ;;  %v1835_v7 = vpop.permute.xlu1 %1834 }
 0x145   :  { %v2404_v1 = vsel %vm2402_vm7, %v2339_v38, %v6333_v33  ;;  %v2211_v50 = vsel %vm2207_vm4, %v2146_v26, %v6133_v41  ;;  %v137_v41 = vld [vmem:[%s10395_s0 + $0x98] sm:$0x3] }
 0x146   :  { %1856 = vrot.lane.b32.xlu0 %v6190_v31, %s5525_s20  ;;  %v2145_v31 = vsel %vm2142_vm3, %v6405_v14, %v6076_v42  ;;  %v2468_v42 = vsel %vm2467_vm8, %v2403_v45, %v1835_v7  ;;  %v2276_v10 = vsel %vm2272_vm5, %v2211_v50, %v6178_v63  ;;  %1103 = vrot.lane.b32.xlu1 %v133_v34, %s5521_s13 }
 0x147   :  { %v2210_v16 = vsel %vm2207_vm4, %v2145_v31, %v6121_v37  ;;  %v2341_v37 = vsel %vm2337_vm6, %v2276_v10, %v6263_v27 }
 0x148   :  { %v1837_v15 = vpop.permute.xlu0 %1836  ;;  %v2275_v6 = vsel %vm2272_vm5, %v2210_v16, %v6162_v40  ;;  %v139_v40 = vld [vmem:[%s10395_s0 + $0x9c] sm:$0x3]  ;;  %v2406_v38 = vsel %vm2402_vm7, %v2341_v37, %v6351_v23  ;;  %v1839_v34 = vpop.permute.xlu1 %1838 }
 0x149   :  { %v2469_v43 = vsel %vm2467_vm8, %v2404_v1, %v1837_v15  ;;  %v2340_v33 = vsel %vm2337_vm6, %v2275_v6, %v6237_v56 }
 0x14a   :  { %1105 = vrot.lane.b32.xlu0 %v135_v29, %s5521_s13  ;;  %v2405_v63 = vsel %vm2402_vm7, %v2340_v33, %v6349_v24  ;;  %v2607_v8 = vcombine.low %v2468_v42, %v2469_v43  ;;  %v6482_v29 = vsub.s32 %v2611_v12, %v6443_v32  ;;  %1107 = vrot.lane.b32.xlu1 %v137_v41, %s5521_s13  ;;  %v6586_v41 = vld [vmem:[%s10395_s0 + $0xaa] sm:$0x3] }
 0x14b   :  { %v2470_v27 = vsel %vm2467_vm8, %v2405_v63, %v1839_v34 }
 0x14c   :  { %v1841_v56 = vpop.permute.xlu0 %1840  ;;  %v6488_v45 = vpop.permute.xlu1 %1087  ;;  %v2615_v23 = vrot.slane %v2607_v8, %v6482_v29 }
 0x14d   :  { %v2471_v31 = vsel %vm2467_vm8, %v2406_v38, %v1841_v56  ;;  %v140_v56 = vld [vmem:[%s10395_s0 + $0x9e] sm:$0x3] }
 0x14e   :  { %v2608_v26 = vcombine.low %v2470_v27, %v2471_v31  ;;  %1109 = vrot.lane.b32.xlu0 %v139_v40, %s5521_s13  ;;  %1295 = vrot.lane.b32.xlu1 %v6261_v60, %s5522_s29 }
 0x150   :  { %v6490_v24 = vpop.permute.xlu0 %1089  ;;  %v2622_v1 = vrot.slane %v2608_v26, %v6482_v29  ;;  %v6498_v7 = vpop.permute.xlu1 %1091  ;;  %v10530_v26 = vld [vmem:[#allocation69_spill] sm:$0xff] }
 0x152   :  { %1297 = vrot.lane.b32.xlu0 %v6274_v55, %s5522_s29  ;;  %v2623_v12 = vcombine.low %v2615_v23, %v2622_v1  ;;  %1299 = vrot.lane.b32.xlu1 %v6279_v47, %s5522_s29  ;;  %v2147_v55 = vsel %vm2142_vm3, %v6405_v14, %v6084_v5  ;;  %v2148_v47 = vsel %vm2142_vm3, %v6405_v14, %v6100_v0 }
 0x153   :  { %v2212_v42 = vsel %vm2207_vm4, %v2147_v55, %v6135_v35 }
 0x154   :  { %5317 = vmatprep.mubr.msk.f32.mxu1 %vm2879_vm9, %v2623_v12  ;;  %v6501_v15 = vpop.permute.xlu0 %1093  ;;  %v6507_v16 = vpop.permute.xlu1 %1279  ;;  %v6635_v12 = vld [vmem:[%s10395_s0 + $0xb2] sm:$0x3] }
 0x156   :  { %1301 = vrot.lane.b32.xlu0 %v6324_v54, %s5522_s29  ;;  %1858 = vrot.lane.b32.xlu1 %v6229_v4, %s5525_s20  ;;  %v2213_v4 = vsel %vm2207_vm4, %v2148_v47, %v6144_v25  ;;  %v2149_v25 = vsel %vm2142_vm3, %v6405_v14, %v6098_v44 }
 0x157   :  { %v2278_v5 = vsel %vm2272_vm5, %v2213_v4, %v6214_v59  ;;  %v2150_v59 = vsel %vm2142_vm3, %v6405_v14, %v6110_v39  ;;  %v2214_v39 = vsel %vm2207_vm4, %v2149_v25, %v6146_v28  ;;  %v6653_v4 = vld [vmem:[%s10395_s0 + $0xba] sm:$0x3]  ;;  %v6680_v25 = vld [vmem:[%s10395_s0 + $0xc6] sm:$0x3] }
 0x158   :  { %v6509_v50 = vpop.permute.xlu0 %1281  ;;  %v6521_v60 = vpop.permute.xlu1 %1283  ;;  %v2343_v35 = vsel %vm2337_vm6, %v2278_v5, %v6307_v48  ;;  %v6554_v48 = vld [vmem:[%s10395_s0 + $0xa2] sm:$0x3]  ;;  %v2215_v44 = vsel %vm2207_vm4, %v2150_v59, %v6152_v36  ;;  %v2279_v14 = vsel %vm2272_vm5, %v2214_v39, %v6216_v61  ;;  %v6685_v59 = vld [vmem:[%s10395_s0 + $0xca] sm:$0x3] }
 0x159   :  { %v2280_v6 = vsel %vm2272_vm5, %v2215_v44, %v6222_v2  ;;  %v2344_v28 = vsel %vm2337_vm6, %v2279_v14, %v6313_v46  ;;  %v6591_v46 = vld [vmem:[%s10395_s0 + $0xae] sm:$0x3]  ;;  %v6667_v5 = vld [vmem:[%s10395_s0 + $0xc2] sm:$0x3]  ;;  %v10537_v14 = vld [vmem:[#allocation11_spill] sm:$0xff] }
 0x15a   :  { %1860 = vrot.lane.b32.xlu0 %v6242_v58, %s5525_s20  ;;  %v2277_v58 = vsel %vm2272_vm5, %v2212_v42, %v6209_v62  ;;  %1862 = vrot.lane.b32.xlu1 %v6247_v49, %s5525_s20  ;;  %v2345_v36 = vsel %vm2337_vm6, %v2280_v6, %v6315_v52  ;;  %v2409_v10 = vsel %vm2402_vm7, %v2344_v28, %v6417_v18  ;;  %v6648_v42 = vld [vmem:[%s10395_s0 + $0xb6] sm:$0x3]  ;;  %v10538_v6 = vld [vmem:[#allocation12_spill] sm:$0xff] }
 0x15b   :  { %v2342_v0 = vsel %vm2337_vm6, %v2277_v58, %v6305_v30  ;;  %v6559_v30 = vld [vmem:[%s10395_s0 + $0xa6] sm:$0x3]  ;;  %v2410_v61 = vsel %vm2402_vm7, %v2345_v36, %v6419_v17  ;;  %v6662_v58 = vld [vmem:[%s10395_s0 + $0xbe] sm:$0x3] }
 0x15c   :  { %v6523_v54 = vpop.permute.xlu0 %1285  ;;  %v2407_v49 = vsel %vm2402_vm7, %v2342_v0, %v6399_v19  ;;  %v1843_v62 = vpop.permute.xlu1 %1842 }
 0x15d   :  { %v2472_v19 = vsel %vm2467_vm8, %v2407_v49, %v1843_v62 }
 0x15e   :  { %1864 = vrot.lane.b32.xlu0 %v6256_v57, %s5525_s20  ;;  %v2408_v57 = vsel %vm2402_vm7, %v2343_v35, %v6401_v13  ;;  %635 = vrot.lane.b32.xlu1 %v6554_v48, %s5519_s17 }
 0x160   :  { %v1845_v43 = vpop.permute.xlu0 %1844  ;;  %v1847_v2 = vpop.permute.xlu1 %1846 }
 0x161   :  { %v2473_v13 = vsel %vm2467_vm8, %v2408_v57, %v1845_v43  ;;  %v2474_v52 = vsel %vm2467_vm8, %v2409_v10, %v1847_v2  ;;  %v10539_v10 = vld [vmem:[#allocation13_spill] sm:$0xff]  ;;  %v6735_v2 = vld [vmem:[%s10395_s0 + $0xd2] sm:$0x3] }
 0x162   :  { %637 = vrot.lane.b32.xlu0 %v6559_v30, %s5519_s17  ;;  %v2624_v33 = vcombine.low %v2472_v19, %v2473_v13  ;;  %639 = vrot.lane.b32.xlu1 %v6586_v41, %s5519_s17 }
 0x164   :  { %v1849_v37 = vpop.permute.xlu0 %1848  ;;  %v2632_v17 = vrot.slane %v2624_v33, %v6482_v29  ;;  %v6601_v38 = vpop.permute.xlu1 %619  ;;  %v6730_v33 = vld [vmem:[%s10395_s0 + $0xce] sm:$0x3] }
 0x165   :  { %v2475_v18 = vsel %vm2467_vm8, %v2410_v61, %v1849_v37  ;;  %v10540_v61 = vld [vmem:[#allocation14_spill] sm:$0xff] }
 0x166   :  { %v2625_v40 = vcombine.low %v2474_v52, %v2475_v18  ;;  %641 = vrot.lane.b32.xlu0 %v6591_v46, %s5519_s17  ;;  %1303 = vrot.lane.b32.xlu1 %v6329_v9, %s5522_s29  ;;  %v6744_v18 = vld [vmem:[%s10395_s0 + $0xd6] sm:$0x3] }
 0x168   :  { %v2639_v63 = vrot.slane %v2625_v40, %v6482_v29  ;;  %v6603_v8 = vpop.permute.xlu0 %621  ;;  %v6612_v27 = vpop.permute.xlu1 %623  ;;  %v6749_v40 = vld [vmem:[%s10395_s0 + $0xda] sm:$0x3] }
 0x169   :  { %10528 = vst [vmem:[#allocation75_spill] sm:$0xff] %v6612_v27  ;;  %v10560_v27 = vld [vmem:[#allocation21_spill] sm:$0xff] }
 0x16a   :  { %v2640_v34 = vcombine.low %v2632_v17, %v2639_v63  ;;  %1305 = vrot.lane.b32.xlu0 %v6342_v11, %s5522_s29  ;;  %1307 = vrot.lane.b32.xlu1 %v10530_v26, %s5522_s29 }
 0x16c   :  { %5318 = vmatmul.mubr.msk.f32.vlgmr.msra.gmra.mxu1 %vm2879_vm9, %v2640_v34  ;;  %v6615_v31 = vpop.permute.xlu0 %625  ;;  %v6620_v23 = vpop.permute.xlu1 %1287  ;;  %v157_v34 = vld [vmem:[%s10395_s0 + $0xc0] sm:$0x3] }
 0x16d   :  { %10529 = vst [vmem:[#allocation76_spill] sm:$0xff] %v6615_v31  ;;  %v10558_v31 = vld [vmem:[#allocation20_spill] sm:$0xff] }
 0x16e   :  { %1309 = vrot.lane.b32.xlu0 %v140_v56, %s5522_s29  ;;  %1492 = vrot.lane.b32.xlu1 %v6554_v48, %s5523_s22  ;;  %v159_v56 = vld [vmem:[%s10395_s0 + $0xc4] sm:$0x3] }
 0x170   :  { %v6622_v9 = vpop.permute.xlu0 %1289  ;;  %v6628_v11 = vpop.permute.xlu1 %1291 }
 0x172   :  { %1494 = vrot.lane.b32.xlu0 %v6559_v30, %s5523_s22  ;;  %1496 = vrot.lane.b32.xlu1 %v6586_v41, %s5523_s22 }
 0x174   :  { %v6630_v1 = vpop.permute.xlu0 %1293  ;;  %v6641_v55 = vpop.permute.xlu1 %1478 }
 0x176   :  { %643 = vrot.lane.b32.xlu0 %v6635_v12, %s5519_s17  ;;  %645 = vrot.lane.b32.xlu1 %v6648_v42, %s5519_s17 }
 0x178   :  { %v6643_v47 = vpop.permute.xlu0 %1480  ;;  %v6669_v0 = vpop.permute.xlu1 %1482 }
 0x17a   :  { %647 = vrot.lane.b32.xlu0 %v6653_v4, %s5519_s17  ;;  %649 = vrot.lane.b32.xlu1 %v6662_v58, %s5519_s17 }
 0x17c   :  { %v6671_v35 = vpop.permute.xlu0 %627  ;;  %v6687_v49 = vpop.permute.xlu1 %629 }
 0x17d   :  { %10531 = vst [vmem:[#allocation69_spill] sm:$0xff] %v6671_v35  ;;  %10532 = vst [vmem:[#allocation77_spill] sm:$0xff] %v6687_v49  ;;  %v10552_v49 = vld [vmem:[#allocation57_spill] sm:$0xff] }
 0x17e   :  { %872 = vrot.lane.b32.xlu0 %v6667_v5, %s5520_s18  ;;  %874 = vrot.lane.b32.xlu1 %v6680_v25, %s5520_s18 }
 0x180   :  { %v6689_v57 = vpop.permute.xlu0 %631  ;;  %v6695_v62 = vpop.permute.xlu1 %633 }
 0x181   :  { %10533 = vst [vmem:[#allocation78_spill] sm:$0xff] %v6689_v57  ;;  %10534 = vst [vmem:[#allocation79_spill] sm:$0xff] %v6695_v62  ;;  %v10546_v57 = vld [vmem:[#allocation16_spill] sm:$0xff] }
 0x182   :  { %876 = vrot.lane.b32.xlu0 %v6685_v59, %s5520_s18  ;;  %1498 = vrot.lane.b32.xlu1 %v6591_v46, %s5523_s22 }
 0x184   :  { %v6697_v43 = vpop.permute.xlu0 %858  ;;  %v6703_v39 = vpop.permute.xlu1 %860 }
 0x185   :  { %10535 = vst [vmem:[#allocation80_spill] sm:$0xff] %v6703_v39 }
 0x186   :  { %1500 = vrot.lane.b32.xlu0 %v6635_v12, %s5523_s22  ;;  %1502 = vrot.lane.b32.xlu1 %v6648_v42, %s5523_s22 }
 0x188   :  { %v6705_v44 = vpop.permute.xlu0 %862  ;;  %v6711_v19 = vpop.permute.xlu1 %1484 }
 0x189   :  { %10536 = vst [vmem:[#allocation81_spill] sm:$0xff] %v6705_v44 }
 0x18a   :  { %1504 = vrot.lane.b32.xlu0 %v6653_v4, %s5523_s22  ;;  %1673 = vrot.lane.b32.xlu1 %v10537_v14, %s5524_s19 }
 0x18c   :  { %v6713_v13 = vpop.permute.xlu0 %1486  ;;  %v6719_v28 = vpop.permute.xlu1 %1488 }
 0x18e   :  { %1675 = vrot.lane.b32.xlu0 %v10538_v6, %s5524_s19  ;;  %1677 = vrot.lane.b32.xlu1 %v10539_v10, %s5524_s19  ;;  %v161_v6 = vld [vmem:[%s10395_s0 + $0xc8] sm:$0x3]  ;;  %v163_v10 = vld [vmem:[%s10395_s0 + $0xcc] sm:$0x3] }
 0x190   :  { %v6721_v36 = vpop.permute.xlu0 %1490  ;;  %v1658_v37 = vpop.permute.xlu1 %1657 }
 0x192   :  { %1679 = vrot.lane.b32.xlu0 %v10540_v61, %s5524_s19  ;;  %878 = vrot.lane.b32.xlu1 %v6730_v33, %s5520_s18 }
 0x194   :  { %v1660_v52 = vpop.permute.xlu0 %1659  ;;  %v6751_v17 = vpop.permute.xlu1 %1661 }
 0x196   :  { %880 = vrot.lane.b32.xlu0 %v6735_v2, %s5520_s18  ;;  %882 = vrot.lane.b32.xlu1 %v6744_v18, %s5520_s18 }
 0x198   :  { %v6753_v63 = vpop.permute.xlu0 %1663  ;;  %v6765_v26 = vpop.permute.xlu1 %864 }
 0x199   :  { %10541 = vst [vmem:[#allocation11_spill] sm:$0xff] %v6765_v26 }
 0x19a   :  { %884 = vrot.lane.b32.xlu0 %v6749_v40, %s5520_s18  ;;  %1111 = vrot.lane.b32.xlu1 %v157_v34, %s5521_s13 }
 0x19c   :  { %v6767_v14 = vpop.permute.xlu0 %866  ;;  %v6777_v61 = vpop.permute.xlu1 %868 }
 0x19d   :  { %10542 = vst [vmem:[#allocation12_spill] sm:$0xff] %v6767_v14  ;;  %10543 = vst [vmem:[#allocation13_spill] sm:$0xff] %v6777_v61  ;;  %v10549_v61 = vld [vmem:[#allocation24_spill] sm:$0xff] }
 0x19e   :  { %1113 = vrot.lane.b32.xlu0 %v159_v56, %s5521_s13  ;;  %1115 = vrot.lane.b32.xlu1 %v161_v6, %s5521_s13  ;;  %v10545_v56 = vld [vmem:[#allocation15_spill] sm:$0xff]  ;;  %v10550_v6 = vld [vmem:[#allocation17_spill] sm:$0xff] }
 0x1a0   :  { %v6779_v32 = vpop.permute.xlu0 %870  ;;  %v6783_v62 = vpop.permute.xlu1 %1095 }
 0x1a1   :  { %10544 = vst [vmem:[#allocation14_spill] sm:$0xff] %v6779_v32  ;;  %v2028_v32 = vsel %vm2026_vm1, 0.0, %v10549_v61 }
 0x1a2   :  { %1117 = vrot.lane.b32.xlu0 %v163_v10, %s5521_s13  ;;  %1681 = vrot.lane.b32.xlu1 %v10545_v56, %s5524_s19  ;;  %v10551_v10 = vld [vmem:[#allocation18_spill] sm:$0xff]  ;;  %v2086_v35 = vsel %vm2084_vm2, %v2028_v32, %v10552_v49 }
 0x1a3   :  { %v2151_v61 = vsel %vm2142_vm3, %v2086_v35, %v6070_v51 }
 0x1a4   :  { %v6785_v34 = vpop.permute.xlu0 %1097  ;;  %v6791_v14 = vpop.permute.xlu1 %1099  ;;  %v2216_v49 = vsel %vm2207_vm4, %v2151_v61, %v6381_v20 }
 0x1a5   :  { %10547 = vst [vmem:[#allocation15_spill] sm:$0xff] %v6791_v14  ;;  %v10554_v14 = vld [vmem:[#allocation19_spill] sm:$0xff] }
 0x1a6   :  { %1683 = vrot.lane.b32.xlu0 %v10546_v57, %s5524_s19  ;;  %1685 = vrot.lane.b32.xlu1 %v10550_v6, %s5524_s19  ;;  %v10553_v57 = vld [vmem:[#allocation23_spill] sm:$0xff]  ;;  %v10555_v6 = vld [vmem:[#allocation58_spill] sm:$0xff] }
 0x1a8   :  { %v6793_v26 = vpop.permute.xlu0 %1101  ;;  %v6803_v56 = vpop.permute.xlu1 %1665 }
 0x1a9   :  { %10548 = vst [vmem:[#allocation16_spill] sm:$0xff] %v6793_v26  ;;  %v2029_v26 = vsel %vm2026_vm1, %v10554_v14, %v10553_v57  ;;  %v2281_v14 = vsel %vm2272_vm5, %v2216_v49, %v6507_v16  ;;  %v10561_v16 = vld [vmem:[#allocation59_spill] sm:$0xff] }
 0x1aa   :  { %1687 = vrot.lane.b32.xlu0 %v10551_v10, %s5524_s19  ;;  %1866 = vrot.lane.b32.xlu1 %v6554_v48, %s5525_s20  ;;  %v2087_v32 = vsel %vm2084_vm2, %v2029_v26, %v10555_v6  ;;  %v10556_v10 = vld [vmem:[#allocation66_spill] sm:$0xff] }
 0x1ab   :  { %v2152_v39 = vsel %vm2142_vm3, %v2087_v32, %v10556_v10  ;;  %v10559_v6 = vld [vmem:[#allocation26_spill] sm:$0xff]  ;;  %v10564_v10 = vld [vmem:[#allocation68_spill] sm:$0xff] }
 0x1ac   :  { %v6805_v44 = vpop.permute.xlu0 %1667  ;;  %v6824_v57 = vpop.permute.xlu1 %1669  ;;  %v2217_v48 = vsel %vm2207_vm4, %v2152_v39, %v6383_v53  ;;  %v2031_v20 = vsel %vm2026_vm1, %v10560_v27, %v10559_v6  ;;  %v10562_v39 = vld [vmem:[#allocation60_spill] sm:$0xff]  ;;  %v2346_v27 = vsel %vm2337_vm6, %v2281_v14, %v6224_v3 }
 0x1ad   :  { %v2282_v61 = vsel %vm2272_vm5, %v2217_v48, %v6509_v50  ;;  %v2089_v32 = vsel %vm2084_vm2, %v2031_v20, %v10562_v39  ;;  %v165_v50 = vld [vmem:[%s10395_s0 + $0xd0] sm:$0x3] }
 0x1ae   :  { %1868 = vrot.lane.b32.xlu0 %v6559_v30, %s5525_s20  ;;  %v10557_v30 = vld [vmem:[#allocation25_spill] sm:$0xff]  ;;  %1870 = vrot.lane.b32.xlu1 %v6586_v41, %s5525_s20  ;;  %v2154_v48 = vsel %vm2142_vm3, %v2089_v32, %v10564_v10 }
 0x1af   :  { %v2030_v26 = vsel %vm2026_vm1, %v10558_v31, %v10557_v30  ;;  %v2347_v31 = vsel %vm2337_vm6, %v2282_v61, %v6641_v55  ;;  %v167_v41 = vld [vmem:[%s10395_s0 + $0xd4] sm:$0x3]  ;;  %v2411_v30 = vsel %vm2402_vm7, %v2346_v27, %v1658_v37  ;;  %v2219_v20 = vsel %vm2207_vm4, %v2154_v48, %v6391_v21 }
 0x1b0   :  { %v6826_v35 = vpop.permute.xlu0 %1671  ;;  %v2088_v53 = vsel %vm2084_vm2, %v2030_v26, %v10561_v16  ;;  %v2412_v55 = vsel %vm2402_vm7, %v2347_v31, %v1660_v52  ;;  %v1851_v26 = vpop.permute.xlu1 %1850  ;;  %v2284_v37 = vsel %vm2272_vm5, %v2219_v20, %v6523_v54  ;;  %v169_v52 = vld [vmem:[%s10395_s0 + $0xd8] sm:$0x3] }
 0x1b1   :  { %v2476_v61 = vsel %vm2467_vm8, %v2411_v30, %v1851_v26  ;;  %v2349_v21 = vsel %vm2337_vm6, %v2284_v37, %v6669_v0  ;;  %v10566_v26 = vld [vmem:[#allocation22_spill] sm:$0xff] }
 0x1b2   :  { %1872 = vrot.lane.b32.xlu0 %v6591_v46, %s5525_s20  ;;  %v10563_v46 = vld [vmem:[#allocation67_spill] sm:$0xff]  ;;  %1119 = vrot.lane.b32.xlu1 %v165_v50, %s5521_s13  ;;  %v2414_v39 = vsel %vm2402_vm7, %v2349_v21, %v6753_v63 }
 0x1b3   :  { %v2153_v49 = vsel %vm2142_vm3, %v2088_v53, %v10563_v46 }
 0x1b4   :  { %v1853_v14 = vpop.permute.xlu0 %1852  ;;  %v2218_v6 = vsel %vm2207_vm4, %v2153_v49, %v6389_v22  ;;  %v1855_v31 = vpop.permute.xlu1 %1854 }
 0x1b5   :  { %v2477_v16 = vsel %vm2467_vm8, %v2412_v55, %v1853_v14  ;;  %v2283_v53 = vsel %vm2272_vm5, %v2218_v6, %v6521_v60  ;;  %v171_v60 = vld [vmem:[%s10395_s0 + $0xdc] sm:$0x3]  ;;  %v10567_v14 = vld [vmem:[#allocation29_spill] sm:$0xff]  ;;  %v10568_v6 = vld [vmem:[#allocation27_spill] sm:$0xff] }
 0x1b6   :  { %1121 = vrot.lane.b32.xlu0 %v167_v41, %s5521_s13  ;;  %v2348_v22 = vsel %vm2337_vm6, %v2283_v53, %v6643_v47  ;;  %v2641_v32 = vcombine.low %v2476_v61, %v2477_v16  ;;  %1123 = vrot.lane.b32.xlu1 %v169_v52, %s5521_s13  ;;  %v2033_v20 = vsel %vm2026_vm1, %v10568_v6, %v10567_v14  ;;  %v10570_v61 = vld [vmem:[#allocation63_spill] sm:$0xff]  ;;  %v10571_v53 = vld [vmem:[#allocation70_spill] sm:$0xff] }
 0x1b7   :  { %v2413_v54 = vsel %vm2402_vm7, %v2348_v22, %v6751_v17  ;;  %v2091_v16 = vsel %vm2084_vm2, %v2033_v20, %v10570_v61  ;;  %v10572_v22 = vld [vmem:[#allocation71_spill] sm:$0xff] }
 0x1b8   :  { %v1857_v47 = vpop.permute.xlu0 %1856  ;;  %v2478_v27 = vsel %vm2467_vm8, %v2413_v54, %v1855_v31  ;;  %v2649_v41 = vrot.slane %v2641_v32, %v6482_v29  ;;  %v6894_v17 = vpop.permute.xlu1 %1103  ;;  %v2156_v21 = vsel %vm2142_vm3, %v2091_v16, %v10572_v22  ;;  %v10574_v54 = vld [vmem:[#allocation30_spill] sm:$0xff]  ;;  %v10575_v31 = vld [vmem:[#allocation33_spill] sm:$0xff] }
 0x1b9   :  { %v2479_v0 = vsel %vm2467_vm8, %v2414_v39, %v1857_v47  ;;  %v2221_v32 = vsel %vm2207_vm4, %v2156_v21, %v6490_v24  ;;  %v10576_v47 = vld [vmem:[#allocation31_spill] sm:$0xff]  ;;  %v10578_v24 = vld [vmem:[#allocation65_spill] sm:$0xff]  ;;  %v7006_v22 = vld [vmem:[%s10395_s0 + $0xe2] sm:$0x3] }
 0x1ba   :  { %v2642_v50 = vcombine.low %v2478_v27, %v2479_v0  ;;  %1125 = vrot.lane.b32.xlu0 %v171_v60, %s5521_s13  ;;  %1311 = vrot.lane.b32.xlu1 %v6667_v5, %s5522_s29  ;;  %v10565_v5 = vld [vmem:[#allocation28_spill] sm:$0xff]  ;;  %v2035_v27 = vsel %vm2026_vm1, %v10576_v47, %v10575_v31 }
 0x1bc   :  { %v2656_v46 = vrot.slane %v2642_v50, %v6482_v29  ;;  %v6896_v49 = vpop.permute.xlu0 %1105  ;;  %v6902_v10 = vpop.permute.xlu1 %1107  ;;  %v2286_v50 = vsel %vm2272_vm5, %v2221_v32, %v6622_v9  ;;  %v6966_v9 = vld [vmem:[%s10395_s0 + $0xf8] sm:$0x3]  ;;  %v7033_v32 = vld [vmem:[%s10395_s0 + $0xee] sm:$0x3] }
 0x1be   :  { %v2657_v63 = vcombine.low %v2649_v41, %v2656_v46  ;;  %1313 = vrot.lane.b32.xlu0 %v6680_v25, %s5522_s29  ;;  %1315 = vrot.lane.b32.xlu1 %v6685_v59, %s5522_s29  ;;  %v2032_v25 = vsel %vm2026_vm1, %v10566_v26, %v10565_v5  ;;  %v10569_v59 = vld [vmem:[#allocation62_spill] sm:$0xff]  ;;  %v2093_v46 = vsel %vm2084_vm2, %v2035_v27, %v10578_v24  ;;  %v10580_v26 = vld [vmem:[#allocation73_spill] sm:$0xff] }
 0x1c0   :  { %5320 = vmatprep.mubr.msk.f32.mxu1 %vm2879_vm9, %v2657_v63  ;;  %v6905_v48 = vpop.permute.xlu0 %1109  ;;  %v6911_v30 = vpop.permute.xlu1 %1295 }
 0x1c2   :  { %1317 = vrot.lane.b32.xlu0 %v6730_v33, %s5522_s29  ;;  %1874 = vrot.lane.b32.xlu1 %v6635_v12, %s5525_s20  ;;  %v2090_v33 = vsel %vm2084_vm2, %v2032_v25, %v10569_v59  ;;  %v10573_v12 = vld [vmem:[#allocation32_spill] sm:$0xff]  ;;  %v2158_v25 = vsel %vm2142_vm3, %v2093_v46, %v10580_v26  ;;  %v7082_v46 = vld [vmem:[%s10395_s0 + $0xf6] sm:$0x3]  ;;  %v7105_v26 = vld [vmem:[%s10395_s0 + $0x102] sm:$0x3] }
 0x1c3   :  { %v2155_v37 = vsel %vm2142_vm3, %v2090_v33, %v10571_v53  ;;  %v2223_v59 = vsel %vm2207_vm4, %v2158_v25, %v6501_v15 }
 0x1c4   :  { %v6913_v55 = vpop.permute.xlu0 %1297  ;;  %v6933_v52 = vpop.permute.xlu1 %1299  ;;  %v2220_v39 = vsel %vm2207_vm4, %v2155_v37, %v6488_v45  ;;  %v10577_v45 = vld [vmem:[#allocation64_spill] sm:$0xff] }
 0x1c5   :  { %v2285_v0 = vsel %vm2272_vm5, %v2220_v39, %v6620_v23  ;;  %v2351_v23 = vsel %vm2337_vm6, %v2286_v50, %v6713_v13  ;;  %v7028_v39 = vld [vmem:[%s10395_s0 + $0xea] sm:$0x3] }
 0x1c6   :  { %1876 = vrot.lane.b32.xlu0 %v6648_v42, %s5525_s20  ;;  %v2034_v42 = vsel %vm2026_vm1, %v10574_v54, %v10573_v12  ;;  %1878 = vrot.lane.b32.xlu1 %v6653_v4, %s5525_s20  ;;  %v2350_v63 = vsel %vm2337_vm6, %v2285_v0, %v6711_v19  ;;  %v6971_v4 = vld [vmem:[%s10395_s0 + $0xfc] sm:$0x3]  ;;  %v2416_v13 = vsel %vm2402_vm7, %v2351_v23, %v6805_v44  ;;  %v172_v0 = vld [vmem:[%s10395_s0 + $0xde] sm:$0x3] }
 0x1c7   :  { %v2092_v41 = vsel %vm2084_vm2, %v2034_v42, %v10577_v45  ;;  %v2415_v19 = vsel %vm2402_vm7, %v2350_v63, %v6803_v56  ;;  %v2288_v56 = vsel %vm2272_vm5, %v2223_v59, %v6630_v1  ;;  %v7087_v63 = vld [vmem:[%s10395_s0 + $0xfa] sm:$0x3] }
 0x1c8   :  { %v6935_v60 = vpop.permute.xlu0 %1301  ;;  %v1859_v14 = vpop.permute.xlu1 %1858  ;;  %v2353_v15 = vsel %vm2337_vm6, %v2288_v56, %v6721_v36 }
 0x1c9   :  { %v2480_v33 = vsel %vm2467_vm8, %v2415_v19, %v1859_v14  ;;  %v7123_v14 = vld [vmem:[%s10395_s0 + $0x10a] sm:$0x3] }
 0x1ca   :  { %1880 = vrot.lane.b32.xlu0 %v6662_v58, %s5525_s20  ;;  %v10579_v58 = vld [vmem:[#allocation72_spill] sm:$0xff]  ;;  %436 = vrot.lane.b32.xlu1 %v6966_v9, %s5518_s3 }
 0x1cb   :  { %v2157_v5 = vsel %vm2142_vm3, %v2092_v41, %v10579_v58 }
 0x1cc   :  { %v1861_v6 = vpop.permute.xlu0 %1860  ;;  %v2222_v20 = vsel %vm2207_vm4, %v2157_v5, %v6498_v7  ;;  %v1863_v1 = vpop.permute.xlu1 %1862  ;;  %v7100_v5 = vld [vmem:[%s10395_s0 + $0xfe] sm:$0x3] }
 0x1cd   :  { %v2481_v61 = vsel %vm2467_vm8, %v2416_v13, %v1861_v6  ;;  %v2287_v16 = vsel %vm2272_vm5, %v2222_v20, %v6628_v11  ;;  %v2418_v11 = vsel %vm2402_vm7, %v2353_v15, %v6826_v35  ;;  %v7118_v13 = vld [vmem:[%s10395_s0 + $0x106] sm:$0x3]  ;;  %v5395_v15 = vld [vmem:[%s10395_s0 + $0xe0] sm:$0x3] }
 0x1ce   :  { %438 = vrot.lane.b32.xlu0 %v6971_v4, %s5518_s3  ;;  %v2352_v7 = vsel %vm2337_vm6, %v2287_v16, %v6719_v28  ;;  %v2658_v53 = vcombine.low %v2480_v33, %v2481_v61  ;;  %v7011_v28 = vld [vmem:[%s10395_s0 + $0xe6] sm:$0x3]  ;;  %651 = vrot.lane.b32.xlu1 %v7006_v22, %s5519_s17 }
 0x1cf   :  { %v2417_v44 = vsel %vm2402_vm7, %v2352_v7, %v6824_v57 }
 0x1d0   :  { %v1865_v37 = vpop.permute.xlu0 %1864  ;;  %v2482_v36 = vsel %vm2467_vm8, %v2417_v44, %v1863_v1  ;;  %v2666_v35 = vrot.slane %v2658_v53, %v6482_v29  ;;  %v7021_v54 = vpop.permute.xlu1 %635  ;;  %v5396_v44 = vld [vmem:[%s10395_s0 + $0xe4] sm:$0x3]  ;;  %v5397_v1 = vld [vmem:[%s10395_s0 + $0xe8] sm:$0x3] }
 0x1d1   :  { %v2483_v57 = vsel %vm2467_vm8, %v2418_v11, %v1865_v37  ;;  %v5398_v37 = vld [vmem:[%s10395_s0 + $0xec] sm:$0x3] }
 0x1d2   :  { %v2659_v21 = vcombine.low %v2482_v36, %v2483_v57  ;;  %653 = vrot.lane.b32.xlu0 %v7011_v28, %s5519_s17  ;;  %655 = vrot.lane.b32.xlu1 %v7028_v39, %s5519_s17  ;;  %v7176_v36 = vld [vmem:[%s10395_s0 + $0x10e] sm:$0x3]  ;;  %v7181_v57 = vld [vmem:[%s10395_s0 + $0x112] sm:$0x3] }
 0x1d4   :  { %v2673_v12 = vrot.slane %v2659_v21, %v6482_v29  ;;  %v7023_v42 = vpop.permute.xlu0 %637  ;;  %v7039_v47 = vpop.permute.xlu1 %639 }
 0x1d6   :  { %v2674_v31 = vcombine.low %v2666_v35, %v2673_v12  ;;  %657 = vrot.lane.b32.xlu0 %v7033_v32, %s5519_s17  ;;  %1319 = vrot.lane.b32.xlu1 %v6735_v2, %s5522_s29  ;;  %v7194_v12 = vld [vmem:[%s10395_s0 + $0x116] sm:$0x3] }
 0x1d8   :  { %5321 = vmatmul.mubr.msk.f32.gmra.mxu1 %vm2879_vm9, %v2674_v31  ;;  %v7042_v27 = vpop.permute.xlu0 %641  ;;  %v7051_v50 = vpop.permute.xlu1 %1303  ;;  %v7199_v31 = vld [vmem:[%s10395_s0 + $0x11a] sm:$0x3] }
 0x1da   :  { %1321 = vrot.lane.b32.xlu0 %v6744_v18, %s5522_s29  ;;  %1323 = vrot.lane.b32.xlu1 %v6749_v40, %s5522_s29  ;;  %v7073_v40 = vld [vmem:[%s10395_s0 + $0xf2] sm:$0x3] }
 0x1dc   :  { %v7053_v45 = vpop.permute.xlu0 %1305  ;;  %v7058_v41 = vpop.permute.xlu1 %1307 }
 0x1de   :  { %1325 = vrot.lane.b32.xlu0 %v172_v0, %s5522_s29  ;;  %1506 = vrot.lane.b32.xlu1 %v7006_v22, %s5523_s22 }
 0x1e0   :  { %v7060_v24 = vpop.permute.xlu0 %1309  ;;  %v7066_v2 = vpop.permute.xlu1 %1492 }
 0x1e2   :  { %1508 = vrot.lane.b32.xlu0 %v7011_v28, %s5523_s22  ;;  %1510 = vrot.lane.b32.xlu1 %v7028_v39, %s5523_s22 }
 0x1e4   :  { %v7068_v18 = vpop.permute.xlu0 %1494  ;;  %v7089_v23 = vpop.permute.xlu1 %1496 }
 0x1e6   :  { %659 = vrot.lane.b32.xlu0 %v7073_v40, %s5519_s17  ;;  %661 = vrot.lane.b32.xlu1 %v7082_v46, %s5519_s17 }
 0x1e8   :  { %v7091_v58 = vpop.permute.xlu0 %643  ;;  %v7107_v25 = vpop.permute.xlu1 %645 }
 0x1e9   :  { %10581 = vst [vmem:[#allocation24_spill] sm:$0xff] %v7091_v58  ;;  %10582 = vst [vmem:[#allocation17_spill] sm:$0xff] %v7107_v25  ;;  %v5399_v58 = vld [vmem:[%s10395_s0 + $0xf0] sm:$0x3] }
 0x1ea   :  { %663 = vrot.lane.b32.xlu0 %v7087_v63, %s5519_s17  ;;  %665 = vrot.lane.b32.xlu1 %v7100_v5, %s5519_s17 }
 0x1ec   :  { %v7109_v19 = vpop.permute.xlu0 %647  ;;  %v7125_v6 = vpop.permute.xlu1 %649 }
 0x1ed   :  { %10583 = vst [vmem:[#allocation18_spill] sm:$0xff] %v7109_v19  ;;  %10584 = vst [vmem:[#allocation57_spill] sm:$0xff] %v7125_v6  ;;  %v193_v19 = vld [vmem:[%s10395_s0 + $0x108] sm:$0x3] }
 0x1ee   :  { %886 = vrot.lane.b32.xlu0 %v7105_v26, %s5520_s18  ;;  %888 = vrot.lane.b32.xlu1 %v7118_v13, %s5520_s18 }
 0x1f0   :  { %v7127_v20 = vpop.permute.xlu0 %872  ;;  %v7133_v59 = vpop.permute.xlu1 %874 }
 0x1f1   :  { %10585 = vst [vmem:[#allocation23_spill] sm:$0xff] %v7133_v59 }
 0x1f2   :  { %890 = vrot.lane.b32.xlu0 %v7123_v14, %s5520_s18  ;;  %1512 = vrot.lane.b32.xlu1 %v7033_v32, %s5523_s22 }
 0x1f4   :  { %v7135_v33 = vpop.permute.xlu0 %876  ;;  %v7141_v61 = vpop.permute.xlu1 %1498 }
 0x1f5   :  { %10586 = vst [vmem:[#allocation19_spill] sm:$0xff] %v7135_v33  ;;  %v5400_v33 = vld [vmem:[%s10395_s0 + $0xf4] sm:$0x3] }
 0x1f6   :  { %1514 = vrot.lane.b32.xlu0 %v7073_v40, %s5523_s22  ;;  %1516 = vrot.lane.b32.xlu1 %v7082_v46, %s5523_s22 }
 0x1f8   :  { %v7143_v16 = vpop.permute.xlu0 %1500  ;;  %v7149_v56 = vpop.permute.xlu1 %1502 }
 0x1fa   :  { %1518 = vrot.lane.b32.xlu0 %v7087_v63, %s5523_s22  ;;  %1689 = vrot.lane.b32.xlu1 %v5395_v15, %s5524_s19 }
 0x1fc   :  { %v7151_v7 = vpop.permute.xlu0 %1504  ;;  %v7161_v11 = vpop.permute.xlu1 %1673 }
 0x1fe   :  { %1691 = vrot.lane.b32.xlu0 %v5396_v44, %s5524_s19  ;;  %1693 = vrot.lane.b32.xlu1 %v5397_v1, %s5524_s19  ;;  %v189_v44 = vld [vmem:[%s10395_s0 + $0x100] sm:$0x3]  ;;  %v191_v1 = vld [vmem:[%s10395_s0 + $0x104] sm:$0x3] }
 0x200   :  { %v7163_v53 = vpop.permute.xlu0 %1675  ;;  %v7183_v21 = vpop.permute.xlu1 %1677 }
 0x202   :  { %1695 = vrot.lane.b32.xlu0 %v5398_v37, %s5524_s19  ;;  %892 = vrot.lane.b32.xlu1 %v7176_v36, %s5520_s18 }
 0x204   :  { %v7185_v35 = vpop.permute.xlu0 %1679  ;;  %v7201_v0 = vpop.permute.xlu1 %878 }
 0x205   :  { %10587 = vst [vmem:[#allocation58_spill] sm:$0xff] %v7201_v0 }
 0x206   :  { %894 = vrot.lane.b32.xlu0 %v7181_v57, %s5520_s18  ;;  %896 = vrot.lane.b32.xlu1 %v7194_v12, %s5520_s18 }
 0x208   :  { %v7203_v15 = vpop.permute.xlu0 %880  ;;  %v7215_v37 = vpop.permute.xlu1 %882 }
 0x209   :  { %10588 = vst [vmem:[#allocation66_spill] sm:$0xff] %v7203_v15  ;;  %10589 = vst [vmem:[#allocation25_spill] sm:$0xff] %v7215_v37  ;;  %v195_v15 = vld [vmem:[%s10395_s0 + $0x10c] sm:$0x3] }
 0x20a   :  { %898 = vrot.lane.b32.xlu0 %v7199_v31, %s5520_s18  ;;  %1127 = vrot.lane.b32.xlu1 %v189_v44, %s5521_s13 }
 0x20c   :  { %v7217_v6 = vpop.permute.xlu0 %884  ;;  %v7227_v0 = vpop.permute.xlu1 %1111 }
 0x20d   :  { %10590 = vst [vmem:[#allocation20_spill] sm:$0xff] %v7217_v6 }
 0x20e   :  { %1129 = vrot.lane.b32.xlu0 %v191_v1, %s5521_s13  ;;  %1131 = vrot.lane.b32.xlu1 %v193_v19, %s5521_s13  ;;  %v10593_v1 = vld [vmem:[#allocation34_spill] sm:$0xff] }
 0x20f   :  { %v2036_v37 = vsel %vm2026_vm1, 0.0, %v10593_v1  ;;  %v5401_v1 = vld [vmem:[%s10395_s0 + $0x62] sm:$0x3] }
 0x210   :  { %v7229_v25 = vpop.permute.xlu0 %1113  ;;  %v7233_v6 = vpop.permute.xlu1 %1115  ;;  %v2094_v19 = vsel %vm2084_vm2, %v2036_v37, %v6601_v38 }
 0x211   :  { %10591 = vst [vmem:[#allocation26_spill] sm:$0xff] %v7233_v6  ;;  %v10594_v6 = vld [vmem:[#allocation35_spill] sm:$0xff]  ;;  %v2159_v59 = vsel %vm2142_vm3, %v2094_v19, %v6070_v51 }
 0x212   :  { %1133 = vrot.lane.b32.xlu0 %v195_v15, %s5521_s13  ;;  %1697 = vrot.lane.b32.xlu1 %v5399_v58, %s5524_s19  ;;  %v2037_v58 = vsel %vm2026_vm1, %v5401_v1, %v10594_v6 }
 0x213   :  { %v2095_v38 = vsel %vm2084_vm2, %v2037_v58, %v6603_v8  ;;  %v5402_v8 = vld [vmem:[%s10395_s0 + $0x66] sm:$0x3] }
 0x214   :  { %v7235_v44 = vpop.permute.xlu0 %1117  ;;  %v7249_v15 = vpop.permute.xlu1 %1681  ;;  %v2160_v37 = vsel %vm2142_vm3, %v2095_v38, %v6697_v43  ;;  %v5403_v43 = vld [vmem:[%s10395_s0 + $0x6a] sm:$0x3] }
 0x215   :  { %10592 = vst [vmem:[#allocation21_spill] sm:$0xff] %v7235_v44 }
 0x216   :  { %1699 = vrot.lane.b32.xlu0 %v5400_v33, %s5524_s19  ;;  %1701 = vrot.lane.b32.xlu1 %v6966_v9, %s5524_s19  ;;  %v2224_v33 = vsel %vm2207_vm4, %v2159_v59, %v6783_v62  ;;  %v2225_v9 = vsel %vm2207_vm4, %v2160_v37, %v6785_v34  ;;  %v10596_v59 = vld [vmem:[#allocation37_spill] sm:$0xff]  ;;  %v10597_v34 = vld [vmem:[#allocation75_spill] sm:$0xff] }
 0x217   :  { %v2289_v6 = vsel %vm2272_vm5, %v2224_v33, %v6911_v30  ;;  %v2039_v30 = vsel %vm2026_vm1, %v5403_v43, %v10596_v59  ;;  %v2290_v58 = vsel %vm2272_vm5, %v2225_v9, %v6913_v55  ;;  %v10598_v33 = vld [vmem:[#allocation76_spill] sm:$0xff]  ;;  %v10600_v9 = vld [vmem:[#allocation81_spill] sm:$0xff] }
 0x218   :  { %v7251_v44 = vpop.permute.xlu0 %1683  ;;  %v7272_v1 = vpop.permute.xlu1 %1685  ;;  %v2097_v37 = vsel %vm2084_vm2, %v2039_v30, %v10598_v33  ;;  %v10599_v43 = vld [vmem:[#allocation80_spill] sm:$0xff] }
 0x21a   :  { %1703 = vrot.lane.b32.xlu0 %v6971_v4, %s5524_s19  ;;  %v10595_v4 = vld [vmem:[#allocation36_spill] sm:$0xff]  ;;  %1882 = vrot.lane.b32.xlu1 %v7006_v22, %s5525_s20  ;;  %v2162_v22 = vsel %vm2142_vm3, %v2097_v37, %v10600_v9 }
 0x21b   :  { %v2038_v62 = vsel %vm2026_vm1, %v5402_v8, %v10595_v4  ;;  %v2355_v8 = vsel %vm2337_vm6, %v2290_v58, %v7066_v2  ;;  %v2354_v4 = vsel %vm2337_vm6, %v2289_v6, %v6224_v3  ;;  %v10602_v58 = vld [vmem:[#allocation16_spill] sm:$0xff] }
 0x21c   :  { %v7274_v19 = vpop.permute.xlu0 %1687  ;;  %v2096_v38 = vsel %vm2084_vm2, %v2038_v62, %v10597_v34  ;;  %v2420_v62 = vsel %vm2402_vm7, %v2355_v8, %v7163_v53  ;;  %v1867_v59 = vpop.permute.xlu1 %1866  ;;  %v10601_v34 = vld [vmem:[#allocation15_spill] sm:$0xff]  ;;  %v2227_v6 = vsel %vm2207_vm4, %v2162_v22, %v10602_v58 }
 0x21d   :  { %v2161_v55 = vsel %vm2142_vm3, %v2096_v38, %v10599_v43 }
 0x21e   :  { %1884 = vrot.lane.b32.xlu0 %v7011_v28, %s5525_s20  ;;  %v2419_v28 = vsel %vm2402_vm7, %v2354_v4, %v7161_v11  ;;  %v2226_v2 = vsel %vm2207_vm4, %v2161_v55, %v10601_v34  ;;  %v2292_v11 = vsel %vm2272_vm5, %v2227_v6, %v6935_v60  ;;  %1886 = vrot.lane.b32.xlu1 %v7028_v39, %s5525_s20  ;;  %v7331_v4 = vld [vmem:[%s10395_s0 + $0x120] sm:$0x3]  ;;  %v197_v34 = vld [vmem:[%s10395_s0 + $0x110] sm:$0x3] }
 0x21f   :  { %v2484_v33 = vsel %vm2467_vm8, %v2419_v28, %v1867_v59  ;;  %v2291_v37 = vsel %vm2272_vm5, %v2226_v2, %v6933_v52  ;;  %v2357_v8 = vsel %vm2337_vm6, %v2292_v11, %v7089_v23  ;;  %v7336_v52 = vld [vmem:[%s10395_s0 + $0x124] sm:$0x3]  ;;  %v199_v2 = vld [vmem:[%s10395_s0 + $0x114] sm:$0x3] }
 0x220   :  { %v1869_v30 = vpop.permute.xlu0 %1868  ;;  %v2356_v53 = vsel %vm2337_vm6, %v2291_v37, %v7068_v18  ;;  %v2422_v39 = vsel %vm2402_vm7, %v2357_v8, %v7185_v35  ;;  %v1871_v18 = vpop.permute.xlu1 %1870  ;;  %v7356_v35 = vld [vmem:[%s10395_s0 + $0x12c] sm:$0x3]  ;;  %v10603_v8 = vld [vmem:[#allocation38_spill] sm:$0xff] }
 0x221   :  { %v2485_v38 = vsel %vm2467_vm8, %v2420_v62, %v1869_v30  ;;  %v2421_v60 = vsel %vm2402_vm7, %v2356_v53, %v7183_v21  ;;  %v7351_v21 = vld [vmem:[%s10395_s0 + $0x128] sm:$0x3]  ;;  %v5404_v53 = vld [vmem:[%s10395_s0 + $0x6e] sm:$0x3] }
 0x222   :  { %1888 = vrot.lane.b32.xlu0 %v7033_v32, %s5525_s20  ;;  %v2675_v32 = vcombine.low %v2484_v33, %v2485_v38  ;;  %v2486_v23 = vsel %vm2467_vm8, %v2421_v60, %v1871_v18  ;;  %440 = vrot.lane.b32.xlu1 %v7331_v4, %s5518_s3  ;;  %v201_v33 = vld [vmem:[%s10395_s0 + $0x118] sm:$0x3]  ;;  %v203_v38 = vld [vmem:[%s10395_s0 + $0x11c] sm:$0x3]  ;;  %v2040_v60 = vsel %vm2026_vm1, %v5404_v53, %v10603_v8 }
 0x224   :  { %v1873_v43 = vpop.permute.xlu0 %1872  ;;  %v2683_v22 = vrot.slane %v2675_v32, %v6482_v29  ;;  %v7360_v62 = vpop.permute.xlu1 %1119  ;;  %v10604_v32 = vld [vmem:[#allocation39_spill] sm:$0xff] }
 0x225   :  { %v2487_v55 = vsel %vm2467_vm8, %v2422_v39, %v1873_v43  ;;  %v5405_v39 = vld [vmem:[%s10395_s0 + $0x72] sm:$0x3]  ;;  %v10605_v43 = vld [vmem:[#allocation69_spill] sm:$0xff] }
 0x226   :  { %v2676_v9 = vcombine.low %v2486_v23, %v2487_v55  ;;  %442 = vrot.lane.b32.xlu0 %v7336_v52, %s5518_s3  ;;  %444 = vrot.lane.b32.xlu1 %v7351_v21, %s5518_s3  ;;  %v2041_v18 = vsel %vm2026_vm1, %v5405_v39, %v10604_v32  ;;  %v2098_v23 = vsel %vm2084_vm2, %v2040_v60, %v10605_v43  ;;  %v10606_v55 = vld [vmem:[#allocation77_spill] sm:$0xff] }
 0x227   :  { %v5407_v60 = vld [vmem:[%s10395_s0 + $0x7a] sm:$0x3] }
 0x228   :  { %v2690_v28 = vrot.slane %v2676_v9, %v6482_v29  ;;  %v7362_v59 = vpop.permute.xlu0 %1121  ;;  %v7374_v58 = vpop.permute.xlu1 %1123  ;;  %v2099_v9 = vsel %vm2084_vm2, %v2041_v18, %v10606_v55  ;;  %v10610_v39 = vld [vmem:[#allocation41_spill] sm:$0xff] }
 0x229   :  { %v2043_v32 = vsel %vm2026_vm1, %v5407_v60, %v10610_v39 }
 0x22a   :  { %v2691_v30 = vcombine.low %v2683_v22, %v2690_v28  ;;  %446 = vrot.lane.b32.xlu0 %v7356_v35, %s5518_s3  ;;  %1135 = vrot.lane.b32.xlu1 %v197_v34, %s5521_s13  ;;  %v5406_v28 = vld [vmem:[%s10395_s0 + $0x76] sm:$0x3] }
 0x22c   :  { %5323 = vmatprep.mubr.msk.f32.mxu1 %vm2879_vm9, %v2691_v30  ;;  %v7377_v6 = vpop.permute.xlu0 %1125  ;;  %v7387_v37 = vpop.permute.xlu1 %1311  ;;  %v10607_v30 = vld [vmem:[#allocation40_spill] sm:$0xff] }
 0x22d   :  { %v2042_v34 = vsel %vm2026_vm1, %v5406_v28, %v10607_v30 }
 0x22e   :  { %1137 = vrot.lane.b32.xlu0 %v199_v2, %s5521_s13  ;;  %1139 = vrot.lane.b32.xlu1 %v201_v33, %s5521_s13  ;;  %v10608_v2 = vld [vmem:[#allocation11_spill] sm:$0xff] }
 0x22f   :  { %v2163_v33 = vsel %vm2142_vm3, %v2098_v23, %v10608_v2  ;;  %v10611_v23 = vld [vmem:[#allocation78_spill] sm:$0xff]  ;;  %v10613_v2 = vld [vmem:[#allocation13_spill] sm:$0xff] }
 0x230   :  { %v7389_v11 = vpop.permute.xlu0 %1313  ;;  %v7407_v22 = vpop.permute.xlu1 %1315  ;;  %v2228_v18 = vsel %vm2207_vm4, %v2163_v33, %v6894_v17  ;;  %v2100_v55 = vsel %vm2084_vm2, %v2042_v34, %v10611_v23  ;;  %v10614_v33 = vld [vmem:[#allocation14_spill] sm:$0xff] }
 0x231   :  { %v2293_v30 = vsel %vm2272_vm5, %v2228_v18, %v7051_v50 }
 0x232   :  { %1141 = vrot.lane.b32.xlu0 %v203_v38, %s5521_s13  ;;  %v10609_v38 = vld [vmem:[#allocation12_spill] sm:$0xff]  ;;  %1327 = vrot.lane.b32.xlu1 %v7105_v26, %s5522_s29 }
 0x233   :  { %v2164_v53 = vsel %vm2142_vm3, %v2099_v9, %v10609_v38  ;;  %v10612_v9 = vld [vmem:[#allocation79_spill] sm:$0xff] }
 0x234   :  { %v7418_v8 = vpop.permute.xlu0 %1317  ;;  %v2229_v43 = vsel %vm2207_vm4, %v2164_v53, %v6896_v49  ;;  %v2101_v28 = vsel %vm2084_vm2, %v2043_v32, %v10612_v9  ;;  %v2165_v49 = vsel %vm2142_vm3, %v2100_v55, %v10613_v2  ;;  %v1875_v38 = vpop.permute.xlu1 %1874  ;;  %v7531_v2 = vld [vmem:[%s10395_s0 + $0x122] sm:$0x3] }
 0x235   :  { %v2294_v17 = vsel %vm2272_vm5, %v2229_v43, %v7053_v45  ;;  %v2166_v26 = vsel %vm2142_vm3, %v2101_v28, %v10614_v33  ;;  %v2230_v53 = vsel %vm2207_vm4, %v2165_v49, %v6902_v10  ;;  %v7536_v49 = vld [vmem:[%s10395_s0 + $0x126] sm:$0x3] }
 0x236   :  { %1329 = vrot.lane.b32.xlu0 %v7118_v13, %s5522_s29  ;;  %v2358_v13 = vsel %vm2337_vm6, %v2293_v30, %v7141_v61  ;;  %v2359_v34 = vsel %vm2337_vm6, %v2294_v17, %v7143_v16  ;;  %v2231_v50 = vsel %vm2207_vm4, %v2166_v26, %v6905_v48  ;;  %v2295_v61 = vsel %vm2272_vm5, %v2230_v53, %v7058_v41 }
 0x237   :  { %v2423_v45 = vsel %vm2402_vm7, %v2358_v13, %v7249_v15  ;;  %v2424_v60 = vsel %vm2402_vm7, %v2359_v34, %v7251_v44  ;;  %1331 = vrot.lane.b32.xlu1 %v7123_v14, %s5522_s29  ;;  %v2296_v10 = vsel %vm2272_vm5, %v2231_v50, %v7060_v24  ;;  %v2360_v48 = vsel %vm2337_vm6, %v2295_v61, %v7149_v56  ;;  %v7549_v13 = vld [vmem:[%s10395_s0 + $0x12a] sm:$0x3]  ;;  %v7554_v34 = vld [vmem:[%s10395_s0 + $0x12e] sm:$0x3] }
 0x238   :  { %v1877_v39 = vpop.permute.xlu0 %1876  ;;  %v2488_v32 = vsel %vm2467_vm8, %v2423_v45, %v1875_v38  ;;  %v2361_v44 = vsel %vm2337_vm6, %v2296_v10, %v7151_v7  ;;  %v2425_v41 = vsel %vm2402_vm7, %v2360_v48, %v7272_v1  ;;  %v1879_v15 = vpop.permute.xlu1 %1878  ;;  %v7606_v10 = vld [vmem:[%s10395_s0 + $0x136] sm:$0x3]  ;;  %v7611_v48 = vld [vmem:[%s10395_s0 + $0x13a] sm:$0x3] }
 0x239   :  { %v2489_v16 = vsel %vm2467_vm8, %v2424_v60, %v1877_v39  ;;  %v2426_v18 = vsel %vm2402_vm7, %v2361_v44, %v7274_v19  ;;  %v2490_v43 = vsel %vm2467_vm8, %v2425_v41, %v1879_v15  ;;  %v204_v60 = vld [vmem:[%s10395_s0 + $0x11e] sm:$0x3] }
 0x23a   :  { %1333 = vrot.lane.b32.xlu0 %v7176_v36, %s5522_s29  ;;  %v2692_v14 = vcombine.low %v2488_v32, %v2489_v16  ;;  %v7624_v15 = vld [vmem:[%s10395_s0 + $0x13e] sm:$0x3] }
 0x23b   :  { %1890 = vrot.lane.b32.xlu1 %v7073_v40, %s5525_s20  ;;  %v7494_v40 = vld [vmem:[%s10395_s0 + $0x130] sm:$0x3] }
 0x23c   :  { %v1881_v36 = vpop.permute.xlu0 %1880  ;;  %v7481_v56 = vpop.permute.xlu1 %436  ;;  %v2700_v7 = vrot.slane %v2692_v14, %v6482_v29 }
 0x23d   :  { %v2491_v23 = vsel %vm2467_vm8, %v2426_v18, %v1881_v36  ;;  %10615 = vst [vmem:[#allocation59_spill] sm:$0xff] %v7481_v56  ;;  %v7629_v18 = vld [vmem:[%s10395_s0 + $0x142] sm:$0x3]  ;;  %v7642_v36 = vld [vmem:[%s10395_s0 + $0x146] sm:$0x3] }
 0x23e   :  { %1892 = vrot.lane.b32.xlu0 %v7082_v46, %s5525_s20  ;;  %v2693_v24 = vcombine.low %v2490_v43, %v2491_v23  ;;  %v7499_v46 = vld [vmem:[%s10395_s0 + $0x134] sm:$0x3]  ;;  %v7647_v23 = vld [vmem:[%s10395_s0 + $0x14a] sm:$0x3] }
 0x23f   :  { %1894 = vrot.lane.b32.xlu1 %v7087_v63, %s5525_s20  ;;  %v7513_v63 = vld [vmem:[%s10395_s0 + $0x138] sm:$0x3] }
 0x240   :  { %v2707_v1 = vrot.slane %v2693_v24, %v6482_v29  ;;  %v7485_v19 = vpop.permute.xlu0 %438  ;;  %v7501_v9 = vpop.permute.xlu1 %651 }
 0x241   :  { %10616 = vst [vmem:[#allocation60_spill] sm:$0xff] %v7485_v19  ;;  %10617 = vst [vmem:[#allocation67_spill] sm:$0xff] %v7501_v9  ;;  %v10638_v9 = vld [vmem:[#allocation44_spill] sm:$0xff] }
 0x242   :  { %1896 = vrot.lane.b32.xlu0 %v7100_v5, %s5525_s20  ;;  %v2708_v55 = vcombine.low %v2700_v7, %v2707_v1  ;;  %v7518_v5 = vld [vmem:[%s10395_s0 + $0x13c] sm:$0x3] }
 0x243   :  { %448 = vrot.lane.b32.xlu1 %v7494_v40, %s5518_s3 }
 0x244   :  { %5324 = vmatmul.mubr.msk.f32.gmra.mxu1 %vm2879_vm9, %v2708_v55  ;;  %v7504_v28 = vpop.permute.xlu0 %653  ;;  %v7520_v30 = vpop.permute.xlu1 %655 }
 0x245   :  { %10618 = vst [vmem:[#allocation68_spill] sm:$0xff] %v7504_v28  ;;  %10619 = vst [vmem:[#allocation28_spill] sm:$0xff] %v7520_v30 }
 0x246   :  { %450 = vrot.lane.b32.xlu0 %v7499_v46, %s5518_s3 }
 0x247   :  { %452 = vrot.lane.b32.xlu1 %v7513_v63, %s5518_s3 }
 0x248   :  { %v7522_v17 = vpop.permute.xlu0 %657  ;;  %v7538_v33 = vpop.permute.xlu1 %1319 }
 0x249   :  { %10620 = vst [vmem:[#allocation22_spill] sm:$0xff] %v7522_v17  ;;  %v223_v17 = vld [vmem:[%s10395_s0 + $0x144] sm:$0x3] }
 0x24a   :  { %454 = vrot.lane.b32.xlu0 %v7518_v5, %s5518_s3 }
 0x24b   :  { %667 = vrot.lane.b32.xlu1 %v7531_v2, %s5519_s17 }
 0x24c   :  { %v7540_v26 = vpop.permute.xlu0 %1321  ;;  %v7556_v38 = vpop.permute.xlu1 %1323 }
 0x24e   :  { %669 = vrot.lane.b32.xlu0 %v7536_v49, %s5519_s17 }
 0x24f   :  { %671 = vrot.lane.b32.xlu1 %v7549_v13, %s5519_s17 }
 0x250   :  { %v7558_v53 = vpop.permute.xlu0 %1325  ;;  %v7564_v50 = vpop.permute.xlu1 %1506 }
 0x252   :  { %673 = vrot.lane.b32.xlu0 %v7554_v34, %s5519_s17 }
 0x253   :  { %1335 = vrot.lane.b32.xlu1 %v7181_v57, %s5522_s29  ;;  %v7593_v57 = vld [vmem:[%s10395_s0 + $0x132] sm:$0x3] }
 0x254   :  { %v7566_v45 = vpop.permute.xlu0 %1508  ;;  %v7575_v39 = vpop.permute.xlu1 %1510 }
 0x256   :  { %1337 = vrot.lane.b32.xlu0 %v7194_v12, %s5522_s29 }
 0x257   :  { %1339 = vrot.lane.b32.xlu1 %v7199_v31, %s5522_s29 }
 0x258   :  { %v7577_v61 = vpop.permute.xlu0 %659  ;;  %v7582_v32 = vpop.permute.xlu1 %661 }
 0x259   :  { %10621 = vst [vmem:[#allocation29_spill] sm:$0xff] %v7577_v61  ;;  %10622 = vst [vmem:[#allocation27_spill] sm:$0xff] %v7582_v32  ;;  %v10636_v61 = vld [vmem:[#allocation42_spill] sm:$0xff] }
 0x25a   :  { %1341 = vrot.lane.b32.xlu0 %v204_v60, %s5522_s29 }
 0x25b   :  { %1520 = vrot.lane.b32.xlu1 %v7531_v2, %s5523_s22 }
 0x25c   :  { %v7584_v16 = vpop.permute.xlu0 %663  ;;  %v7595_v12 = vpop.permute.xlu1 %665 }
 0x25d   :  { %10623 = vst [vmem:[#allocation62_spill] sm:$0xff] %v7584_v16  ;;  %10624 = vst [vmem:[#allocation63_spill] sm:$0xff] %v7595_v12 }
 0x25e   :  { %1522 = vrot.lane.b32.xlu0 %v7536_v49, %s5523_s22 }
 0x25f   :  { %1524 = vrot.lane.b32.xlu1 %v7549_v13, %s5523_s22 }
 0x260   :  { %v7597_v31 = vpop.permute.xlu0 %886  ;;  %v7613_v44 = vpop.permute.xlu1 %888 }
 0x261   :  { %10625 = vst [vmem:[#allocation70_spill] sm:$0xff] %v7597_v31  ;;  %10626 = vst [vmem:[#allocation71_spill] sm:$0xff] %v7613_v44  ;;  %v221_v44 = vld [vmem:[%s10395_s0 + $0x140] sm:$0x3] }
 0x262   :  { %675 = vrot.lane.b32.xlu0 %v7593_v57, %s5519_s17 }
 0x263   :  { %677 = vrot.lane.b32.xlu1 %v7606_v10, %s5519_s17 }
 0x264   :  { %v7615_v41 = vpop.permute.xlu0 %890  ;;  %v7631_v14 = vpop.permute.xlu1 %1512 }
 0x265   :  { %10627 = vst [vmem:[#allocation32_spill] sm:$0xff] %v7615_v41  ;;  %v2044_v41 = vsel %vm2026_vm1, 0.0, %v10636_v61  ;;  %v5408_v61 = vld [vmem:[%s10395_s0 + $0xa2] sm:$0x3] }
 0x266   :  { %679 = vrot.lane.b32.xlu0 %v7611_v48, %s5519_s17 }
 0x267   :  { %681 = vrot.lane.b32.xlu1 %v7624_v15, %s5519_s17 }
 0x268   :  { %v7633_v43 = vpop.permute.xlu0 %1514  ;;  %v7649_v24 = vpop.permute.xlu1 %1516 }
 0x26a   :  { %900 = vrot.lane.b32.xlu0 %v7629_v18, %s5520_s18 }
 0x26b   :  { %902 = vrot.lane.b32.xlu1 %v7642_v36, %s5520_s18 }
 0x26c   :  { %v7651_v7 = vpop.permute.xlu0 %1518  ;;  %v7657_v1 = vpop.permute.xlu1 %1689 }
 0x26e   :  { %904 = vrot.lane.b32.xlu0 %v7647_v23, %s5520_s18 }
 0x26f   :  { %1526 = vrot.lane.b32.xlu1 %v7554_v34, %s5523_s22 }
 0x270   :  { %v7659_v55 = vpop.permute.xlu0 %1691  ;;  %v7665_v60 = vpop.permute.xlu1 %1693 }
 0x272   :  { %1528 = vrot.lane.b32.xlu0 %v7593_v57, %s5523_s22 }
 0x273   :  { %1530 = vrot.lane.b32.xlu1 %v7606_v10, %s5523_s22 }
 0x274   :  { %v7667_v12 = vpop.permute.xlu0 %1695  ;;  %v7673_v16 = vpop.permute.xlu1 %892 }
 0x275   :  { %10628 = vst [vmem:[#allocation30_spill] sm:$0xff] %v7673_v16 }
 0x276   :  { %1532 = vrot.lane.b32.xlu0 %v7611_v48, %s5523_s22 }
 0x277   :  { %1705 = vrot.lane.b32.xlu1 %v7331_v4, %s5524_s19  ;;  %v7697_v4 = vld [vmem:[%s10395_s0 + $0x152] sm:$0x3] }
 0x278   :  { %v7675_v19 = vpop.permute.xlu0 %894  ;;  %v7681_v56 = vpop.permute.xlu1 %896 }
 0x279   :  { %10629 = vst [vmem:[#allocation33_spill] sm:$0xff] %v7675_v19  ;;  %10630 = vst [vmem:[#allocation31_spill] sm:$0xff] %v7681_v56  ;;  %v7692_v19 = vld [vmem:[%s10395_s0 + $0x14e] sm:$0x3] }
 0x27a   :  { %1707 = vrot.lane.b32.xlu0 %v7336_v52, %s5524_s19 }
 0x27b   :  { %1709 = vrot.lane.b32.xlu1 %v7351_v21, %s5524_s19  ;;  %v7710_v21 = vld [vmem:[%s10395_s0 + $0x156] sm:$0x3] }
 0x27c   :  { %v7683_v32 = vpop.permute.xlu0 %898  ;;  %v7699_v52 = vpop.permute.xlu1 %1127 }
 0x27d   :  { %10631 = vst [vmem:[#allocation64_spill] sm:$0xff] %v7683_v32  ;;  %10632 = vst [vmem:[#allocation65_spill] sm:$0xff] %v7699_v52 }
 0x27e   :  { %1711 = vrot.lane.b32.xlu0 %v7356_v35, %s5524_s19  ;;  %v7715_v35 = vld [vmem:[%s10395_s0 + $0x15a] sm:$0x3] }
 0x27f   :  { %906 = vrot.lane.b32.xlu1 %v7692_v19, %s5520_s18 }
 0x280   :  { %v7701_v56 = vpop.permute.xlu0 %1129  ;;  %v7717_v32 = vpop.permute.xlu1 %1131 }
 0x281   :  { %10633 = vst [vmem:[#allocation72_spill] sm:$0xff] %v7701_v56  ;;  %10634 = vst [vmem:[#allocation73_spill] sm:$0xff] %v7717_v32  ;;  %v10637_v56 = vld [vmem:[#allocation43_spill] sm:$0xff] }
 0x282   :  { %908 = vrot.lane.b32.xlu0 %v7697_v4, %s5520_s18  ;;  %v2045_v31 = vsel %vm2026_vm1, %v5408_v61, %v10637_v56 }
 0x283   :  { %910 = vrot.lane.b32.xlu1 %v7710_v21, %s5520_s18 }
 0x284   :  { %v7719_v16 = vpop.permute.xlu0 %1133  ;;  %v7735_v32 = vpop.permute.xlu1 %1697 }
 0x285   :  { %10635 = vst [vmem:[#allocation34_spill] sm:$0xff] %v7719_v16  ;;  %v2102_v16 = vsel %vm2084_vm2, %v2044_v41, %v7021_v54  ;;  %v225_v54 = vld [vmem:[%s10395_s0 + $0x148] sm:$0x3] }
 0x286   :  { %912 = vrot.lane.b32.xlu0 %v7715_v35, %s5520_s18  ;;  %v2167_v52 = vsel %vm2142_vm3, %v2102_v16, %v6070_v51  ;;  %v5409_v51 = vld [vmem:[%s10395_s0 + $0xa6] sm:$0x3] }
 0x287   :  { %1143 = vrot.lane.b32.xlu1 %v221_v44, %s5521_s13  ;;  %v227_v44 = vld [vmem:[%s10395_s0 + $0x14c] sm:$0x3]  ;;  %v2232_v41 = vsel %vm2207_vm4, %v2167_v52, %v7227_v0  ;;  %v5410_v0 = vld [vmem:[%s10395_s0 + $0xaa] sm:$0x3] }
 0x288   :  { %v7737_v30 = vpop.permute.xlu0 %1699  ;;  %v7758_v28 = vpop.permute.xlu1 %1701  ;;  %v2297_v16 = vsel %vm2272_vm5, %v2232_v41, %v7387_v37 }
 0x28a   :  { %1145 = vrot.lane.b32.xlu0 %v223_v17, %s5521_s13  ;;  %v2103_v17 = vsel %vm2084_vm2, %v2045_v31, %v7023_v42  ;;  %v2046_v42 = vsel %vm2026_vm1, %v5409_v51, %v10638_v9  ;;  %v10639_v31 = vld [vmem:[#allocation45_spill] sm:$0xff] }
 0x28b   :  { %v2168_v56 = vsel %vm2142_vm3, %v2103_v17, %v7127_v20  ;;  %v2047_v52 = vsel %vm2026_vm1, %v5410_v0, %v10639_v31  ;;  %1147 = vrot.lane.b32.xlu1 %v225_v54, %s5521_s13  ;;  %v2104_v37 = vsel %vm2084_vm2, %v2046_v42, %v7039_v47  ;;  %v10640_v17 = vld [vmem:[#allocation23_spill] sm:$0xff]  ;;  %v2362_v54 = vsel %vm2337_vm6, %v2297_v16, %v6224_v3  ;;  %v10642_v47 = vld [vmem:[#allocation26_spill] sm:$0xff] }
 0x28c   :  { %v7764_v61 = vpop.permute.xlu0 %1703  ;;  %v2233_v20 = vsel %vm2207_vm4, %v2168_v56, %v7229_v25  ;;  %v2105_v51 = vsel %vm2084_vm2, %v2047_v52, %v7042_v27  ;;  %v2169_v41 = vsel %vm2142_vm3, %v2104_v37, %v10640_v17  ;;  %v10641_v0 = vld [vmem:[#allocation19_spill] sm:$0xff]  ;;  %v10643_v27 = vld [vmem:[#allocation21_spill] sm:$0xff]  ;;  %v7802_v37 = vpop.f32.mrf.mxu1 }
 0x28d   :  { %v2298_v9 = vsel %vm2272_vm5, %v2233_v20, %v7389_v11  ;;  %v2170_v31 = vsel %vm2142_vm3, %v2105_v51, %v10641_v0  ;;  %v2234_v56 = vsel %vm2207_vm4, %v2169_v41, %v10642_v47  ;;  %v2427_v11 = vsel %vm2402_vm7, %v2362_v54, %v7657_v1  ;;  %10644 = vst [vmem:[#allocation35_spill] sm:$0xff] %v7802_v37 }
 0x28e   :  { %1149 = vrot.lane.b32.xlu0 %v227_v44, %s5521_s13  ;;  %v2363_v25 = vsel %vm2337_vm6, %v2298_v9, %v7564_v50  ;;  %v1883_v44 = vpop.permute.xlu1 %1882  ;;  %v2235_v42 = vsel %vm2207_vm4, %v2170_v31, %v10643_v27  ;;  %v2299_v50 = vsel %vm2272_vm5, %v2234_v56, %v7407_v22  ;;  %v7823_v31 = vpop.f32.mrf.mxu1 }
 0x28f   :  { %v2428_v52 = vsel %vm2402_vm7, %v2363_v25, %v7659_v55  ;;  %v2492_v16 = vsel %vm2467_vm8, %v2427_v11, %v1883_v44  ;;  %1713 = vrot.lane.b32.xlu1 %v7494_v40, %s5524_s19  ;;  %v2300_v1 = vsel %vm2272_vm5, %v2235_v42, %v7418_v8  ;;  %v2364_v55 = vsel %vm2337_vm6, %v2299_v50, %v7566_v45 }
 0x290   :  { %v1885_v20 = vpop.permute.xlu0 %1884  ;;  %v2365_v9 = vsel %vm2337_vm6, %v2300_v1, %v7575_v39  ;;  %v2429_v22 = vsel %vm2402_vm7, %v2364_v55, %v7665_v60  ;;  %10645 = vst [vmem:[#allocation36_spill] sm:$0xff] %v7823_v31  ;;  %v7833_v39 = vld [vmem:[%s10397_s2] ss:$0 sm:$0xff]  ;;  %v229_v1 = vld [vmem:[%s10395_s0 + $0x150] sm:$0x3] }
 0x291   :  { %v2493_v51 = vsel %vm2467_vm8, %v2428_v52, %v1885_v20  ;;  %v2430_v41 = vsel %vm2402_vm7, %v2365_v9, %v7667_v12  ;;  %10646 = vst [vmem:[#allocation37_spill] sm:$0xff] %v7833_v39 }
 0x292   :  { %1715 = vrot.lane.b32.xlu0 %v7499_v46, %s5524_s19  ;;  %v1887_v17 = vpop.permute.xlu1 %1886  ;;  %v2709_v40 = vcombine.low %v2492_v16, %v2493_v51 }
 0x293   :  { %v2494_v0 = vsel %vm2467_vm8, %v2429_v22, %v1887_v17  ;;  %1717 = vrot.lane.b32.xlu1 %v7513_v63, %s5524_s19 }
 0x294   :  { %v1889_v46 = vpop.permute.xlu0 %1888  ;;  %v2717_v25 = vrot.slane %v2709_v40, %v6482_v29  ;;  %v233_v40 = vld [vmem:[%s10395_s0 + $0x158] sm:$0x3] }
 0x295   :  { %v2495_v8 = vsel %vm2467_vm8, %v2430_v41, %v1889_v46 }
 0x296   :  { %1719 = vrot.lane.b32.xlu0 %v7518_v5, %s5524_s19  ;;  %v2710_v45 = vcombine.low %v2494_v0, %v2495_v8  ;;  %v7835_v12 = vpop.permute.xlu1 %440  ;;  %v235_v0 = vld [vmem:[%s10395_s0 + $0x15c] sm:$0x3] }
 0x297   :  { %1898 = vrot.lane.b32.xlu1 %v7531_v2, %s5525_s20 }
 0x298   :  { %v5322_v60 = vpop.f32.mrf.mxu1  ;;  %v2724_v54 = vrot.slane %v2710_v45, %v6482_v29  ;;  %v7840_v47 = vpop.permute.xlu0 %442 }
 0x299   :  { %v2998_v44 = vadd.f32 %v5322_v60, %v7833_v39 }
 0x29a   :  { %v2992_v63 = vpop.f32.mrf.mxu1  ;;  %1900 = vrot.lane.b32.xlu0 %v7536_v49, %s5525_s20  ;;  %v2725_v5 = vcombine.low %v2717_v25, %v2724_v54  ;;  %v7847_v42 = vpop.permute.xlu1 %444 }
 0x29b   :  { %v3064_v56 = vmax.f32 %v2998_v44, 0.0  ;;  %v2993_v27 = vadd.f32 %v7833_v39, %v2992_v63  ;;  %1902 = vrot.lane.b32.xlu1 %v7549_v13, %s5525_s20  ;;  %v231_v13 = vld [vmem:[%s10395_s0 + $0x154] sm:$0x3]  ;;  %v10688_v39 = vld [vmem:[#allocation70_spill] sm:$0xff] }
 0x29c   :  { %5326 = vmatprep.mubr.msk.f32.mxu1 %vm2879_vm9, %v2725_v5  ;;  %v7853_v50 = vpop.permute.xlu0 %446 }
 0x29d   :  { %v3144_v11 = vcombine.high %v3064_v56, %v3064_v56  ;;  %v7850_v52 = vrot.slane %v3064_v56, %v6482_v29  ;;  %v3063_v20 = vmax.f32 %v2993_v27, 0.0 }
 0x29e   :  { %1904 = vrot.lane.b32.xlu0 %v7554_v34, %s5525_s20  ;;  %v7875_v34 = vpop.permute.xlu1 %1135 }
 0x29f   :  { %10647 = vst [vmem:[#allocation75_spill] sm:$0xff] %v7850_v52  ;;  %v7860_v2 = vrot.slane %v3144_v11, %v6482_v29  ;;  %v7864_v49 = vcombine.high %v7850_v52, %v7850_v52  ;;  %v3127_v16 = vcombine.high %v3063_v20, %v3063_v20  ;;  %v7867_v51 = vrot.slane %v3063_v20, %v6482_v29  ;;  %v5411_v20 = vld [vmem:[%s10395_s0 + $0xae] sm:$0x3] }
 0x2a0   :  { %v7884_v22 = vpop.permute.xlu0 %1137  ;;  %1151 = vrot.lane.b32.xlu1 %v229_v1, %s5521_s13 }
 0x2a1   :  { %10648 = vst [vmem:[#allocation76_spill] sm:$0xff] %v7860_v2  ;;  %10649 = vst [vmem:[#allocation80_spill] sm:$0xff] %v7864_v49  ;;  %v7878_v55 = vrot.slane %v3127_v16, %v6482_v29  ;;  %v7882_v9 = vcombine.high %v7867_v51, %v7867_v51  ;;  %v7888_v17 = vcombine.high %v7860_v2, %v7860_v2  ;;  %v10655_v16 = vld [vmem:[#allocation46_spill] sm:$0xff] }
 0x2a2   :  { %10650 = vst [vmem:[#allocation81_spill] sm:$0xff] %v7867_v51  ;;  %1153 = vrot.lane.b32.xlu0 %v231_v13, %s5521_s13  ;;  %v3783_v46 = vrot.slane %v7864_v49, %v6482_v29  ;;  %v7906_v45 = vpop.permute.xlu1 %1139  ;;  %v2048_v1 = vsel %vm2026_vm1, %v5411_v20, %v10655_v16  ;;  %v5412_v13 = vld [vmem:[%s10395_s0 + $0xb2] sm:$0x3]  ;;  %v10660_v16 = vld [vmem:[#allocation58_spill] sm:$0xff] }
 0x2a3   :  { %10651 = vst [vmem:[#allocation15_spill] sm:$0xff] %v7878_v55  ;;  %10652 = vst [vmem:[#allocation16_spill] sm:$0xff] %v7882_v9  ;;  %v7894_v41 = vcombine.high %v7878_v55, %v7878_v55  ;;  %v3799_v8 = vrot.slane %v7888_v17, %v6482_v29  ;;  %v3751_v25 = vrot.slane %v7882_v9, %v6482_v29  ;;  %v8225_v9 = vld [vmem:[%s10395_s0 + $0x18a] sm:$0x3] }
 0x2a4   :  { %10653 = vst [vmem:[#allocation38_spill] sm:$0xff] %v7888_v17  ;;  %v7908_v60 = vpop.permute.xlu0 %1141  ;;  %1155 = vrot.lane.b32.xlu1 %v233_v40, %s5521_s13  ;;  %v10656_v40 = vld [vmem:[#allocation47_spill] sm:$0xff] }
 0x2a5   :  { %10654 = vst [vmem:[#allocation39_spill] sm:$0xff] %v7894_v41  ;;  %v3767_v54 = vrot.slane %v7894_v41, %v6482_v29  ;;  %v5134_v44 = vcombine.low %v3783_v46, %v3799_v8  ;;  %v8220_v41 = vld [vmem:[%s10395_s0 + $0x186] sm:$0x3] }
 0x2a6   :  { %1157 = vrot.lane.b32.xlu0 %v235_v0, %s5521_s13  ;;  %v7916_v5 = vpop.permute.xlu1 %1327  ;;  %v2049_v0 = vsel %vm2026_vm1, %v5412_v13, %v10656_v40  ;;  %v10661_v13 = vld [vmem:[#allocation66_spill] sm:$0xff]  ;;  %v10662_v40 = vld [vmem:[#allocation49_spill] sm:$0xff] }
 0x2a7   :  { %v5132_v63 = vcombine.low %v3751_v25, %v3767_v54  ;;  %v4067_v11 = vrot.slane %v5134_v44, %v6482_v29  ;;  %v5413_v44 = vld [vmem:[%s10395_s0 + $0xb6] sm:$0x3] }
 0x2a8   :  { %v7918_v56 = vpop.permute.xlu0 %1329  ;;  %1343 = vrot.lane.b32.xlu1 %v7629_v18, %s5522_s29  ;;  %v10657_v18 = vld [vmem:[#allocation24_spill] sm:$0xff] }
 0x2a9   :  { %v4053_v27 = vrot.slane %v5132_v63, %v6482_v29  ;;  %v2106_v8 = vsel %vm2084_vm2, %v2048_v1, %v10657_v18  ;;  %v10659_v63 = vld [vmem:[#allocation48_spill] sm:$0xff]  ;;  %v5414_v1 = vld [vmem:[%s10395_s0 + $0xba] sm:$0x3] }
 0x2aa   :  { %1345 = vrot.lane.b32.xlu0 %v7642_v36, %s5522_s29  ;;  %v10658_v36 = vld [vmem:[#allocation17_spill] sm:$0xff]  ;;  %v7940_v54 = vpop.permute.xlu1 %1331  ;;  %v2050_v20 = vsel %vm2026_vm1, %v5413_v44, %v10659_v63  ;;  %v2171_v17 = vsel %vm2142_vm3, %v2106_v8, %v10660_v16  ;;  %v10666_v16 = vld [vmem:[#allocation20_spill] sm:$0xff] }
 0x2ab   :  { %v4070_v46 = vcombine.low %v4053_v27, %v4067_v11  ;;  %v2107_v25 = vsel %vm2084_vm2, %v2049_v0, %v10658_v36  ;;  %v2051_v0 = vsel %vm2026_vm1, %v5414_v1, %v10662_v40  ;;  %v2236_v18 = vsel %vm2207_vm4, %v2171_v17, %v7360_v62  ;;  %v10665_v17 = vld [vmem:[#allocation25_spill] sm:$0xff] }
 0x2ac   :  { %v2172_v27 = vsel %vm2142_vm3, %v2107_v25, %v10661_v13  ;;  %v7951_v11 = vpop.permute.xlu0 %1333  ;;  %1347 = vrot.lane.b32.xlu1 %v7647_v23, %s5522_s29  ;;  %v10664_v25 = vld [vmem:[#allocation57_spill] sm:$0xff]  ;;  %v2301_v63 = vsel %vm2272_vm5, %v2236_v18, %v7538_v33 }
 0x2ad   :  { %5349 = vmatprep.mubr.msk.f32.mxu0 %vm3612_vm10, %v4070_v46  ;;  %v2237_v8 = vsel %vm2207_vm4, %v2172_v27, %v7362_v59  ;;  %v10663_v46 = vld [vmem:[#allocation18_spill] sm:$0xff]  ;;  %v2109_v44 = vsel %vm2084_vm2, %v2051_v0, %v10664_v25  ;;  %v241_v25 = vld [vmem:[%s10395_s0 + $0x168] sm:$0x3] }
 0x2ae   :  { %1349 = vrot.lane.b32.xlu0 %v7692_v19, %s5522_s29  ;;  %v2108_v36 = vsel %vm2084_vm2, %v2050_v20, %v10663_v46  ;;  %v2302_v62 = vsel %vm2272_vm5, %v2237_v8, %v7540_v26  ;;  %v2174_v23 = vsel %vm2142_vm3, %v2109_v44, %v10666_v16  ;;  %v2366_v19 = vsel %vm2337_vm6, %v2301_v63, %v7631_v14  ;;  %v1891_v13 = vpop.permute.xlu1 %1890  ;;  %v8041_v44 = vld [vmem:[%s10395_s0 + $0x16c] sm:$0x3]  ;;  %v236_v16 = vld [vmem:[%s10395_s0 + $0x15e] sm:$0x3] }
 0x2af   :  { %v2173_v59 = vsel %vm2142_vm3, %v2108_v36, %v10665_v17  ;;  %v2367_v20 = vsel %vm2337_vm6, %v2302_v62, %v7633_v43  ;;  %v2239_v33 = vsel %vm2207_vm4, %v2174_v23, %v7377_v6  ;;  %v2431_v26 = vsel %vm2402_vm7, %v2366_v19, %v7735_v32 }
 0x2b0   :  { %v2238_v27 = vsel %vm2207_vm4, %v2173_v59, %v7374_v58  ;;  %v2432_v1 = vsel %vm2402_vm7, %v2367_v20, %v7737_v30  ;;  %v1893_v40 = vpop.permute.xlu0 %1892  ;;  %v2496_v0 = vsel %vm2467_vm8, %v2431_v26, %v1891_v13  ;;  %1906 = vrot.lane.b32.xlu1 %v7593_v57, %s5525_s20  ;;  %v2304_v58 = vsel %vm2272_vm5, %v2239_v33, %v7558_v53 }
 0x2b1   :  { %v2303_v14 = vsel %vm2272_vm5, %v2238_v27, %v7556_v38  ;;  %v2497_v43 = vsel %vm2467_vm8, %v2432_v1, %v1893_v40  ;;  %v2369_v30 = vsel %vm2337_vm6, %v2304_v58, %v7651_v7  ;;  %v245_v27 = vld [vmem:[%s10395_s0 + $0x170] sm:$0x3]  ;;  %v247_v1 = vld [vmem:[%s10395_s0 + $0x174] sm:$0x3]  ;;  %v249_v40 = vld [vmem:[%s10395_s0 + $0x178] sm:$0x3] }
 0x2b2   :  { %1908 = vrot.lane.b32.xlu0 %v7606_v10, %s5525_s20  ;;  %v2368_v6 = vsel %vm2337_vm6, %v2303_v14, %v7649_v24  ;;  %v1895_v32 = vpop.permute.xlu1 %1894  ;;  %v2434_v18 = vsel %vm2402_vm7, %v2369_v30, %v7764_v61  ;;  %v2726_v57 = vcombine.low %v2496_v0, %v2497_v43  ;;  %v8023_v24 = vld [vmem:[%s10395_s0 + $0x164] sm:$0x3]  ;;  %v251_v43 = vld [vmem:[%s10395_s0 + $0x17c] sm:$0x3] }
 0x2b3   :  { %v2433_v38 = vsel %vm2402_vm7, %v2368_v6, %v7758_v28  ;;  %v8018_v28 = vld [vmem:[%s10395_s0 + $0x160] sm:$0x3] }
 0x2b4   :  { %v2498_v8 = vsel %vm2467_vm8, %v2433_v38, %v1895_v32  ;;  %v1897_v10 = vpop.permute.xlu0 %1896  ;;  %1910 = vrot.lane.b32.xlu1 %v7611_v48, %s5525_s20  ;;  %v2734_v61 = vrot.slane %v2726_v57, %v6482_v29  ;;  %v8135_v32 = vld [vmem:[%s10395_s0 + $0x16e] sm:$0x3] }
 0x2b5   :  { %v2499_v46 = vsel %vm2467_vm8, %v2434_v18, %v1897_v10  ;;  %v8153_v10 = vld [vmem:[%s10395_s0 + $0x176] sm:$0x3] }
 0x2b6   :  { %1912 = vrot.lane.b32.xlu0 %v7624_v15, %s5525_s20  ;;  %v2727_v53 = vcombine.low %v2498_v8, %v2499_v46  ;;  %v8025_v7 = vpop.permute.xlu1 %448  ;;  %v8148_v8 = vld [vmem:[%s10395_s0 + $0x172] sm:$0x3] }
 0x2b7   :  { %10667 = vst [vmem:[#allocation69_spill] sm:$0xff] %v8025_v7 }
 0x2b8   :  { %v2741_v48 = vrot.slane %v2727_v53, %v6482_v29  ;;  %v8029_v36 = vpop.permute.xlu0 %450  ;;  %456 = vrot.lane.b32.xlu1 %v8018_v28, %s5518_s3 }
 0x2b9   :  { %10668 = vst [vmem:[#allocation77_spill] sm:$0xff] %v8029_v36  ;;  %v10687_v36 = vld [vmem:[#allocation65_spill] sm:$0xff] }
 0x2ba   :  { %458 = vrot.lane.b32.xlu0 %v8023_v24, %s5518_s3  ;;  %v2742_v15 = vcombine.low %v2734_v61, %v2741_v48  ;;  %v8043_v63 = vpop.permute.xlu1 %452  ;;  %v8166_v61 = vld [vmem:[%s10395_s0 + $0x17a] sm:$0x3] }
 0x2bb   :  { %10669 = vst [vmem:[#allocation40_spill] sm:$0xff] %v8043_v63 }
 0x2bc   :  { %5327 = vmatmul.mubr.msk.f32.gmra.mxu1 %vm2879_vm9, %v2742_v15  ;;  %v8046_v62 = vpop.permute.xlu0 %454  ;;  %460 = vrot.lane.b32.xlu1 %v241_v25, %s5518_s3 }
 0x2bd   :  { %10670 = vst [vmem:[#allocation11_spill] sm:$0xff] %v8046_v62  ;;  %v10683_v62 = vld [vmem:[#allocation67_spill] sm:$0xff] }
 0x2be   :  { %462 = vrot.lane.b32.xlu0 %v8041_v44, %s5518_s3  ;;  %v8051_v17 = vpop.permute.xlu1 %667 }
 0x2c0   :  { %v8053_v59 = vpop.permute.xlu0 %669  ;;  %1351 = vrot.lane.b32.xlu1 %v7697_v4, %s5522_s29  ;;  %v8072_v4 = vld [vmem:[%s10395_s0 + $0x162] sm:$0x3] }
 0x2c2   :  { %1353 = vrot.lane.b32.xlu0 %v7710_v21, %s5522_s29  ;;  %v8062_v23 = vpop.permute.xlu1 %671  ;;  %v8077_v21 = vld [vmem:[%s10395_s0 + $0x166] sm:$0x3] }
 0x2c4   :  { %v8064_v19 = vpop.permute.xlu0 %673  ;;  %1355 = vrot.lane.b32.xlu1 %v7715_v35, %s5522_s29  ;;  %v8090_v35 = vld [vmem:[%s10395_s0 + $0x16a] sm:$0x3] }
 0x2c6   :  { %1357 = vrot.lane.b32.xlu0 %v236_v16, %s5522_s29  ;;  %v8079_v20 = vpop.permute.xlu1 %1335 }
 0x2c8   :  { %v8081_v13 = vpop.permute.xlu0 %1337  ;;  %1534 = vrot.lane.b32.xlu1 %v8072_v4, %s5523_s22 }
 0x2ca   :  { %1536 = vrot.lane.b32.xlu0 %v8077_v21, %s5523_s22  ;;  %v8095_v33 = vpop.permute.xlu1 %1339 }
 0x2cc   :  { %v8097_v26 = vpop.permute.xlu0 %1341  ;;  %1538 = vrot.lane.b32.xlu1 %v8090_v35, %s5523_s22 }
 0x2ce   :  { %464 = vrot.lane.b32.xlu0 %v245_v27, %s5518_s3  ;;  %v8108_v14 = vpop.permute.xlu1 %1520 }
 0x2d0   :  { %v8110_v0 = vpop.permute.xlu0 %1522  ;;  %466 = vrot.lane.b32.xlu1 %v247_v1, %s5518_s3 }
 0x2d2   :  { %468 = vrot.lane.b32.xlu0 %v249_v40, %s5518_s3  ;;  %v8117_v58 = vpop.permute.xlu1 %1524 }
 0x2d4   :  { %v8119_v6 = vpop.permute.xlu0 %675  ;;  %470 = vrot.lane.b32.xlu1 %v251_v43, %s5518_s3 }
 0x2d5   :  { %10671 = vst [vmem:[#allocation12_spill] sm:$0xff] %v8119_v6 }
 0x2d6   :  { %683 = vrot.lane.b32.xlu0 %v8072_v4, %s5519_s17  ;;  %v8124_v30 = vpop.permute.xlu1 %677 }
 0x2d7   :  { %10672 = vst [vmem:[#allocation41_spill] sm:$0xff] %v8124_v30 }
 0x2d8   :  { %v8126_v38 = vpop.permute.xlu0 %679  ;;  %685 = vrot.lane.b32.xlu1 %v8077_v21, %s5519_s17 }
 0x2d9   :  { %10673 = vst [vmem:[#allocation78_spill] sm:$0xff] %v8126_v38 }
 0x2da   :  { %687 = vrot.lane.b32.xlu0 %v8090_v35, %s5519_s17  ;;  %v8137_v18 = vpop.permute.xlu1 %681 }
 0x2db   :  { %10674 = vst [vmem:[#allocation79_spill] sm:$0xff] %v8137_v18 }
 0x2dc   :  { %v8139_v57 = vpop.permute.xlu0 %900  ;;  %689 = vrot.lane.b32.xlu1 %v8135_v32, %s5519_s17 }
 0x2de   :  { %1540 = vrot.lane.b32.xlu0 %v8135_v32, %s5523_s22  ;;  %v8155_v46 = vpop.permute.xlu1 %902 }
 0x2e0   :  { %v8157_v53 = vpop.permute.xlu0 %904  ;;  %1542 = vrot.lane.b32.xlu1 %v8148_v8, %s5523_s22 }
 0x2e1   :  { %10675 = vst [vmem:[#allocation13_spill] sm:$0xff] %v8157_v53 }
 0x2e2   :  { %1544 = vrot.lane.b32.xlu0 %v8153_v10, %s5523_s22  ;;  %v8168_v48 = vpop.permute.xlu1 %1526 }
 0x2e4   :  { %v8170_v15 = vpop.permute.xlu0 %1528  ;;  %1546 = vrot.lane.b32.xlu1 %v8166_v61, %s5523_s22 }
 0x2e6   :  { %1721 = vrot.lane.b32.xlu0 %v8018_v28, %s5524_s19  ;;  %v8176_v16 = vpop.permute.xlu1 %1530 }
 0x2e8   :  { %v8178_v2 = vpop.permute.xlu0 %1532  ;;  %1723 = vrot.lane.b32.xlu1 %v8023_v24, %s5524_s19  ;;  %v8202_v24 = vld [vmem:[%s10395_s0 + $0x17e] sm:$0x3] }
 0x2ea   :  { %1725 = vrot.lane.b32.xlu0 %v241_v25, %s5524_s19  ;;  %v8183_v52 = vpop.permute.xlu1 %1705  ;;  %v8207_v25 = vld [vmem:[%s10395_s0 + $0x182] sm:$0x3] }
 0x2ec   :  { %v8185_v55 = vpop.permute.xlu0 %1707  ;;  %1727 = vrot.lane.b32.xlu1 %v8041_v44, %s5524_s19 }
 0x2ee   :  { %691 = vrot.lane.b32.xlu0 %v8148_v8, %s5519_s17  ;;  %v8191_v28 = vpop.permute.xlu1 %1709 }
 0x2f0   :  { %v8193_v51 = vpop.permute.xlu0 %1711  ;;  %693 = vrot.lane.b32.xlu1 %v8153_v10, %s5519_s17 }
 0x2f2   :  { %695 = vrot.lane.b32.xlu0 %v8166_v61, %s5519_s17  ;;  %v8209_v44 = vpop.permute.xlu1 %906 }
 0x2f3   :  { %10676 = vst [vmem:[#allocation14_spill] sm:$0xff] %v8209_v44 }
 0x2f4   :  { %v8211_v49 = vpop.permute.xlu0 %908  ;;  %697 = vrot.lane.b32.xlu1 %v8202_v24, %s5519_s17 }
 0x2f5   :  { %10677 = vst [vmem:[#allocation42_spill] sm:$0xff] %v8211_v49 }
 0x2f6   :  { %914 = vrot.lane.b32.xlu0 %v8207_v25, %s5520_s18  ;;  %v8227_v37 = vpop.permute.xlu1 %910 }
 0x2f7   :  { %10678 = vst [vmem:[#allocation43_spill] sm:$0xff] %v8227_v37 }
 0x2f8   :  { %v8229_v31 = vpop.permute.xlu0 %912  ;;  %916 = vrot.lane.b32.xlu1 %v8220_v41, %s5520_s18 }
 0x2f9   :  { %10679 = vst [vmem:[#allocation44_spill] sm:$0xff] %v8229_v31  ;;  %v10682_v31 = vld [vmem:[#allocation50_spill] sm:$0xff] }
 0x2fa   :  { %918 = vrot.lane.b32.xlu0 %v8225_v9, %s5520_s18  ;;  %v8235_v18 = vpop.permute.xlu1 %1143  ;;  %v2052_v37 = vsel %vm2026_vm1, 0.0, %v10682_v31 }
 0x2fb   :  { %v2110_v30 = vsel %vm2084_vm2, %v2052_v37, %v10683_v62  ;;  %v10686_v62 = vld [vmem:[#allocation68_spill] sm:$0xff] }
 0x2fc   :  { %v8237_v49 = vpop.permute.xlu0 %1145  ;;  %1729 = vrot.lane.b32.xlu1 %v245_v27, %s5524_s19  ;;  %v5415_v27 = vld [vmem:[%s10395_s0 + $0xe2] sm:$0x3] }
 0x2fe   :  { %1731 = vrot.lane.b32.xlu0 %v247_v1, %s5524_s19  ;;  %v8241_v44 = vpop.permute.xlu1 %1147  ;;  %v10684_v1 = vld [vmem:[#allocation51_spill] sm:$0xff] }
 0x2ff   :  { %10680 = vst [vmem:[#allocation45_spill] sm:$0xff] %v8241_v44  ;;  %v2053_v31 = vsel %vm2026_vm1, %v5415_v27, %v10684_v1  ;;  %v10689_v27 = vld [vmem:[#allocation52_spill] sm:$0xff] }
 0x300   :  { %v8243_v38 = vpop.permute.xlu0 %1149  ;;  %1733 = vrot.lane.b32.xlu1 %v249_v40, %s5524_s19  ;;  %v10685_v40 = vld [vmem:[#allocation56_spill] sm:$0xff] }
 0x301   :  { %10681 = vst [vmem:[#allocation23_spill] sm:$0xff] %v8243_v38  ;;  %v2175_v37 = vsel %vm2142_vm3, %v2110_v30, %v10685_v40  ;;  %v5416_v30 = vld [vmem:[%s10395_s0 + $0xe6] sm:$0x3] }
 0x302   :  { %1735 = vrot.lane.b32.xlu0 %v251_v43, %s5524_s19  ;;  %v8251_v6 = vpop.permute.xlu1 %1713  ;;  %v2111_v43 = vsel %vm2084_vm2, %v2053_v31, %v10686_v62  ;;  %v2240_v7 = vsel %vm2207_vm4, %v2175_v37, %v10687_v36  ;;  %v2054_v1 = vsel %vm2026_vm1, %v5416_v30, %v10689_v27  ;;  %v10690_v31 = vld [vmem:[#allocation72_spill] sm:$0xff]  ;;  %v10693_v30 = vld [vmem:[#allocation22_spill] sm:$0xff] }
 0x303   :  { %v2305_v38 = vsel %vm2272_vm5, %v2240_v7, %v7916_v5  ;;  %v5417_v5 = vld [vmem:[%s10395_s0 + $0xea] sm:$0x3]  ;;  %v10691_v7 = vld [vmem:[#allocation53_spill] sm:$0xff]  ;;  %v10692_v62 = vld [vmem:[#allocation28_spill] sm:$0xff] }
 0x304   :  { %v8253_v63 = vpop.permute.xlu0 %1715  ;;  %1914 = vrot.lane.b32.xlu1 %v8072_v4, %s5525_s20  ;;  %v2055_v37 = vsel %vm2026_vm1, %v5417_v5, %v10691_v7  ;;  %v10695_v7 = vld [vmem:[#allocation32_spill] sm:$0xff] }
 0x305   :  { %v2113_v27 = vsel %vm2084_vm2, %v2055_v37, %v10693_v30  ;;  %v10696_v37 = vld [vmem:[#allocation73_spill] sm:$0xff] }
 0x306   :  { %1916 = vrot.lane.b32.xlu0 %v8077_v21, %s5525_s20  ;;  %v8270_v4 = vpop.permute.xlu1 %1717  ;;  %v2176_v21 = vsel %vm2142_vm3, %v2111_v43, %v10688_v39  ;;  %v4028_v39 = vld [vmem:[#allocation2 + $0x118] sm:$0xff]  ;;  %v2112_v43 = vsel %vm2084_vm2, %v2054_v1, %v10692_v62  ;;  %v2370_v1 = vsel %vm2337_vm6, %v2305_v38, %v6224_v3  ;;  %v2178_v62 = vsel %vm2142_vm3, %v2113_v27, %v10695_v7 }
 0x307   :  { %v2241_v36 = vsel %vm2207_vm4, %v2176_v21, %v10690_v31  ;;  %5341 = vmatprep.subr.mxu0 %v4028_v39  ;;  %v10694_v31 = vld [vmem:[#allocation71_spill] sm:$0xff] }
 0x308   :  { %v8276_v44 = vpop.permute.xlu0 %1719  ;;  %1918 = vrot.lane.b32.xlu1 %v8090_v35, %s5525_s20  ;;  %v2306_v21 = vsel %vm2272_vm5, %v2241_v36, %v7918_v56  ;;  %v8301_v35 = vld [vmem:[%s10395_s0 + $0x18e] sm:$0x3]  ;;  %v2177_v53 = vsel %vm2142_vm3, %v2112_v43, %v10694_v31  ;;  %v8314_v36 = vld [vmem:[%s10395_s0 + $0x192] sm:$0x3]  ;;  %5342 = vmatpush3.msra.mxu0 %v4028_v39  ;;  %v2435_v43 = vsel %vm2402_vm7, %v2370_v1, %v8183_v52 }
 0x309   :  { %v2371_v5 = vsel %vm2337_vm6, %v2306_v21, %v8108_v14  ;;  %v2242_v30 = vsel %vm2207_vm4, %v2177_v53, %v10696_v37  ;;  %v10697_v21 = vld [vmem:[#allocation34_spill] sm:$0xff]  ;;  %v4026_v53 = vld [vmem:[#allocation2 + $0x108] sm:$0xff] }
 0x30a   :  { %1920 = vrot.lane.b32.xlu0 %v8135_v32, %s5525_s20  ;;  %v4027_v32 = vld [vmem:[#allocation2 + $0x110] sm:$0xff]  ;;  %v1899_v56 = vpop.permute.xlu1 %1898  ;;  %v2436_v14 = vsel %vm2402_vm7, %v2371_v5, %v8185_v55  ;;  %v2243_v31 = vsel %vm2207_vm4, %v2178_v62, %v10697_v21  ;;  %v2307_v39 = vsel %vm2272_vm5, %v2242_v30, %v7940_v54  ;;  %v4025_v5 = vld [vmem:[#allocation2 + $0x100] sm:$0xff] }
 0x30b   :  { %5343 = vmatprep.subr.mxu0 %v4027_v32  ;;  %v2500_v3 = vsel %vm2467_vm8, %v2435_v43, %v1899_v56  ;;  %v2308_v52 = vsel %vm2272_vm5, %v2243_v31, %v7951_v11  ;;  %v2372_v55 = vsel %vm2337_vm6, %v2307_v39, %v8110_v0  ;;  %v8341_v54 = vld [vmem:[%s10395_s0 + $0x196] sm:$0x3]  ;;  %v8350_v0 = vld [vmem:[%s10395_s0 + $0x19a] sm:$0x3]  ;;  %v253_v30 = vld [vmem:[%s10395_s0 + $0x180] sm:$0x3] }
 0x30c   :  { %v1901_v38 = vpop.permute.xlu0 %1900  ;;  %920 = vrot.lane.b32.xlu1 %v8301_v35, %s5520_s18  ;;  %5344 = vmatpush3.msra.mxu0 %v4027_v32  ;;  %v2373_v1 = vsel %vm2337_vm6, %v2308_v52, %v8117_v58  ;;  %v2437_v56 = vsel %vm2402_vm7, %v2372_v55, %v8191_v28  ;;  %v257_v31 = vld [vmem:[%s10395_s0 + $0x188] sm:$0x3] }
 0x30d   :  { %v2501_v27 = vsel %vm2467_vm8, %v2436_v14, %v1901_v38  ;;  %5345 = vmatprep.subr.mxu0 %v4026_v53  ;;  %v2438_v7 = vsel %vm2402_vm7, %v2373_v1, %v8193_v51  ;;  %v255_v51 = vld [vmem:[%s10395_s0 + $0x184] sm:$0x3]  ;;  %v10698_v1 = vld [vmem:[#allocation54_spill] sm:$0xff] }
 0x30e   :  { %922 = vrot.lane.b32.xlu0 %v8314_v36, %s5520_s18  ;;  %v1903_v11 = vpop.permute.xlu1 %1902  ;;  %v2743_v62 = vcombine.low %v2500_v3, %v2501_v27  ;;  %5346 = vmatpush3.msra.mxu0 %v4026_v53  ;;  %v259_v27 = vld [vmem:[%s10395_s0 + $0x18c] sm:$0x3] }
 0x30f   :  { %v2502_v32 = vsel %vm2467_vm8, %v2437_v56, %v1903_v11  ;;  %5347 = vmatprep.subr.mxu0 %v4025_v5  ;;  %v5419_v11 = vld [vmem:[%s10395_s0 + $0xf2] sm:$0x3] }
 0x310   :  { %v1905_v37 = vpop.permute.xlu0 %1904  ;;  %924 = vrot.lane.b32.xlu1 %v8341_v54, %s5520_s18  ;;  %5348 = vmatpush3.msra.mxu0 %v4025_v5  ;;  %v2751_v43 = vrot.slane %v2743_v62, %v6482_v29  ;;  %v5418_v5 = vld [vmem:[%s10395_s0 + $0xee] sm:$0x3] }
 0x311   :  { %v2503_v58 = vsel %vm2467_vm8, %v2438_v7, %v1905_v37  ;;  %v2056_v56 = vsel %vm2026_vm1, %v5418_v5, %v10698_v1  ;;  %v10699_v7 = vld [vmem:[#allocation55_spill] sm:$0xff] }
 0x312   :  { %v2744_v28 = vcombine.low %v2502_v32, %v2503_v58  ;;  %926 = vrot.lane.b32.xlu0 %v8350_v0, %s5520_s18  ;;  %v8363_v3 = vpop.permute.xlu1 %1151  ;;  %v2057_v62 = vsel %vm2026_vm1, %v5419_v11, %v10699_v7  ;;  %v10700_v32 = vld [vmem:[#allocation29_spill] sm:$0xff]  ;;  %v10701_v37 = vld [vmem:[#allocation27_spill] sm:$0xff]  ;;  %v10705_v11 = vld [vmem:[#allocation60_spill] sm:$0xff] }
 0x313   :  { %v2115_v58 = vsel %vm2084_vm2, %v2057_v62, %v10701_v37  ;;  %v10706_v62 = vld [vmem:[#allocation62_spill] sm:$0xff] }
 0x314   :  { %v2758_v14 = vrot.slane %v2744_v28, %v6482_v29  ;;  %v8370_v38 = vpop.permute.xlu0 %1153  ;;  %1159 = vrot.lane.b32.xlu1 %v253_v30, %s5521_s13  ;;  %v10702_v30 = vld [vmem:[#allocation30_spill] sm:$0xff] }
 0x316   :  { %v2759_v21 = vcombine.low %v2751_v43, %v2758_v14  ;;  %1161 = vrot.lane.b32.xlu0 %v255_v51, %s5521_s13  ;;  %v8377_v39 = vpop.permute.xlu1 %1155  ;;  %v10703_v43 = vld [vmem:[#allocation33_spill] sm:$0xff] }
 0x317   :  { %v2180_v14 = vsel %vm2142_vm3, %v2115_v58, %v10703_v43  ;;  %v10708_v58 = vld [vmem:[#allocation31_spill] sm:$0xff]  ;;  %v10709_v43 = vld [vmem:[#allocation64_spill] sm:$0xff] }
 0x318   :  { %5329 = vmatprep.mubr.msk.f32.mxu1 %vm2879_vm9, %v2759_v21  ;;  %v8383_v53 = vpop.permute.xlu0 %1157  ;;  %1163 = vrot.lane.b32.xlu1 %v257_v31, %s5521_s13  ;;  %v10704_v31 = vld [vmem:[#allocation59_spill] sm:$0xff]  ;;  %v2245_v1 = vsel %vm2207_vm4, %v2180_v14, %v7884_v22  ;;  %v8444_v22 = vld [vmem:[%s10395_s0 + $0x1a0] sm:$0x3] }
 0x31a   :  { %1165 = vrot.lane.b32.xlu0 %v259_v27, %s5521_s13  ;;  %v8387_v52 = vpop.permute.xlu1 %1343 }
 0x31c   :  { %v8389_v55 = vpop.permute.xlu0 %1345  ;;  %1922 = vrot.lane.b32.xlu1 %v8148_v8, %s5525_s20  ;;  %v2114_v8 = vsel %vm2084_vm2, %v2056_v56, %v10700_v32  ;;  %v5421_v56 = vld [vmem:[%s10395_s0 + $0xfa] sm:$0x3] }
 0x31d   :  { %v2179_v51 = vsel %vm2142_vm3, %v2114_v8, %v10702_v30  ;;  %v2059_v7 = vsel %vm2026_vm1, %v5421_v56, %v10705_v11 }
 0x31e   :  { %1924 = vrot.lane.b32.xlu0 %v8153_v10, %s5525_s20  ;;  %v8409_v28 = vpop.permute.xlu1 %1347  ;;  %v5420_v10 = vld [vmem:[%s10395_s0 + $0xf6] sm:$0x3]  ;;  %v2244_v5 = vsel %vm2207_vm4, %v2179_v51, %v7875_v34  ;;  %v2310_v34 = vsel %vm2272_vm5, %v2245_v1, %v8081_v13 }
 0x31f   :  { %v2058_v27 = vsel %vm2026_vm1, %v5420_v10, %v10704_v31  ;;  %v2309_v8 = vsel %vm2272_vm5, %v2244_v5, %v8079_v20  ;;  %v2375_v13 = vsel %vm2337_vm6, %v2310_v34, %v8170_v15 }
 0x320   :  { %v8415_v21 = vpop.permute.xlu0 %1349  ;;  %1926 = vrot.lane.b32.xlu1 %v8166_v61, %s5525_s20  ;;  %v2116_v32 = vsel %vm2084_vm2, %v2058_v27, %v10706_v62  ;;  %v10707_v61 = vld [vmem:[#allocation63_spill] sm:$0xff]  ;;  %v2374_v20 = vsel %vm2337_vm6, %v2309_v8, %v8168_v48  ;;  %v2440_v48 = vsel %vm2402_vm7, %v2375_v13, %v8253_v63 }
 0x321   :  { %v2117_v37 = vsel %vm2084_vm2, %v2059_v7, %v10707_v61  ;;  %v2181_v30 = vsel %vm2142_vm3, %v2116_v32, %v10708_v58  ;;  %v2439_v31 = vsel %vm2402_vm7, %v2374_v20, %v8251_v6  ;;  %v265_v20 = vld [vmem:[%s10395_s0 + $0x198] sm:$0x3] }
 0x322   :  { %1928 = vrot.lane.b32.xlu0 %v8202_v24, %s5525_s20  ;;  %v1907_v51 = vpop.permute.xlu1 %1906  ;;  %v8457_v24 = vld [vmem:[%s10395_s0 + $0x1a4] sm:$0x3]  ;;  %v2182_v14 = vsel %vm2142_vm3, %v2117_v37, %v10709_v43  ;;  %v2246_v10 = vsel %vm2207_vm4, %v2181_v30, %v7906_v45 }
 0x323   :  { %v2247_v15 = vsel %vm2207_vm4, %v2182_v14, %v7908_v60  ;;  %v2311_v5 = vsel %vm2272_vm5, %v2246_v10, %v8095_v33  ;;  %v2504_v1 = vsel %vm2467_vm8, %v2439_v31, %v1907_v51  ;;  %v8484_v60 = vld [vmem:[%s10395_s0 + $0x1a8] sm:$0x3]  ;;  %v267_v51 = vld [vmem:[%s10395_s0 + $0x19c] sm:$0x3] }
 0x324   :  { %v1909_v27 = vpop.permute.xlu0 %1908  ;;  %472 = vrot.lane.b32.xlu1 %v8444_v22, %s5518_s3  ;;  %v2312_v45 = vsel %vm2272_vm5, %v2247_v15, %v8097_v26  ;;  %v2376_v63 = vsel %vm2337_vm6, %v2311_v5, %v8176_v16  ;;  %v8493_v26 = vld [vmem:[%s10395_s0 + $0x1ac] sm:$0x3]  ;;  %v8574_v5 = vld [vmem:[%s10395_s0 + $0x1bc] sm:$0x3] }
 0x325   :  { %v2505_v56 = vsel %vm2467_vm8, %v2440_v48, %v1909_v27  ;;  %v2377_v33 = vsel %vm2337_vm6, %v2312_v45, %v8178_v2  ;;  %v2441_v6 = vsel %vm2402_vm7, %v2376_v63, %v8270_v4  ;;  %v261_v4 = vld [vmem:[%s10395_s0 + $0x190] sm:$0x3]  ;;  %v8592_v63 = vld [vmem:[%s10395_s0 + $0x1a6] sm:$0x3] }
 0x326   :  { %474 = vrot.lane.b32.xlu0 %v8457_v24, %s5518_s3  ;;  %v1911_v11 = vpop.permute.xlu1 %1910  ;;  %v2442_v16 = vsel %vm2402_vm7, %v2377_v33, %v8276_v44  ;;  %v2760_v7 = vcombine.low %v2504_v1, %v2505_v56  ;;  %v263_v44 = vld [vmem:[%s10395_s0 + $0x194] sm:$0x3]  ;;  %v8549_v27 = vld [vmem:[%s10395_s0 + $0x1b0] sm:$0x3]  ;;  %v8585_v56 = vld [vmem:[%s10395_s0 + $0x1a2] sm:$0x3] }
 0x327   :  { %v2506_v62 = vsel %vm2467_vm8, %v2441_v6, %v1911_v11  ;;  %v8603_v6 = vld [vmem:[%s10395_s0 + $0x1aa] sm:$0x3] }
 0x328   :  { %v1913_v32 = vpop.permute.xlu0 %1912  ;;  %476 = vrot.lane.b32.xlu1 %v8484_v60, %s5518_s3  ;;  %v2768_v61 = vrot.slane %v2760_v7, %v6482_v29 }
 0x329   :  { %v2507_v8 = vsel %vm2467_vm8, %v2442_v16, %v1913_v32  ;;  %v8610_v16 = vld [vmem:[%s10395_s0 + $0x1ae] sm:$0x3] }
 0x32a   :  { %v2761_v2 = vcombine.low %v2506_v62, %v2507_v8  ;;  %478 = vrot.lane.b32.xlu0 %v8493_v26, %s5518_s3  ;;  %v8506_v34 = vpop.permute.xlu1 %456 }
 0x32c   :  { %v2775_v37 = vrot.slane %v2761_v2, %v6482_v29  ;;  %v8513_v58 = vpop.permute.xlu0 %458  ;;  %1167 = vrot.lane.b32.xlu1 %v261_v4, %s5521_s13  ;;  %v268_v2 = vld [vmem:[%s10395_s0 + $0x19e] sm:$0x3] }
 0x32d   :  { %10710 = vst [vmem:[#allocation19_spill] sm:$0xff] %v8513_v58 }
 0x32e   :  { %v2776_v30 = vcombine.low %v2768_v61, %v2775_v37  ;;  %1169 = vrot.lane.b32.xlu0 %v263_v44, %s5521_s13  ;;  %v8520_v13 = vpop.permute.xlu1 %460  ;;  %v8660_v37 = vld [vmem:[%s10395_s0 + $0x1b6] sm:$0x3] }
 0x32f   :  { %10711 = vst [vmem:[#allocation26_spill] sm:$0xff] %v8520_v13 }
 0x330   :  { %5330 = vmatmul.mubr.msk.f32.gmra.mxu1 %vm2879_vm9, %v2776_v30  ;;  %v8526_v43 = vpop.permute.xlu0 %462  ;;  %1171 = vrot.lane.b32.xlu1 %v265_v20, %s5521_s13  ;;  %v8665_v20 = vld [vmem:[%s10395_s0 + $0x1ba] sm:$0x3] }
 0x331   :  { %10712 = vst [vmem:[#allocation21_spill] sm:$0xff] %v8526_v43 }
 0x332   :  { %1173 = vrot.lane.b32.xlu0 %v267_v51, %s5521_s13  ;;  %v8530_v14 = vpop.permute.xlu1 %1351 }
 0x334   :  { %v8532_v10 = vpop.permute.xlu0 %1353  ;;  %1359 = vrot.lane.b32.xlu1 %v8207_v25, %s5522_s29 }
 0x336   :  { %1361 = vrot.lane.b32.xlu0 %v8220_v41, %s5522_s29  ;;  %v8538_v31 = vpop.permute.xlu1 %1355  ;;  %v8556_v41 = vld [vmem:[%s10395_s0 + $0x1b4] sm:$0x3] }
 0x338   :  { %v8540_v48 = vpop.permute.xlu0 %1357  ;;  %1363 = vrot.lane.b32.xlu1 %v8225_v9, %s5522_s29  ;;  %v8567_v9 = vld [vmem:[%s10395_s0 + $0x1b8] sm:$0x3] }
 0x33a   :  { %1365 = vrot.lane.b32.xlu0 %v8301_v35, %s5522_s29  ;;  %v8551_v15 = vpop.permute.xlu1 %1534 }
 0x33c   :  { %v8558_v25 = vpop.permute.xlu0 %1536  ;;  %480 = vrot.lane.b32.xlu1 %v8549_v27, %s5518_s3 }
 0x33e   :  { %482 = vrot.lane.b32.xlu0 %v8556_v41, %s5518_s3  ;;  %v8569_v35 = vpop.permute.xlu1 %1538 }
 0x340   :  { %v8576_v1 = vpop.permute.xlu0 %464  ;;  %484 = vrot.lane.b32.xlu1 %v8567_v9, %s5518_s3 }
 0x341   :  { %10713 = vst [vmem:[#allocation46_spill] sm:$0xff] %v8576_v1  ;;  %v8694_v1 = vld [vmem:[%s10395_s0 + $0x1c6] sm:$0x3] }
 0x342   :  { %486 = vrot.lane.b32.xlu0 %v8574_v5, %s5518_s3  ;;  %v8587_v45 = vpop.permute.xlu1 %466  ;;  %s5485_s3 = scalar_lea.vmem %s5103_s21, 64 }
 0x343   :  { %10714 = vst [vmem:[#allocation47_spill] sm:$0xff] %v8587_v45  ;;  %p5486_p10 = scmp.ne.s32.totalorder %s5103_s21, %s5485_s3  ;;  %p5491_p12 = scmp.lt.s32.totalorder %s5485_s3, %s5485_s3 }
 0x344   :  { %v8594_v33 = vpop.permute.xlu0 %468  ;;  %699 = vrot.lane.b32.xlu1 %v8585_v56, %s5519_s17 }
 0x345   :  { %10715 = vst [vmem:[#allocation24_spill] sm:$0xff] %v8594_v33  ;;  %v8683_v33 = vld [vmem:[%s10395_s0 + $0x1c2] sm:$0x3]  ;;  %p5492_p13 = por %p5491_p12, %p5490_p11 }
 0x346   :  { %701 = vrot.lane.b32.xlu0 %v8592_v63, %s5519_s17  ;;  %v8605_v11 = vpop.permute.xlu1 %470 }
 0x347   :  { %10716 = vst [vmem:[#allocation17_spill] sm:$0xff] %v8605_v11  ;;  %p5493_p0 = pnand %p5492_p13, %p5486_p10 }
 0x348   :  { %v8612_v7 = vpop.permute.xlu0 %683  ;;  %703 = vrot.lane.b32.xlu1 %v8603_v6, %s5519_s17 }
 0x349   :  { %10717 = vst [vmem:[#allocation48_spill] sm:$0xff] %v8612_v7 }
 0x34a   :  { %705 = vrot.lane.b32.xlu0 %v8610_v16, %s5519_s17  ;;  %v8618_v62 = vpop.permute.xlu1 %685 }
 0x34b   :  { %10718 = vst [vmem:[#allocation58_spill] sm:$0xff] %v8618_v62 }
 0x34c   :  { %v8620_v32 = vpop.permute.xlu0 %687  ;;  %1367 = vrot.lane.b32.xlu1 %v8314_v36, %s5522_s29 }
 0x34d   :  { %10719 = vst [vmem:[#allocation66_spill] sm:$0xff] %v8620_v32  ;;  %v8701_v32 = vld [vmem:[%s10395_s0 + $0x1ca] sm:$0x3] }
 0x34e   :  { %1369 = vrot.lane.b32.xlu0 %v8341_v54, %s5522_s29  ;;  %v8626_v8 = vpop.permute.xlu1 %689  ;;  %v8649_v54 = vld [vmem:[%s10395_s0 + $0x1b2] sm:$0x3] }
 0x34f   :  { %10720 = vst [vmem:[#allocation49_spill] sm:$0xff] %v8626_v8 }
 0x350   :  { %v8631_v4 = vpop.permute.xlu0 %1540  ;;  %1371 = vrot.lane.b32.xlu1 %v8350_v0, %s5522_s29 }
 0x352   :  { %1373 = vrot.lane.b32.xlu0 %v268_v2, %s5522_s29  ;;  %v8636_v44 = vpop.permute.xlu1 %1542  ;;  %v8676_v2 = vld [vmem:[%s10395_s0 + $0x1be] sm:$0x3] }
 0x354   :  { %v8638_v61 = vpop.permute.xlu0 %1544  ;;  %1548 = vrot.lane.b32.xlu1 %v8585_v56, %s5523_s22 }
 0x356   :  { %1550 = vrot.lane.b32.xlu0 %v8592_v63, %s5523_s22  ;;  %v8644_v36 = vpop.permute.xlu1 %1546 }
 0x358   :  { %v8651_v0 = vpop.permute.xlu0 %1721  ;;  %1552 = vrot.lane.b32.xlu1 %v8603_v6, %s5523_s22 }
 0x35a   :  { %707 = vrot.lane.b32.xlu0 %v8649_v54, %s5519_s17  ;;  %v1724_v30 = vpop.permute.xlu1 %1723 }
 0x35c   :  { %v8667_v51 = vpop.permute.xlu0 %1725  ;;  %709 = vrot.lane.b32.xlu1 %v8660_v37, %s5519_s17 }
 0x35e   :  { %711 = vrot.lane.b32.xlu0 %v8665_v20, %s5519_s17  ;;  %v8678_v11 = vpop.permute.xlu1 %1727 }
 0x360   :  { %v8685_v45 = vpop.permute.xlu0 %691  ;;  %713 = vrot.lane.b32.xlu1 %v8676_v2, %s5519_s17 }
 0x361   :  { %10721 = vst [vmem:[#allocation18_spill] sm:$0xff] %v8685_v45 }
 0x362   :  { %928 = vrot.lane.b32.xlu0 %v8683_v33, %s5520_s18  ;;  %v8696_v8 = vpop.permute.xlu1 %693 }
 0x363   :  { %10722 = vst [vmem:[#allocation57_spill] sm:$0xff] %v8696_v8 }
 0x364   :  { %v8703_v43 = vpop.permute.xlu0 %695  ;;  %930 = vrot.lane.b32.xlu1 %v8694_v1, %s5520_s18 }
 0x365   :  { %10723 = vst [vmem:[#allocation25_spill] sm:$0xff] %v8703_v43  ;;  %v2060_v43 = vsel %vm2026_vm1, 0.0, %v7835_v12 }
 0x366   :  { %932 = vrot.lane.b32.xlu0 %v8701_v32, %s5520_s18  ;;  %v8709_v45 = vpop.permute.xlu1 %697 }
 0x367   :  { %10724 = vst [vmem:[#allocation20_spill] sm:$0xff] %v8709_v45  ;;  %v2118_v45 = vsel %vm2084_vm2, %v2060_v43, %v8051_v17 }
 0x368   :  { %v8711_v13 = vpop.permute.xlu0 %914  ;;  %1554 = vrot.lane.b32.xlu1 %v8610_v16, %s5523_s22 }
 0x369   :  { %10725 = vst [vmem:[#allocation50_spill] sm:$0xff] %v8711_v13 }
 0x36a   :  { %1556 = vrot.lane.b32.xlu0 %v8649_v54, %s5523_s22  ;;  %v8717_v8 = vpop.permute.xlu1 %916 }
 0x36b   :  { %10726 = vst [vmem:[#allocation67_spill] sm:$0xff] %v8717_v8  ;;  %v2183_v8 = vsel %vm2142_vm3, %v2118_v45, %v10685_v40 }
 0x36c   :  { %v8719_v62 = vpop.permute.xlu0 %918  ;;  %1558 = vrot.lane.b32.xlu1 %v8660_v37, %s5523_s22  ;;  %v2248_v43 = vsel %vm2207_vm4, %v2183_v8, %v8235_v18  ;;  %v8772_v8 = vpop.f32.mrf.mxu1 }
 0x36d   :  { %10727 = vst [vmem:[#allocation51_spill] sm:$0xff] %v8719_v62  ;;  %v5422_v62 = vld [vmem:[%s10395_s0 + $0x122] sm:$0x3] }
 0x36e   :  { %1560 = vrot.lane.b32.xlu0 %v8665_v20, %s5523_s22  ;;  %v8729_v13 = vpop.permute.xlu1 %1729  ;;  %v2061_v12 = vsel %vm2026_vm1, %v5422_v62, %v7840_v47  ;;  %v2313_v47 = vsel %vm2272_vm5, %v2248_v43, %v8387_v52 }
 0x36f   :  { %v2119_v17 = vsel %vm2084_vm2, %v2061_v12, %v8053_v59 }
 0x370   :  { %v8731_v58 = vpop.permute.xlu0 %1731  ;;  %1737 = vrot.lane.b32.xlu1 %v8444_v22, %s5524_s19  ;;  %v2184_v7 = vsel %vm2142_vm3, %v2119_v17, %v8139_v57  ;;  %v5424_v57 = vld [vmem:[%s10395_s0 + $0x12a] sm:$0x3]  ;;  %v10729_v17 = vld [vmem:[#allocation13_spill] sm:$0xff] }
 0x371   :  { %v2249_v18 = vsel %vm2207_vm4, %v2184_v7, %v8237_v49  ;;  %v2063_v52 = vsel %vm2026_vm1, %v5424_v57, %v7853_v50  ;;  %v8781_v49 = vld [vmem:[%s10395_s0 + $0x1ce] sm:$0x3]  ;;  %v10728_v7 = vld [vmem:[#allocation61_spill] sm:$0xff] }
 0x372   :  { %1739 = vrot.lane.b32.xlu0 %v8457_v24, %s5524_s19  ;;  %v8748_v22 = vpop.permute.xlu1 %1733  ;;  %v5423_v24 = vld [vmem:[%s10395_s0 + $0x126] sm:$0x3] }
 0x373   :  { %v2062_v59 = vsel %vm2026_vm1, %v5423_v24, %v7847_v42  ;;  %v2314_v42 = vsel %vm2272_vm5, %v2249_v18, %v8389_v55  ;;  %v2378_v55 = vsel %vm2337_vm6, %v2313_v47, %v10728_v7  ;;  %v10730_v24 = vld [vmem:[#allocation45_spill] sm:$0xff]  ;;  %v10731_v18 = vld [vmem:[#allocation23_spill] sm:$0xff] }
 0x374   :  { %v8754_v62 = vpop.permute.xlu0 %1735  ;;  %1741 = vrot.lane.b32.xlu1 %v8484_v60, %s5524_s19  ;;  %v2120_v45 = vsel %vm2084_vm2, %v2062_v59, %v8062_v23  ;;  %v2121_v60 = vsel %vm2084_vm2, %v2063_v52, %v8064_v19  ;;  %v2379_v23 = vsel %vm2337_vm6, %v2314_v42, %v8551_v15  ;;  %v8811_v42 = vpop.f32.mrf.mxu1 }
 0x375   :  { %v2185_v50 = vsel %vm2142_vm3, %v2120_v45, %v8155_v46  ;;  %v2186_v43 = vsel %vm2142_vm3, %v2121_v60, %v10729_v17  ;;  %v2443_v46 = vsel %vm2402_vm7, %v2378_v55, %v8651_v0  ;;  %v2444_v15 = vsel %vm2402_vm7, %v2379_v23, %v1724_v30 }
 0x376   :  { %1743 = vrot.lane.b32.xlu0 %v8493_v26, %s5524_s19  ;;  %v1915_v12 = vpop.permute.xlu1 %1914  ;;  %v8794_v26 = vld [vmem:[%s10395_s0 + $0x1d2] sm:$0x3]  ;;  %v2250_v19 = vsel %vm2207_vm4, %v2185_v50, %v10730_v24  ;;  %v2251_v47 = vsel %vm2207_vm4, %v2186_v43, %v10731_v18  ;;  %v10732_v24 = vld [vmem:[#allocation37_spill] sm:$0xff] }
 0x377   :  { %v2315_v57 = vsel %vm2272_vm5, %v2250_v19, %v8409_v28  ;;  %v2508_v52 = vsel %vm2467_vm8, %v2443_v46, %v1915_v12  ;;  %v2316_v0 = vsel %vm2272_vm5, %v2251_v47, %v8415_v21  ;;  %v8822_v28 = vld [vmem:[%s10395_s0 + $0x1d6] sm:$0x3]  ;;  %v8831_v21 = vld [vmem:[%s10395_s0 + $0x1da] sm:$0x3]  ;;  %v287_v47 = vld [vmem:[%s10395_s0 + $0x1c4] sm:$0x3] }
 0x378   :  { %v1917_v59 = vpop.permute.xlu0 %1916  ;;  %934 = vrot.lane.b32.xlu1 %v8781_v49, %s5520_s18  ;;  %v2380_v30 = vsel %vm2337_vm6, %v2315_v57, %v8558_v25  ;;  %v2381_v60 = vsel %vm2337_vm6, %v2316_v0, %v8569_v35 }
 0x379   :  { %v2509_v45 = vsel %vm2467_vm8, %v2444_v15, %v1917_v59  ;;  %v2445_v50 = vsel %vm2402_vm7, %v2380_v30, %v8667_v51  ;;  %v2446_v25 = vsel %vm2402_vm7, %v2381_v60, %v8678_v11  ;;  %v285_v11 = vld [vmem:[%s10395_s0 + $0x1c0] sm:$0x3] }
 0x37a   :  { %936 = vrot.lane.b32.xlu0 %v8794_v26, %s5520_s18  ;;  %v1919_v23 = vpop.permute.xlu1 %1918  ;;  %v2777_v55 = vcombine.low %v2508_v52, %v2509_v45 }
 0x37b   :  { %v2510_v12 = vsel %vm2467_vm8, %v2445_v50, %v1919_v23  ;;  %v289_v23 = vld [vmem:[%s10395_s0 + $0x1c8] sm:$0x3] }
 0x37c   :  { %v5328_v17 = vpop.f32.mrf.mxu1  ;;  %v1921_v43 = vpop.permute.xlu0 %1920  ;;  %938 = vrot.lane.b32.xlu1 %v8822_v28, %s5520_s18  ;;  %v2785_v57 = vrot.slane %v2777_v55, %v6482_v29 }
 0x37d   :  { %v3018_v19 = vadd.f32 %v5328_v17, %v10732_v24  ;;  %v2511_v35 = vsel %vm2467_vm8, %v2446_v25, %v1921_v43 }
 0x37e   :  { %v2778_v51 = vcombine.low %v2510_v12, %v2511_v35  ;;  %v3012_v46 = vpop.f32.mrf.mxu1  ;;  %940 = vrot.lane.b32.xlu0 %v8831_v21, %s5520_s18  ;;  %v8846_v18 = vpop.permute.xlu1 %920 }
 0x37f   :  { %v3068_v15 = vmax.f32 %v3018_v19, 0.0  ;;  %v3013_v59 = vadd.f32 %v10732_v24, %v3012_v46  ;;  %v291_v24 = vld [vmem:[%s10395_s0 + $0x1cc] sm:$0x3] }
 0x380   :  { %v2792_v52 = vrot.slane %v2778_v51, %v6482_v29  ;;  %v8853_v45 = vpop.permute.xlu0 %922  ;;  %1175 = vrot.lane.b32.xlu1 %v285_v11, %s5521_s13 }
 0x381   :  { %v3212_v0 = vcombine.high %v3068_v15, %v3068_v15  ;;  %v8856_v30 = vrot.slane %v3068_v15, %v6482_v29  ;;  %v3067_v60 = vmax.f32 %v3013_v59, 0.0 }
 0x382   :  { %v2793_v50 = vcombine.low %v2785_v57, %v2792_v52  ;;  %1177 = vrot.lane.b32.xlu0 %v287_v47, %s5521_s13  ;;  %v8873_v43 = vpop.permute.xlu1 %924 }
 0x383   :  { %10733 = vst [vmem:[#allocation56_spill] sm:$0xff] %v8856_v30  ;;  %v8864_v25 = vrot.slane %v3212_v0, %v6482_v29  ;;  %v8868_v55 = vcombine.high %v8856_v30, %v8856_v30  ;;  %v3195_v12 = vcombine.high %v3067_v60, %v3067_v60  ;;  %v8871_v17 = vrot.slane %v3067_v60, %v6482_v29  ;;  %v10744_v30 = vld [vmem:[#allocation12_spill] sm:$0xff] }
 0x384   :  { %5332 = vmatprep.mubr.msk.f32.mxu1 %vm2879_vm9, %v2793_v50  ;;  %v8879_v19 = vpop.permute.xlu0 %926  ;;  %1179 = vrot.lane.b32.xlu1 %v289_v23, %s5521_s13  ;;  %v5425_v50 = vld [vmem:[%s10395_s0 + $0x12e] sm:$0x3]  ;;  %v10741_v23 = vld [vmem:[#allocation69_spill] sm:$0xff] }
 0x385   :  { %10734 = vst [vmem:[#allocation68_spill] sm:$0xff] %v8864_v25  ;;  %10735 = vst [vmem:[#allocation65_spill] sm:$0xff] %v8868_v55  ;;  %v8883_v35 = vcombine.high %v8864_v25, %v8864_v25  ;;  %v8886_v51 = vrot.slane %v3195_v12, %v6482_v29  ;;  %v8890_v46 = vcombine.high %v8871_v17, %v8871_v17 }
 0x386   :  { %10736 = vst [vmem:[#allocation70_spill] sm:$0xff] %v8871_v17  ;;  %10737 = vst [vmem:[#allocation52_spill] sm:$0xff] %v8879_v19  ;;  %1181 = vrot.lane.b32.xlu0 %v291_v24, %s5521_s13  ;;  %v3847_v11 = vrot.slane %v8868_v55, %v6482_v29  ;;  %v8902_v47 = vpop.permute.xlu1 %1159  ;;  %v2064_v12 = vsel %vm2026_vm1, %v5425_v50, %v10741_v23  ;;  %v5426_v24 = vld [vmem:[%s10395_s0 + $0x132] sm:$0x3]  ;;  %v10745_v23 = vld [vmem:[#allocation41_spill] sm:$0xff] }
 0x387   :  { %10738 = vst [vmem:[#allocation72_spill] sm:$0xff] %v8883_v35  ;;  %10739 = vst [vmem:[#allocation53_spill] sm:$0xff] %v8886_v51  ;;  %v3863_v15 = vrot.slane %v8883_v35, %v6482_v29  ;;  %v8900_v59 = vcombine.high %v8886_v51, %v8886_v51  ;;  %v3815_v52 = vrot.slane %v8890_v46, %v6482_v29  ;;  %v10742_v35 = vld [vmem:[#allocation77_spill] sm:$0xff] }
 0x388   :  { %v8904_v57 = vpop.permute.xlu0 %1161  ;;  %1745 = vrot.lane.b32.xlu1 %v8549_v27, %s5524_s19  ;;  %v2065_v25 = vsel %vm2026_vm1, %v5426_v24, %v10742_v35  ;;  %v5427_v27 = vld [vmem:[%s10395_s0 + $0x136] sm:$0x3]  ;;  %v2122_v50 = vsel %vm2084_vm2, %v2064_v12, %v10744_v30  ;;  %v10746_v35 = vld [vmem:[#allocation11_spill] sm:$0xff]  ;;  %v10749_v30 = vld [vmem:[#allocation42_spill] sm:$0xff] }
 0x389   :  { %10740 = vst [vmem:[#allocation28_spill] sm:$0xff] %v8900_v59  ;;  %v3831_v0 = vrot.slane %v8900_v59, %v6482_v29  ;;  %v5138_v60 = vcombine.low %v3847_v11, %v3863_v15  ;;  %v10743_v11 = vld [vmem:[#allocation40_spill] sm:$0xff]  ;;  %v2123_v51 = vsel %vm2084_vm2, %v2065_v25, %v10745_v23  ;;  %v10747_v59 = vld [vmem:[#allocation78_spill] sm:$0xff] }
 0x38a   :  { %1747 = vrot.lane.b32.xlu0 %v8556_v41, %s5524_s19  ;;  %v2066_v15 = vsel %vm2026_vm1, %v5427_v27, %v10743_v11  ;;  %v8933_v17 = vpop.permute.xlu1 %1163  ;;  %v5428_v41 = vld [vmem:[%s10395_s0 + $0x13a] sm:$0x3]  ;;  %v10748_v27 = vld [vmem:[#allocation14_spill] sm:$0xff]  ;;  %v2188_v12 = vsel %vm2142_vm3, %v2123_v51, %v10749_v30 }
 0x38b   :  { %v5136_v55 = vcombine.low %v3815_v52, %v3831_v0  ;;  %v2067_v24 = vsel %vm2026_vm1, %v5428_v41, %v10746_v35  ;;  %v2124_v19 = vsel %vm2084_vm2, %v2066_v15, %v10747_v59  ;;  %v2187_v11 = vsel %vm2142_vm3, %v2122_v50, %v10748_v27  ;;  %v10750_v15 = vld [vmem:[#allocation79_spill] sm:$0xff] }
 0x38c   :  { %v8946_v25 = vpop.permute.xlu0 %1165  ;;  %v2252_v52 = vsel %vm2207_vm4, %v2187_v11, %v8363_v3  ;;  %v2253_v0 = vsel %vm2207_vm4, %v2188_v12, %v8370_v38  ;;  %1749 = vrot.lane.b32.xlu1 %v8567_v9, %s5524_s19  ;;  %v4102_v59 = vrot.slane %v5138_v60, %v6482_v29  ;;  %v2125_v50 = vsel %vm2084_vm2, %v2067_v24, %v10750_v15  ;;  %v10751_v41 = vld [vmem:[#allocation43_spill] sm:$0xff]  ;;  %v10752_v38 = vld [vmem:[#allocation44_spill] sm:$0xff] }
 0x38d   :  { %v4088_v23 = vrot.slane %v5136_v55, %v6482_v29  ;;  %v2189_v51 = vsel %vm2142_vm3, %v2124_v19, %v10751_v41  ;;  %v2317_v35 = vsel %vm2272_vm5, %v2252_v52, %v8530_v14  ;;  %v2318_v3 = vsel %vm2272_vm5, %v2253_v0, %v8532_v10 }
 0x38e   :  { %1751 = vrot.lane.b32.xlu0 %v8574_v5, %s5524_s19  ;;  %v2190_v9 = vsel %vm2142_vm3, %v2125_v50, %v10752_v38  ;;  %v2382_v55 = vsel %vm2337_vm6, %v2317_v35, %v8631_v4  ;;  %v2383_v60 = vsel %vm2337_vm6, %v2318_v3, %v8636_v44  ;;  %v1923_v24 = vpop.permute.xlu1 %1922  ;;  %v2254_v14 = vsel %vm2207_vm4, %v2189_v51, %v8377_v39  ;;  %v299_v50 = vld [vmem:[%s10395_s0 + $0x1dc] sm:$0x3] }
 0x38f   :  { %v4105_v19 = vcombine.low %v4088_v23, %v4102_v59  ;;  %v2255_v10 = vsel %vm2207_vm4, %v2190_v9, %v8383_v53  ;;  %v2447_v5 = vsel %vm2402_vm7, %v2382_v55, %v8729_v13  ;;  %v2448_v27 = vsel %vm2402_vm7, %v2383_v60, %v8731_v58 }
 0x390   :  { %v1925_v11 = vpop.permute.xlu0 %1924  ;;  %v2319_v4 = vsel %vm2272_vm5, %v2254_v14, %v8538_v31  ;;  %v2512_v44 = vsel %vm2467_vm8, %v2447_v5, %v1923_v24  ;;  %1930 = vrot.lane.b32.xlu1 %v8585_v56, %s5525_s20  ;;  %v2320_v39 = vsel %vm2272_vm5, %v2255_v10, %v8540_v48  ;;  %v310_v10 = vld [vmem:[%s10395_s0 + $0x1f2] sm:$0x3] }
 0x391   :  { %v2513_v30 = vsel %vm2467_vm8, %v2448_v27, %v1925_v11  ;;  %5350 = vmatmul.mubr.msk.f32.vlgmr.msra.gmra.mxu0 %vm3612_vm10, %v4105_v19  ;;  %v2384_v53 = vsel %vm2337_vm6, %v2319_v4, %v8638_v61  ;;  %v2385_v58 = vsel %vm2337_vm6, %v2320_v39, %v8644_v36  ;;  %v293_v61 = vld [vmem:[%s10395_s0 + $0x1d0] sm:$0x3]  ;;  %v308_v19 = vld [vmem:[%s10395_s0 + $0x1ee] sm:$0x3]  ;;  %v312_v27 = vld [vmem:[%s10395_s0 + $0x1f6] sm:$0x3] }
 0x392   :  { %1932 = vrot.lane.b32.xlu0 %v8592_v63, %s5525_s20  ;;  %v2449_v13 = vsel %vm2402_vm7, %v2384_v53, %v8748_v22  ;;  %v1927_v31 = vpop.permute.xlu1 %1926  ;;  %v2450_v12 = vsel %vm2402_vm7, %v2385_v58, %v8754_v62  ;;  %v2794_v56 = vcombine.low %v2512_v44, %v2513_v30  ;;  %v295_v22 = vld [vmem:[%s10395_s0 + $0x1d4] sm:$0x3]  ;;  %v314_v4 = vld [vmem:[%s10395_s0 + $0x1fa] sm:$0x3]  ;;  %v301_v30 = vld [vmem:[%s10395_s0 + $0x1e0] sm:$0x3] }
 0x393   :  { %v2514_v52 = vsel %vm2467_vm8, %v2449_v13, %v1927_v31  ;;  %v303_v53 = vld [vmem:[%s10395_s0 + $0x1e4] sm:$0x3]  ;;  %v305_v13 = vld [vmem:[%s10395_s0 + $0x1e8] sm:$0x3] }
 0x394   :  { %v1929_v48 = vpop.permute.xlu0 %1928  ;;  %1934 = vrot.lane.b32.xlu1 %v8603_v6, %s5525_s20  ;;  %v2802_v62 = vrot.slane %v2794_v56, %v6482_v29 }
 0x395   :  { %v2515_v0 = vsel %vm2467_vm8, %v2450_v12, %v1929_v48  ;;  %v307_v12 = vld [vmem:[%s10395_s0 + $0x1ec] sm:$0x3] }
 0x396   :  { %v2795_v63 = vcombine.low %v2514_v52, %v2515_v0  ;;  %1936 = vrot.lane.b32.xlu0 %v8610_v16, %s5525_s20  ;;  %v9008_v36 = vpop.permute.xlu1 %472  ;;  %v297_v16 = vld [vmem:[%s10395_s0 + $0x1d8] sm:$0x3]  ;;  %v309_v52 = vld [vmem:[%s10395_s0 + $0x1f0] sm:$0x3]  ;;  %v311_v0 = vld [vmem:[%s10395_s0 + $0x1f4] sm:$0x3] }
 0x398   :  { %v2809_v23 = vrot.slane %v2795_v63, %v6482_v29  ;;  %v9015_v59 = vpop.permute.xlu0 %474  ;;  %1183 = vrot.lane.b32.xlu1 %v293_v61, %s5521_s13  ;;  %v313_v61 = vld [vmem:[%s10395_s0 + $0x1f8] sm:$0x3] }
 0x39a   :  { %v2810_v6 = vcombine.low %v2802_v62, %v2809_v23  ;;  %1185 = vrot.lane.b32.xlu0 %v295_v22, %s5521_s13  ;;  %v9022_v15 = vpop.permute.xlu1 %476  ;;  %v315_v62 = vld [vmem:[%s10395_s0 + $0x1fc] sm:$0x3] }
 0x39c   :  { %5333 = vmatmul.mubr.msk.f32.gmra.mxu1 %vm2879_vm9, %v2810_v6  ;;  %v9028_v41 = vpop.permute.xlu0 %478  ;;  %1187 = vrot.lane.b32.xlu1 %v297_v16, %s5521_s13 }
 0x39e   :  { %1189 = vrot.lane.b32.xlu0 %v299_v50, %s5521_s13  ;;  %v9032_v51 = vpop.permute.xlu1 %1167  ;;  %v9180_v50 = vld [vmem:[%s10397_s2] ss:$0 sm:$0xff] }
 0x3a0   :  { %v9034_v35 = vpop.permute.xlu0 %1169  ;;  %1375 = vrot.lane.b32.xlu1 %v8683_v33, %s5522_s29 }
 0x3a2   :  { %1377 = vrot.lane.b32.xlu0 %v8694_v1, %s5522_s29  ;;  %v9040_v3 = vpop.permute.xlu1 %1171 }
 0x3a4   :  { %v9042_v38 = vpop.permute.xlu0 %1173  ;;  %1379 = vrot.lane.b32.xlu1 %v8701_v32, %s5522_s29 }
 0x3a6   :  { %1381 = vrot.lane.b32.xlu0 %v8781_v49, %s5522_s29  ;;  %v9048_v9 = vpop.permute.xlu1 %1359 }
 0x3a8   :  { %v9050_v55 = vpop.permute.xlu0 %1361  ;;  %1938 = vrot.lane.b32.xlu1 %v8649_v54, %s5525_s20 }
 0x3aa   :  { %1940 = vrot.lane.b32.xlu0 %v8660_v37, %s5525_s20  ;;  %v9056_v1 = vpop.permute.xlu1 %1363  ;;  %v300_v37 = vld [vmem:[%s10395_s0 + $0x1de] sm:$0x3] }
 0x3ac   :  { %v9058_v33 = vpop.permute.xlu0 %1365  ;;  %1942 = vrot.lane.b32.xlu1 %v8665_v20, %s5525_s20 }
 0x3ae   :  { %1944 = vrot.lane.b32.xlu0 %v8676_v2, %s5525_s20  ;;  %v9064_v32 = vpop.permute.xlu1 %480  ;;  %v302_v2 = vld [vmem:[%s10395_s0 + $0x1e2] sm:$0x3] }
 0x3af   :  { %10753 = vst [vmem:[#allocation22_spill] sm:$0xff] %v9064_v32  ;;  %v10790_v32 = vld [vmem:[#allocation66_spill] sm:$0xff] }
 0x3b0   :  { %v9066_v49 = vpop.permute.xlu0 %482  ;;  %1383 = vrot.lane.b32.xlu1 %v8794_v26, %s5522_s29 }
 0x3b1   :  { %10754 = vst [vmem:[#allocation71_spill] sm:$0xff] %v9066_v49  ;;  %v3995_v49 = vld [vmem:[#allocation2 + $0x10] sm:$0xff] }
 0x3b2   :  { %1385 = vrot.lane.b32.xlu0 %v8822_v28, %s5522_s29  ;;  %v9072_v54 = vpop.permute.xlu1 %484  ;;  %v304_v28 = vld [vmem:[%s10395_s0 + $0x1e6] sm:$0x3] }
 0x3b3   :  { %10755 = vst [vmem:[#allocation32_spill] sm:$0xff] %v9072_v54 }
 0x3b4   :  { %v9077_v20 = vpop.permute.xlu0 %486  ;;  %1387 = vrot.lane.b32.xlu1 %v8831_v21, %s5522_s29  ;;  %v306_v21 = vld [vmem:[%s10395_s0 + $0x1ea] sm:$0x3] }
 0x3b5   :  { %10756 = vst [vmem:[#allocation73_spill] sm:$0xff] %v9077_v20 }
 0x3b6   :  { %1389 = vrot.lane.b32.xlu0 %v300_v37, %s5522_s29  ;;  %v9085_v26 = vpop.permute.xlu1 %699  ;;  %v10764_v37 = vld [vmem:[#allocation36_spill] sm:$0xff] }
 0x3b8   :  { %v9090_v60 = vpop.permute.xlu0 %701  ;;  %1562 = vrot.lane.b32.xlu1 %v302_v2, %s5523_s22 }
 0x3ba   :  { %1564 = vrot.lane.b32.xlu0 %v304_v28, %s5523_s22  ;;  %v9097_v24 = vpop.permute.xlu1 %703 }
 0x3bb   :  { %10757 = vst [vmem:[#allocation34_spill] sm:$0xff] %v9097_v24 }
 0x3bc   :  { %v9102_v14 = vpop.permute.xlu0 %705  ;;  %1566 = vrot.lane.b32.xlu1 %v306_v21, %s5523_s22 }
 0x3bd   :  { %10758 = vst [vmem:[#allocation54_spill] sm:$0xff] %v9102_v14  ;;  %v4019_v14 = vld [vmem:[#allocation2 + $0xd0] sm:$0xff] }
 0x3be   :  { %1568 = vrot.lane.b32.xlu0 %v308_v19, %s5523_s22  ;;  %v9109_v5 = vpop.permute.xlu1 %1367 }
 0x3c0   :  { %v9114_v11 = vpop.permute.xlu0 %1369  ;;  %1570 = vrot.lane.b32.xlu1 %v310_v10, %s5523_s22 }
 0x3c2   :  { %1572 = vrot.lane.b32.xlu0 %v312_v27, %s5523_s22  ;;  %v9121_v44 = vpop.permute.xlu1 %1371 }
 0x3c4   :  { %v9126_v39 = vpop.permute.xlu0 %1373  ;;  %1574 = vrot.lane.b32.xlu1 %v314_v4, %s5523_s22 }
 0x3c6   :  { %1753 = vrot.lane.b32.xlu0 %v301_v30, %s5524_s19  ;;  %v9133_v58 = vpop.permute.xlu1 %1548  ;;  %v2983_v30 = vadd.f32 %v9180_v50, %v10764_v37 }
 0x3c8   :  { %v9138_v31 = vpop.permute.xlu0 %1550  ;;  %1755 = vrot.lane.b32.xlu1 %v303_v53, %s5524_s19 }
 0x3ca   :  { %1757 = vrot.lane.b32.xlu0 %v305_v13, %s5524_s19  ;;  %v9145_v56 = vpop.permute.xlu1 %1552 }
 0x3cc   :  { %v9150_v48 = vpop.permute.xlu0 %707  ;;  %1759 = vrot.lane.b32.xlu1 %v307_v12, %s5524_s19  ;;  %v10766_v12 = vld [vmem:[#allocation35_spill] sm:$0xff] }
 0x3cd   :  { %10759 = vst [vmem:[#allocation55_spill] sm:$0xff] %v9150_v48  ;;  %v4007_v48 = vld [vmem:[#allocation2 + $0x70] sm:$0xff] }
 0x3ce   :  { %1761 = vrot.lane.b32.xlu0 %v309_v52, %s5524_s19  ;;  %v9157_v63 = vpop.permute.xlu1 %709  ;;  %v3061_v52 = vmax.f32 %v2983_v30, 0.0 }
 0x3cf   :  { %10760 = vst [vmem:[#allocation29_spill] sm:$0xff] %v9157_v63  ;;  %v4023_v63 = vld [vmem:[#allocation2 + $0xf0] sm:$0xff] }
 0x3d0   :  { %v9162_v22 = vpop.permute.xlu0 %711  ;;  %1763 = vrot.lane.b32.xlu1 %v311_v0, %s5524_s19  ;;  %v3093_v37 = vcombine.high %v3061_v52, %v3061_v52 }
 0x3d1   :  { %10761 = vst [vmem:[#allocation27_spill] sm:$0xff] %v9162_v22 }
 0x3d2   :  { %1765 = vrot.lane.b32.xlu0 %v313_v61, %s5524_s19  ;;  %v9169_v23 = vpop.permute.xlu1 %713  ;;  %v9211_v30 = vrot.slane %v3093_v37, %v6482_v29 }
 0x3d3   :  { %10762 = vst [vmem:[#allocation30_spill] sm:$0xff] %v9169_v23 }
 0x3d4   :  { %v9171_v6 = vpop.permute.xlu0 %928  ;;  %1767 = vrot.lane.b32.xlu1 %v315_v62, %s5524_s19  ;;  %10768 = vst [vmem:[#allocation62_spill] sm:$0xff] %v9211_v30 }
 0x3d6   :  { %1946 = vrot.lane.b32.xlu0 %v302_v2, %s5525_s20  ;;  %v9175_v16 = vpop.permute.xlu1 %930  ;;  %v2988_v2 = vadd.f32 %v9180_v50, %v10766_v12 }
 0x3d7   :  { %10763 = vst [vmem:[#allocation33_spill] sm:$0xff] %v9175_v16  ;;  %v4021_v16 = vld [vmem:[#allocation2 + $0xe0] sm:$0xff] }
 0x3d8   :  { %v9184_v53 = vpop.permute.xlu0 %932  ;;  %1948 = vrot.lane.b32.xlu1 %v304_v28, %s5525_s20  ;;  %v3062_v62 = vmax.f32 %v2988_v2, 0.0  ;;  %v316_v28 = vld [vmem:[%s10395_s0 + $0x1fe] sm:$0x3] }
 0x3d9   :  { %10765 = vst [vmem:[#allocation59_spill] sm:$0xff] %v9184_v53  ;;  %v4008_v2 = vld [vmem:[#allocation2 + $0x78] sm:$0xff]  ;;  %v9232_v53 = vcombine.high %v9211_v30, %v9211_v30  ;;  %v4005_v30 = vld [vmem:[#allocation2 + $0x60] sm:$0xff] }
 0x3da   :  { %1950 = vrot.lane.b32.xlu0 %v306_v21, %s5525_s20  ;;  %v9188_v13 = vpop.permute.xlu1 %1554  ;;  %v9206_v21 = vrot.slane %v3061_v52, %v6482_v29  ;;  %v9219_v52 = vrot.slane %v3062_v62, %v6482_v29 }
 0x3dc   :  { %v9192_v0 = vpop.permute.xlu0 %1556  ;;  %1952 = vrot.lane.b32.xlu1 %v308_v19, %s5525_s20  ;;  %10767 = vst [vmem:[#allocation60_spill] sm:$0xff] %v9206_v21  ;;  %10770 = vst [vmem:[#allocation63_spill] sm:$0xff] %v9219_v52  ;;  %v9223_v22 = vcombine.high %v9206_v21, %v9206_v21  ;;  %v4006_v21 = vld [vmem:[#allocation2 + $0x68] sm:$0xff] }
 0x3de   :  { %1954 = vrot.lane.b32.xlu0 %v310_v10, %s5525_s20  ;;  %v9196_v61 = vpop.permute.xlu1 %1558  ;;  %v3110_v10 = vcombine.high %v3062_v62, %v3062_v62  ;;  %v4022_v62 = vld [vmem:[#allocation2 + $0xe8] sm:$0xff] }
 0x3e0   :  { %v9198_v23 = vpop.permute.xlu0 %1560  ;;  %1956 = vrot.lane.b32.xlu1 %v312_v27, %s5525_s20  ;;  %v4024_v27 = vld [vmem:[#allocation2 + $0xf8] sm:$0xff] }
 0x3e1   :  { %5178 = vmatprep.subr.mxu1 %v4024_v27 }
 0x3e2   :  { %1958 = vrot.lane.b32.xlu0 %v314_v4, %s5525_s20  ;;  %v9208_v19 = vpop.permute.xlu1 %1737  ;;  %v10769_v4 = vmov 0.0   ;;  %5179 = vmatpush3.msra.mxu1 %v4008_v2 }
 0x3e3   :  { %5180 = vmatprep.subr.mxu1 %v4023_v63 }
 0x3e4   :  { %v9213_v12 = vpop.permute.xlu0 %1739  ;;  %1960 = vrot.lane.b32.xlu1 %v316_v28, %s5525_s20  ;;  %v9228_v28 = vrot.slane %v3110_v10, %v6482_v29  ;;  %5181 = vmatpush3.msra.mxu1 %v4007_v48  ;;  %v9242_v10 = vcombine.high %v9219_v52, %v9219_v52  ;;  %v4020_v48 = vld [vmem:[#allocation2 + $0xd8] sm:$0xff]  ;;  %s5528_s20 = smov 64  }
 0x3e5   :  { %5182 = vmatprep.subr.mxu1 %v4022_v62  ;;  %v4004_v62 = vld [vmem:[#allocation2 + $0x58] sm:$0xff] }
 0x3e6   :  { %3390 = vrot.lane.b32.xlu0 %v10769_v4, %s5527_s14  ;;  %v9225_v37 = vpop.permute.xlu1 %1741  ;;  %10771 = vst [vmem:[#allocation31_spill] sm:$0xff] %v9228_v28  ;;  %5183 = vmatpush3.msra.mxu1 %v4006_v21  ;;  %v3126_v63 = vcombine.high %v9228_v28, %v9228_v28  ;;  %v4003_v21 = vld [vmem:[#allocation2 + $0x50] sm:$0xff]  ;;  %v4017_v28 = vld [vmem:[#allocation2 + $0xc0] sm:$0xff] }
 0x3e7   :  { %5184 = vmatprep.subr.mxu1 %v4021_v16  ;;  %v4018_v16 = vld [vmem:[#allocation2 + $0xc8] sm:$0xff] }
 0x3e8   :  { %v9234_v27 = vpop.permute.xlu0 %1743  ;;  %3507 = vrot.lane.b32.xlu1 %v9223_v22, %s5527_s14  ;;  %5185 = vmatpush3.msra.mxu1 %v4005_v30  ;;  %v4002_v30 = vld [vmem:[#allocation2 + $0x48] sm:$0xff] }
 0x3e9   :  { %5186 = vmatprep.subr.mxu1 %v4020_v48  ;;  %v4001_v48 = vld [vmem:[#allocation2 + $0x40] sm:$0xff] }
 0x3ea   :  { %3509 = vrot.lane.b32.xlu0 %v9232_v53, %s5527_s14  ;;  %v9244_v2 = vpop.permute.xlu1 %934  ;;  %5187 = vmatpush3.msra.mxu1 %v4004_v62 }
 0x3eb   :  { %10772 = vst [vmem:[#allocation64_spill] sm:$0xff] %v9244_v2  ;;  %5188 = vmatprep.subr.mxu1 %v4019_v14  ;;  %v10779_v14 = vld [vmem:[#allocation39_spill] sm:$0xff] }
 0x3ec   :  { %v9248_v20 = vpop.permute.xlu0 %936  ;;  %3511 = vrot.lane.b32.xlu1 %v9242_v10, %s5527_s14  ;;  %5189 = vmatpush3.msra.mxu1 %v4003_v21  ;;  %v10780_v21 = vld [vmem:[#allocation80_spill] sm:$0xff] }
 0x3ed   :  { %10773 = vst [vmem:[#allocation61_spill] sm:$0xff] %v9248_v20  ;;  %v10776_v20 = vld [vmem:[#allocation16_spill] sm:$0xff]  ;;  %5190 = vmatprep.subr.mxu1 %v4018_v16 }
 0x3ee   :  { %3513 = vrot.lane.b32.xlu0 %v3126_v63, %s5527_s14  ;;  %v9253_v52 = vpop.permute.xlu1 %938  ;;  %5191 = vmatpush3.msra.mxu1 %v4002_v30  ;;  %v4015_v16 = vld [vmem:[#allocation2 + $0xb0] sm:$0xff] }
 0x3ef   :  { %10774 = vst [vmem:[#allocation13_spill] sm:$0xff] %v9253_v52  ;;  %5192 = vmatprep.subr.mxu1 %v4017_v28  ;;  %v4000_v52 = vld [vmem:[#allocation2 + $0x38] sm:$0xff]  ;;  %v3999_v30 = vld [vmem:[#allocation2 + $0x30] sm:$0xff]  ;;  %v4014_v28 = vld [vmem:[#allocation2 + $0xa8] sm:$0xff] }
 0x3f0   :  { %v9255_v2 = vpop.permute.xlu0 %940  ;;  %3429 = vrot.lane.b32.xlu1 %v10769_v4, %s5528_s20  ;;  %5193 = vmatpush3.msra.mxu1 %v4001_v48  ;;  %v2068_v48 = vsel %vm2026_vm1, 0.0, %v8506_v34  ;;  %v4012_v34 = vld [vmem:[#allocation2 + $0x98] sm:$0xff] }
 0x3f1   :  { %10775 = vst [vmem:[#allocation45_spill] sm:$0xff] %v9255_v2  ;;  %v4016_v2 = vld [vmem:[#allocation2 + $0xb8] sm:$0xff] }
 0x3f2   :  { %3431 = vrot.lane.b32.xlu0 %v10776_v20, %s5528_s20  ;;  %v9261_v63 = vpop.permute.xlu1 %1175  ;;  %5194 = vmatprep.subr.mxu1 %v4016_v2  ;;  %v3998_v2 = vld [vmem:[#allocation2 + $0x28] sm:$0xff] }
 0x3f3   :  { %10777 = vst [vmem:[#allocation23_spill] sm:$0xff] %v9261_v63  ;;  %5195 = vmatpush3.msra.mxu1 %v4000_v52 }
 0x3f4   :  { %v9263_v62 = vpop.permute.xlu0 %1177  ;;  %3433 = vrot.lane.b32.xlu1 %v10779_v14, %s5528_s20  ;;  %5196 = vmatprep.subr.mxu1 %v4015_v16  ;;  %v4013_v16 = vld [vmem:[#allocation2 + $0xa0] sm:$0xff] }
 0x3f5   :  { %10778 = vst [vmem:[#allocation37_spill] sm:$0xff] %v9263_v62  ;;  %5197 = vmatpush3.msra.mxu1 %v3999_v30  ;;  %v10784_v30 = vld [vmem:[#allocation19_spill] sm:$0xff] }
 0x3f6   :  { %3435 = vrot.lane.b32.xlu0 %v10780_v21, %s5528_s20  ;;  %v9269_v24 = vpop.permute.xlu1 %1179  ;;  %v10783_v21 = vld [vmem:[#allocation48_spill] sm:$0xff]  ;;  %5198 = vmatprep.subr.mxu1 %v4014_v28 }
 0x3f7   :  { %10781 = vst [vmem:[#allocation69_spill] sm:$0xff] %v9269_v24  ;;  %v2126_v52 = vsel %vm2084_vm2, %v2068_v48, %v10783_v21  ;;  %5199 = vmatpush3.msra.mxu1 %v3998_v2  ;;  %v5430_v21 = vld [vmem:[%s10395_s0 + $0x162] sm:$0x3]  ;;  %v4011_v2 = vld [vmem:[#allocation2 + $0x90] sm:$0xff] }
 0x3f8   :  { %v9271_v20 = vpop.permute.xlu0 %1181  ;;  %3468 = vrot.lane.b32.xlu1 %v10769_v4, %s5529_s15  ;;  %v3997_v4 = vld [vmem:[#allocation2 + $0x20] sm:$0xff]  ;;  %5200 = vmatprep.subr.mxu1 %v4013_v16  ;;  %v2069_v28 = vsel %vm2026_vm1, %v5430_v21, %v10784_v30  ;;  %v2191_v48 = vsel %vm2142_vm3, %v2126_v52, %v10685_v40  ;;  %v3008_v21 = vadd.f32 %v9180_v50, %v8772_v8  ;;  %v5432_v8 = vld [vmem:[%s10395_s0 + $0x16a] sm:$0x3] }
 0x3f9   :  { %10782 = vst [vmem:[#allocation77_spill] sm:$0xff] %v9271_v20  ;;  %5201 = vmatpush3.msra.mxu1 %v3997_v4  ;;  %v10785_v16 = vld [vmem:[#allocation58_spill] sm:$0xff] }
 0x3fa   :  { %3470 = vrot.lane.b32.xlu0 %v9223_v22, %s5529_s15  ;;  %v9281_v14 = vpop.permute.xlu1 %1745  ;;  %v3003_v22 = vadd.f32 %v9180_v50, %v8811_v42  ;;  %v2127_v24 = vsel %vm2084_vm2, %v2069_v28, %v10785_v16  ;;  %v2256_v42 = vsel %vm2207_vm4, %v2191_v48, %v8902_v47  ;;  %5202 = vmatprep.subr.mxu1 %v4012_v34  ;;  %v10786_v52 = vld [vmem:[#allocation50_spill] sm:$0xff]  ;;  %v5431_v47 = vld [vmem:[%s10395_s0 + $0x166] sm:$0x3]  ;;  %v10788_v48 = vld [vmem:[#allocation21_spill] sm:$0xff] }
 0x3fb   :  { %v2192_v30 = vsel %vm2142_vm3, %v2127_v24, %v10786_v52  ;;  %v2321_v4 = vsel %vm2272_vm5, %v2256_v42, %v9048_v9  ;;  %v10787_v28 = vld [vmem:[#allocation26_spill] sm:$0xff]  ;;  %v2071_v24 = vsel %vm2026_vm1, %v5432_v8, %v10788_v48  ;;  %v10789_v16 = vld [vmem:[#allocation81_spill] sm:$0xff]  ;;  %v3994_v42 = vld [vmem:[#allocation2 + $0x8] sm:$0xff] }
 0x3fc   :  { %v9283_v20 = vpop.permute.xlu0 %1747  ;;  %3472 = vrot.lane.b32.xlu1 %v9232_v53, %s5529_s15  ;;  %v3996_v53 = vld [vmem:[#allocation2 + $0x18] sm:$0xff]  ;;  %v2070_v34 = vsel %vm2026_vm1, %v5431_v47, %v10787_v28  ;;  %v2257_v9 = vsel %vm2207_vm4, %v2192_v30, %v8904_v57  ;;  %v3065_v52 = vmax.f32 %v3003_v22, 0.0  ;;  %v10792_v8 = vld [vmem:[#allocation15_spill] sm:$0xff] }
 0x3fd   :  { %5203 = vmatpush3.msra.mxu1 %v3996_v53  ;;  %v4010_v53 = vld [vmem:[#allocation2 + $0x88] sm:$0xff]  ;;  %v2128_v47 = vsel %vm2084_vm2, %v2070_v34, %v10790_v32  ;;  %v10791_v28 = vld [vmem:[#allocation49_spill] sm:$0xff]  ;;  %v2322_v63 = vsel %vm2272_vm5, %v2257_v9, %v9050_v55  ;;  %v4009_v57 = vld [vmem:[#allocation2 + $0x80] sm:$0xff]  ;;  %v2386_v34 = vsel %vm2337_vm6, %v2321_v4, %v10728_v7 }
 0x3fe   :  { %3474 = vrot.lane.b32.xlu0 %v9242_v10, %s5529_s15  ;;  %v9302_v54 = vpop.permute.xlu1 %1749  ;;  %5204 = vmatprep.subr.mxu1 %v4011_v2  ;;  %v2129_v62 = vsel %vm2084_vm2, %v2071_v24, %v10791_v28  ;;  %v10793_v30 = vld [vmem:[#allocation67_spill] sm:$0xff]  ;;  %v2387_v32 = vsel %vm2337_vm6, %v2322_v63, %v9133_v58 }
 0x3ff   :  { %5205 = vmatpush3.msra.mxu1 %v3995_v49  ;;  %v2193_v2 = vsel %vm2142_vm3, %v2128_v47, %v10793_v30  ;;  %v10794_v48 = vld [vmem:[#allocation51_spill] sm:$0xff]  ;;  %v2451_v47 = vsel %vm2402_vm7, %v2386_v34, %v9208_v19 }
 0x400   :  { %v9310_v10 = vpop.permute.xlu0 %1751  ;;  %3564 = vrot.lane.b32.xlu1 %v10789_v16, %s5529_s15  ;;  %v2194_v22 = vsel %vm2142_vm3, %v2129_v62, %v10794_v48  ;;  %5206 = vmatprep.subr.mxu1 %v4010_v53  ;;  %v3993_v55 = vld [vmem:[#allocation2] sm:$0xff]  ;;  %v2258_v9 = vsel %vm2207_vm4, %v2193_v2, %v8933_v17  ;;  %v2452_v62 = vsel %vm2402_vm7, %v2387_v32, %v9213_v12  ;;  %v10796_v12 = vld [vmem:[#allocation76_spill] sm:$0xff]  ;;  %v3066_v53 = vmax.f32 %v3008_v21, 0.0 }
 0x401   :  { %v2259_v49 = vsel %vm2207_vm4, %v2194_v22, %v8946_v25  ;;  %5207 = vmatpush3.msra.mxu1 %v3994_v42  ;;  %v2323_v58 = vsel %vm2272_vm5, %v2258_v9, %v9056_v1  ;;  %v10795_v17 = vld [vmem:[#allocation75_spill] sm:$0xff]  ;;  %v3161_v2 = vcombine.high %v3065_v52, %v3065_v52 }
 0x402   :  { %3566 = vrot.lane.b32.xlu0 %v10792_v8, %s5529_s15  ;;  %v1931_v24 = vpop.permute.xlu1 %1930  ;;  %5208 = vmatprep.subr.mxu1 %v4009_v57  ;;  %v2324_v25 = vsel %vm2272_vm5, %v2259_v49, %v9058_v33  ;;  %v2388_v19 = vsel %vm2337_vm6, %v2323_v58, %v9138_v31  ;;  %v3178_v32 = vcombine.high %v3066_v53, %v3066_v53 }
 0x403   :  { %v2516_v63 = vsel %vm2467_vm8, %v2451_v47, %v1931_v24  ;;  %5209 = vmatpush3.msra.mxu1 %v3993_v55  ;;  %v2389_v1 = vsel %vm2337_vm6, %v2324_v25, %v9145_v56  ;;  %v2453_v42 = vsel %vm2402_vm7, %v2388_v19, %v9225_v37  ;;  %v9375_v56 = vrot.slane %v3065_v52, %v6482_v29  ;;  %v10797_v25 = vld [vmem:[#allocation46_spill] sm:$0xff] }
 0x404   :  { %v1933_v28 = vpop.permute.xlu0 %1932  ;;  %3568 = vrot.lane.b32.xlu1 %v10795_v17, %s5529_s15  ;;  %v2454_v57 = vsel %vm2402_vm7, %v2389_v1, %v9234_v27  ;;  %v9380_v27 = vrot.slane %v3161_v2, %v6482_v29  ;;  %v9391_v52 = vrot.slane %v3066_v53, %v6482_v29  ;;  %v9400_v49 = vrot.slane %v3178_v32, %v6482_v29  ;;  %v10798_v53 = vld [vmem:[#allocation47_spill] sm:$0xff]  ;;  %v10800_v2 = vld [vmem:[#allocation57_spill] sm:$0xff]  ;;  %v10801_v32 = vld [vmem:[#allocation24_spill] sm:$0xff] }
 0x405   :  { %v2517_v4 = vsel %vm2467_vm8, %v2452_v62, %v1933_v28 }
 0x406   :  { %3570 = vrot.lane.b32.xlu0 %v10796_v12, %s5529_s15  ;;  %v1935_v30 = vpop.permute.xlu1 %1934  ;;  %v2811_v33 = vcombine.low %v2516_v63, %v2517_v4  ;;  %v3177_v47 = vcombine.high %v9380_v27, %v9380_v27  ;;  %v3193_v28 = vcombine.high %v9391_v52, %v9391_v52  ;;  %v3194_v63 = vcombine.high %v9400_v49, %v9400_v49 }
 0x407   :  { %v2518_v48 = vsel %vm2467_vm8, %v2453_v42, %v1935_v30  ;;  %v10799_v42 = vld [vmem:[#allocation18_spill] sm:$0xff] }
 0x408   :  { %v1937_v31 = vpop.permute.xlu0 %1936  ;;  %3392 = vrot.lane.b32.xlu1 %v10789_v16, %s5527_s14  ;;  %v2819_v34 = vrot.slane %v2811_v33, %v6482_v29 }
 0x409   :  { %v2519_v22 = vsel %vm2467_vm8, %v2454_v57, %v1937_v31 }
 0x40a   :  { %v2812_v21 = vcombine.low %v2518_v48, %v2519_v22  ;;  %3394 = vrot.lane.b32.xlu0 %v10792_v8, %s5527_s14  ;;  %v9377_v37 = vpop.permute.xlu1 %1183  ;;  %v9395_v8 = vcombine.high %v9375_v56, %v9375_v56 }
 0x40c   :  { %v2826_v24 = vrot.slane %v2812_v21, %v6482_v29  ;;  %v9384_v55 = vpop.permute.xlu0 %1185  ;;  %3396 = vrot.lane.b32.xlu1 %v10795_v17, %s5527_s14  ;;  %v5433_v17 = vld [vmem:[%s10395_s0 + $0x16e] sm:$0x3]  ;;  %v5435_v21 = vld [vmem:[%s10395_s0 + $0x176] sm:$0x3] }
 0x40d   :  { %v2072_v19 = vsel %vm2026_vm1, %v5433_v17, %v10797_v25  ;;  %v10804_v25 = vld [vmem:[#allocation25_spill] sm:$0xff] }
 0x40e   :  { %v2827_v16 = vcombine.low %v2819_v34, %v2826_v24  ;;  %3398 = vrot.lane.b32.xlu0 %v10796_v12, %s5527_s14  ;;  %v9397_v9 = vpop.permute.xlu1 %1187  ;;  %v5434_v12 = vld [vmem:[%s10395_s0 + $0x172] sm:$0x3]  ;;  %v2130_v30 = vsel %vm2084_vm2, %v2072_v19, %v10799_v42  ;;  %v2074_v34 = vsel %vm2026_vm1, %v5435_v21, %v10801_v32 }
 0x40f   :  { %v2073_v1 = vsel %vm2026_vm1, %v5434_v12, %v10798_v53  ;;  %v2195_v48 = vsel %vm2142_vm3, %v2130_v30, %v8846_v18  ;;  %v10802_v18 = vld [vmem:[#allocation38_spill] sm:$0xff]  ;;  %v2132_v19 = vsel %vm2084_vm2, %v2074_v34, %v10804_v25  ;;  %v10807_v34 = vld [vmem:[#allocation28_spill] sm:$0xff] }
 0x410   :  { %5335 = vmatprep.mubr.msk.f32.mxu1 %vm2879_vm9, %v2827_v16  ;;  %v9405_v62 = vpop.permute.xlu0 %1189  ;;  %3515 = vrot.lane.b32.xlu1 %v9395_v8, %s5527_s14  ;;  %v2131_v57 = vsel %vm2084_vm2, %v2073_v1, %v10800_v2  ;;  %v2260_v24 = vsel %vm2207_vm4, %v2195_v48, %v9032_v51  ;;  %v2197_v1 = vsel %vm2142_vm3, %v2132_v19, %v8873_v43 }
 0x411   :  { %v2196_v31 = vsel %vm2142_vm3, %v2131_v57, %v8853_v45  ;;  %v5436_v45 = vld [vmem:[%s10395_s0 + $0x17a] sm:$0x3]  ;;  %v2325_v12 = vsel %vm2272_vm5, %v2260_v24, %v9109_v5  ;;  %v10806_v5 = vld [vmem:[#allocation52_spill] sm:$0xff] }
 0x412   :  { %3517 = vrot.lane.b32.xlu0 %v3177_v47, %s5527_s14  ;;  %v9412_v58 = vpop.permute.xlu1 %1375  ;;  %v2261_v16 = vsel %vm2207_vm4, %v2196_v31, %v9034_v35  ;;  %v10805_v35 = vld [vmem:[#allocation20_spill] sm:$0xff]  ;;  %v2390_v42 = vsel %vm2337_vm6, %v2325_v12, %v9188_v13 }
 0x413   :  { %v2326_v51 = vsel %vm2272_vm5, %v2261_v16, %v9114_v11  ;;  %v2262_v11 = vsel %vm2207_vm4, %v2197_v1, %v9040_v3  ;;  %v2455_v48 = vsel %vm2402_vm7, %v2390_v42, %v9281_v14  ;;  %v10808_v14 = vld [vmem:[#allocation65_spill] sm:$0xff]  ;;  %v5331_v16 = vpop.f32.mrf.mxu1  ;;  %v10811_v1 = vld [vmem:[#allocation56_spill] sm:$0xff] }
 0x414   :  { %v9416_v4 = vpop.permute.xlu0 %1377  ;;  %3519 = vrot.lane.b32.xlu1 %v3193_v28, %s5527_s14  ;;  %v2391_v30 = vsel %vm2337_vm6, %v2326_v51, %v9192_v0  ;;  %v2327_v0 = vsel %vm2272_vm5, %v2262_v11, %v9121_v44  ;;  %v10809_v51 = vld [vmem:[#allocation70_spill] sm:$0xff] }
 0x415   :  { %v2456_v31 = vsel %vm2402_vm7, %v2391_v30, %v9283_v20  ;;  %v2392_v20 = vsel %vm2337_vm6, %v2327_v0, %v9196_v61 }
 0x416   :  { %3521 = vrot.lane.b32.xlu0 %v3194_v63, %s5527_s14  ;;  %v9434_v33 = vpop.permute.xlu1 %1379  ;;  %v10803_v63 = vld [vmem:[#allocation17_spill] sm:$0xff]  ;;  %v2457_v44 = vsel %vm2402_vm7, %v2392_v20, %v9302_v54  ;;  %v3022_v54 = vpop.f32.mrf.mxu1 }
 0x417   :  { %v2075_v17 = vsel %vm2026_vm1, %v5436_v45, %v10803_v63 }
 0x418   :  { %v9440_v22 = vpop.permute.xlu0 %1381  ;;  %3437 = vrot.lane.b32.xlu1 %v10802_v18, %s5528_s20  ;;  %v2133_v53 = vsel %vm2084_vm2, %v2075_v17, %v10805_v35 }
 0x419   :  { %v2198_v57 = vsel %vm2142_vm3, %v2133_v53, %v10806_v5  ;;  %v10810_v53 = vld [vmem:[#allocation53_spill] sm:$0xff]  ;;  %v10812_v5 = vld [vmem:[#allocation68_spill] sm:$0xff] }
 0x41a   :  { %3439 = vrot.lane.b32.xlu0 %v8890_v46, %s5528_s20  ;;  %v1939_v2 = vpop.permute.xlu1 %1938  ;;  %v2263_v13 = vsel %vm2207_vm4, %v2198_v57, %v9042_v38 }
 0x41b   :  { %v2520_v21 = vsel %vm2467_vm8, %v2455_v48, %v1939_v2  ;;  %v2328_v3 = vsel %vm2272_vm5, %v2263_v13, %v9126_v39 }
 0x41c   :  { %v1941_v43 = vpop.permute.xlu0 %1940  ;;  %3441 = vrot.lane.b32.xlu1 %v10807_v34, %s5528_s20  ;;  %v2393_v38 = vsel %vm2337_vm6, %v2328_v3, %v9198_v23 }
 0x41d   :  { %v2521_v32 = vsel %vm2467_vm8, %v2456_v31, %v1941_v43  ;;  %v2458_v18 = vsel %vm2402_vm7, %v2393_v38, %v9310_v10 }
 0x41e   :  { %3443 = vrot.lane.b32.xlu0 %v10808_v14, %s5528_s20  ;;  %v1943_v24 = vpop.permute.xlu1 %1942  ;;  %v2828_v45 = vcombine.low %v2520_v21, %v2521_v32 }
 0x41f   :  { %v2522_v39 = vsel %vm2467_vm8, %v2457_v44, %v1943_v24 }
 0x420   :  { %v1945_v63 = vpop.permute.xlu0 %1944  ;;  %3476 = vrot.lane.b32.xlu1 %v9395_v8, %s5529_s15  ;;  %v2836_v25 = vrot.slane %v2828_v45, %v6482_v29  ;;  %v3023_v8 = vadd.f32 %v9180_v50, %v3022_v54 }
 0x421   :  { %v2523_v61 = vsel %vm2467_vm8, %v2458_v18, %v1945_v63 }
 0x422   :  { %v2829_v17 = vcombine.low %v2522_v39, %v2523_v61  ;;  %3478 = vrot.lane.b32.xlu0 %v3177_v47, %s5529_s15  ;;  %v9507_v23 = vpop.permute.xlu1 %1383  ;;  %v3069_v42 = vmax.f32 %v3023_v8, 0.0  ;;  %v10813_v61 = vld [vmem:[#allocation72_spill] sm:$0xff]  ;;  %v5437_v8 = vld [vmem:[%s10395_s0 + $0x1a2] sm:$0x3] }
 0x424   :  { %v2843_v19 = vrot.slane %v2829_v17, %v6482_v29  ;;  %v9511_v10 = vpop.permute.xlu0 %1385  ;;  %3480 = vrot.lane.b32.xlu1 %v3193_v28, %s5529_s15  ;;  %v3028_v28 = vadd.f32 %v9180_v50, %v5331_v16  ;;  %v3229_v11 = vcombine.high %v3069_v42, %v3069_v42  ;;  %v9536_v31 = vrot.slane %v3069_v42, %v6482_v29 }
 0x426   :  { %v2844_v12 = vcombine.low %v2836_v25, %v2843_v19  ;;  %3572 = vrot.lane.b32.xlu0 %v10809_v51, %s5529_s15  ;;  %v9517_v35 = vpop.permute.xlu1 %1387  ;;  %v3070_v57 = vmax.f32 %v3028_v28, 0.0  ;;  %v9545_v0 = vrot.slane %v3229_v11, %v6482_v29  ;;  %v9554_v3 = vcombine.high %v9536_v31, %v9536_v31 }
 0x427   :  { %v2076_v25 = vsel %vm2026_vm1, 0.0, %v9008_v36 }
 0x428   :  { %5336 = vmatmul.mubr.msk.f32.gmra.mxu1 %vm2879_vm9, %v2844_v12  ;;  %v9520_v47 = vpop.permute.xlu0 %1389  ;;  %3574 = vrot.lane.b32.xlu1 %v10810_v53, %s5529_s15  ;;  %v3246_v13 = vcombine.high %v3070_v57, %v3070_v57  ;;  %v9550_v32 = vrot.slane %v3070_v57, %v6482_v29  ;;  %v9567_v44 = vcombine.high %v9545_v0, %v9545_v0 }
 0x429   :  { %v2134_v12 = vsel %vm2084_vm2, %v2076_v25, %v9085_v26  ;;  %v5438_v26 = vld [vmem:[%s10395_s0 + $0x1a6] sm:$0x3]  ;;  %v5441_v25 = vld [vmem:[%s10395_s0 + $0x1b2] sm:$0x3] }
 0x42a   :  { %3576 = vrot.lane.b32.xlu0 %v10811_v1, %s5529_s15  ;;  %v1563_v30 = vpop.permute.xlu1 %1562  ;;  %v9563_v38 = vrot.slane %v3246_v13, %v6482_v29  ;;  %v9573_v16 = vcombine.high %v9550_v32, %v9550_v32  ;;  %v2199_v28 = vsel %vm2142_vm3, %v2134_v12, %v10685_v40  ;;  %v10815_v40 = vld [vmem:[#allocation37_spill] sm:$0xff]  ;;  %v10817_v12 = vld [vmem:[#allocation71_spill] sm:$0xff] }
 0x42c   :  { %v9527_v2 = vpop.permute.xlu0 %1564  ;;  %3578 = vrot.lane.b32.xlu1 %v10812_v5, %s5529_s15  ;;  %v3262_v45 = vcombine.high %v9563_v38, %v9563_v38 }
 0x42e   :  { %3400 = vrot.lane.b32.xlu0 %v10809_v51, %s5527_s14  ;;  %v9533_v48 = vpop.permute.xlu1 %1566 }
 0x430   :  { %v9538_v43 = vpop.permute.xlu0 %1568  ;;  %3402 = vrot.lane.b32.xlu1 %v10810_v53, %s5527_s14  ;;  %v2077_v53 = vsel %vm2026_vm1, %v5437_v8, %v9015_v59  ;;  %v5439_v59 = vld [vmem:[%s10395_s0 + $0x1aa] sm:$0x3] }
 0x432   :  { %3404 = vrot.lane.b32.xlu0 %v10811_v1, %s5527_s14  ;;  %v9547_v21 = vpop.permute.xlu1 %1570  ;;  %v2135_v1 = vsel %vm2084_vm2, %v2077_v53, %v9090_v60  ;;  %v2079_v60 = vsel %vm2026_vm1, %v5439_v59, %v9028_v41  ;;  %v2081_v41 = vsel %vm2026_vm1, %v5441_v25, %v10817_v12  ;;  %v10823_v25 = vld [vmem:[#allocation59_spill] sm:$0xff] }
 0x433   :  { %v2200_v36 = vsel %vm2142_vm3, %v2135_v1, %v9171_v6  ;;  %v10814_v6 = vld [vmem:[#allocation23_spill] sm:$0xff]  ;;  %v5442_v1 = vld [vmem:[%s10395_s0 + $0x1b6] sm:$0x3] }
 0x434   :  { %v9556_v20 = vpop.permute.xlu0 %1572  ;;  %3406 = vrot.lane.b32.xlu1 %v10812_v5, %s5527_s14  ;;  %v2078_v5 = vsel %vm2026_vm1, %v5438_v26, %v9022_v15  ;;  %v2264_v57 = vsel %vm2207_vm4, %v2199_v28, %v10814_v6  ;;  %v2265_v11 = vsel %vm2207_vm4, %v2200_v36, %v10815_v40  ;;  %v10818_v36 = vld [vmem:[#allocation32_spill] sm:$0xff]  ;;  %v10819_v26 = vld [vmem:[#allocation34_spill] sm:$0xff] }
 0x435   :  { %v2329_v8 = vsel %vm2272_vm5, %v2264_v57, %v9412_v58  ;;  %v2330_v53 = vsel %vm2272_vm5, %v2265_v11, %v9416_v4  ;;  %v2082_v28 = vsel %vm2026_vm1, %v5442_v1, %v10818_v36  ;;  %v2136_v59 = vsel %vm2084_vm2, %v2078_v5, %v10819_v26  ;;  %v10820_v6 = vld [vmem:[#allocation54_spill] sm:$0xff]  ;;  %v5443_v58 = vld [vmem:[%s10395_s0 + $0x1ba] sm:$0x3] }
 0x436   :  { %3523 = vrot.lane.b32.xlu0 %v9554_v3, %s5527_s14  ;;  %v9569_v24 = vpop.permute.xlu1 %1574  ;;  %v2137_v40 = vsel %vm2084_vm2, %v2079_v60, %v10820_v6  ;;  %v10821_v4 = vld [vmem:[#allocation73_spill] sm:$0xff]  ;;  %v2394_v26 = vsel %vm2337_vm6, %v2329_v8, %v10728_v7 }
 0x437   :  { %v2083_v57 = vsel %vm2026_vm1, %v5443_v58, %v10821_v4  ;;  %v10822_v11 = vld [vmem:[#allocation33_spill] sm:$0xff]  ;;  %v2202_v12 = vsel %vm2142_vm3, %v2137_v40, %v10823_v25  ;;  %v10826_v4 = vld [vmem:[#allocation55_spill] sm:$0xff] }
 0x438   :  { %v1754_v18 = vpop.permute.xlu0 %1753  ;;  %3525 = vrot.lane.b32.xlu1 %v9567_v44, %s5527_s14  ;;  %v10824_v36 = vld [vmem:[#allocation69_spill] sm:$0xff] }
 0x43a   :  { %3527 = vrot.lane.b32.xlu0 %v9573_v16, %s5527_s14  ;;  %v1756_v39 = vpop.permute.xlu1 %1755 }
 0x43c   :  { %v1758_v63 = vpop.permute.xlu0 %1757  ;;  %3529 = vrot.lane.b32.xlu1 %v3262_v45, %s5527_s14  ;;  %v5440_v45 = vld [vmem:[%s10395_s0 + $0x1ae] sm:$0x3] }
 0x43e   :  { %3445 = vrot.lane.b32.xlu0 %v10813_v61, %s5528_s20  ;;  %v1760_v17 = vpop.permute.xlu1 %1759  ;;  %v10816_v61 = vld [vmem:[#allocation22_spill] sm:$0xff] }
 0x43f   :  { %v2080_v15 = vsel %vm2026_vm1, %v5440_v45, %v10816_v61  ;;  %v2395_v45 = vsel %vm2337_vm6, %v2330_v53, %v1563_v30  ;;  %v2201_v61 = vsel %vm2142_vm3, %v2136_v59, %v10822_v11  ;;  %v10825_v30 = vld [vmem:[#allocation77_spill] sm:$0xff] }
 0x440   :  { %v9584_v54 = vpop.permute.xlu0 %1761  ;;  %v2460_v5 = vsel %vm2402_vm7, %v2395_v45, %v1756_v39  ;;  %v2266_v60 = vsel %vm2207_vm4, %v2201_v61, %v10824_v36  ;;  %v2267_v53 = vsel %vm2207_vm4, %v2202_v12, %v10825_v30  ;;  %v2138_v59 = vsel %vm2084_vm2, %v2080_v15, %v10826_v4  ;;  %v10827_v11 = vld [vmem:[#allocation29_spill] sm:$0xff] }
 0x441   :  { %v2331_v40 = vsel %vm2272_vm5, %v2266_v60, %v9434_v33  ;;  %v2332_v39 = vsel %vm2272_vm5, %v2267_v53, %v9440_v22  ;;  %v2459_v45 = vsel %vm2402_vm7, %v2394_v26, %v1754_v18  ;;  %v2139_v61 = vsel %vm2084_vm2, %v2081_v41, %v10827_v11  ;;  %v10828_v15 = vld [vmem:[#allocation61_spill] sm:$0xff]  ;;  %v10830_v60 = vld [vmem:[#allocation30_spill] sm:$0xff]  ;;  %v10831_v53 = vld [vmem:[#allocation64_spill] sm:$0xff] }
 0x442   :  { %v9588_v19 = vpop.permute.xlu1 %1763  ;;  %v2396_v7 = vsel %vm2337_vm6, %v2331_v40, %v9527_v2  ;;  %v2397_v8 = vsel %vm2337_vm6, %v2332_v39, %v9533_v48  ;;  %v2204_v12 = vsel %vm2142_vm3, %v2139_v61, %v10828_v15  ;;  %v2141_v30 = vsel %vm2084_vm2, %v2083_v57, %v10830_v60  ;;  %v10833_v4 = vld [vmem:[#allocation45_spill] sm:$0xff] }
 0x443   :  { %v2461_v33 = vsel %vm2402_vm7, %v2396_v7, %v1758_v63  ;;  %v2462_v22 = vsel %vm2402_vm7, %v2397_v8, %v1760_v17  ;;  %v2269_v2 = vsel %vm2207_vm4, %v2204_v12, %v9384_v55  ;;  %v2203_v63 = vsel %vm2142_vm3, %v2138_v59, %v10831_v53 }
 0x444   :  { %v9592_v51 = vpop.permute.xlu0 %1765  ;;  %v2334_v17 = vsel %vm2272_vm5, %v2269_v2, %v9511_v10  ;;  %v2206_v55 = vsel %vm2142_vm3, %v2141_v30, %v10833_v4 }
 0x445   :  { %v2399_v40 = vsel %vm2337_vm6, %v2334_v17, %v9547_v21 }
 0x446   :  { %v9605_v42 = vpop.permute.xlu1 %1767  ;;  %v2464_v59 = vsel %vm2402_vm7, %v2399_v40, %v9588_v19 }
 0x448   :  { %v1947_v13 = vpop.permute.xlu0 %1946 }
 0x449   :  { %v2524_v25 = vsel %vm2467_vm8, %v2459_v45, %v1947_v13 }
 0x44a   :  { %v1949_v1 = vpop.permute.xlu1 %1948 }
 0x44b   :  { %v2525_v6 = vsel %vm2467_vm8, %v2460_v5, %v1949_v1  ;;  %v10829_v1 = vld [vmem:[#allocation27_spill] sm:$0xff] }
 0x44c   :  { %v1951_v58 = vpop.permute.xlu0 %1950  ;;  %v2845_v5 = vcombine.low %v2524_v25, %v2525_v6  ;;  %v2140_v41 = vsel %vm2084_vm2, %v2082_v28, %v10829_v1  ;;  %v10832_v6 = vld [vmem:[#allocation13_spill] sm:$0xff] }
 0x44d   :  { %v2526_v36 = vsel %vm2467_vm8, %v2461_v33, %v1951_v58  ;;  %v2205_v28 = vsel %vm2142_vm3, %v2140_v41, %v10832_v6  ;;  %v2268_v58 = vsel %vm2207_vm4, %v2203_v63, %v9377_v37  ;;  %v2271_v37 = vsel %vm2207_vm4, %v2206_v55, %v9405_v62 }
 0x44e   :  { %v1953_v18 = vpop.permute.xlu1 %1952  ;;  %v2333_v57 = vsel %vm2272_vm5, %v2268_v58, %v9507_v23  ;;  %v2853_v10 = vrot.slane %v2845_v5, %v6482_v29  ;;  %v2270_v11 = vsel %vm2207_vm4, %v2205_v28, %v9397_v9  ;;  %v2336_v7 = vsel %vm2272_vm5, %v2271_v37, %v9520_v47 }
 0x44f   :  { %v2527_v48 = vsel %vm2467_vm8, %v2462_v22, %v1953_v18  ;;  %v2398_v21 = vsel %vm2337_vm6, %v2333_v57, %v9538_v43  ;;  %v2335_v19 = vsel %vm2272_vm5, %v2270_v11, %v9517_v35  ;;  %v2401_v62 = vsel %vm2337_vm6, %v2336_v7, %v9569_v24 }
 0x450   :  { %v1955_v13 = vpop.permute.xlu0 %1954  ;;  %v2846_v26 = vcombine.low %v2526_v36, %v2527_v48  ;;  %v2463_v8 = vsel %vm2402_vm7, %v2398_v21, %v9584_v54  ;;  %v2400_v9 = vsel %vm2337_vm6, %v2335_v19, %v9556_v20  ;;  %v2466_v35 = vsel %vm2402_vm7, %v2401_v62, %v9605_v42 }
 0x451   :  { %v2528_v43 = vsel %vm2467_vm8, %v2463_v8, %v1955_v13  ;;  %v2465_v15 = vsel %vm2402_vm7, %v2400_v9, %v9592_v51 }
 0x452   :  { %v2860_v39 = vrot.slane %v2846_v26, %v6482_v29  ;;  %v1957_v45 = vpop.permute.xlu1 %1956 }
 0x453   :  { %v2529_v61 = vsel %vm2467_vm8, %v2464_v59, %v1957_v45 }
 0x454   :  { %v1959_v23 = vpop.permute.xlu0 %1958  ;;  %v2861_v25 = vcombine.low %v2853_v10, %v2860_v39  ;;  %v2862_v12 = vcombine.low %v2528_v43, %v2529_v61 }
 0x455   :  { %v2530_v54 = vsel %vm2467_vm8, %v2465_v15, %v1959_v23 }
 0x456   :  { %v1961_v47 = vpop.permute.xlu1 %1960  ;;  %5338 = vmatprep.mubr.msk.f32.mxu1 %vm2879_vm9, %v2861_v25  ;;  %v2870_v24 = vrot.slane %v2862_v12, %v6482_v29 }
 0x457   :  { %v2531_v33 = vsel %vm2467_vm8, %v2466_v35, %v1961_v47 }
 0x458   :  { %v3391_v20 = vpop.permute.xlu0 %3390  ;;  %v2863_v22 = vcombine.low %v2530_v54, %v2531_v33 }
 0x459   :  { %v3613_v25 = vsel %vm3612_vm10, 0.0, %v3391_v20 }
 0x45a   :  { %v2877_v5 = vrot.slane %v2863_v22, %v6482_v29  ;;  %v3508_v18 = vpop.permute.xlu1 %3507 }
 0x45c   :  { %v5334_v1 = vpop.f32.mrf.mxu1  ;;  %v3510_v51 = vpop.permute.xlu0 %3509  ;;  %v2878_v41 = vcombine.low %v2870_v24, %v2877_v5 }
 0x45d   :  { %v3038_v42 = vadd.f32 %v9180_v50, %v5334_v1  ;;  %v10836_v1 = vld [vmem:[#allocation63_spill] sm:$0xff] }
 0x45e   :  { %v3032_v2 = vpop.f32.mrf.mxu1  ;;  %v3512_v13 = vpop.permute.xlu1 %3511  ;;  %5339 = vmatmul.mubr.msk.f32.gmra.mxu1 %vm2879_vm9, %v2878_v41  ;;  %v10837_v41 = vld [vmem:[#allocation31_spill] sm:$0xff] }
 0x45f   :  { %v3072_v36 = vmax.f32 %v3038_v42, 0.0  ;;  %v3033_v48 = vadd.f32 %v9180_v50, %v3032_v2 }
 0x460   :  { %v3514_v60 = vpop.permute.xlu0 %3513 }
 0x461   :  { %v3280_v30 = vcombine.high %v3072_v36, %v3072_v36  ;;  %v9737_v53 = vrot.slane %v3072_v36, %v6482_v29  ;;  %v3071_v63 = vmax.f32 %v3033_v48, 0.0  ;;  %v3660_v42 = vsel %vm3612_vm10, %v10837_v41, %v3514_v60 }
 0x462   :  { %v9745_v28 = vpop.permute.xlu1 %3429 }
 0x463   :  { %v9740_v17 = vrot.slane %v3280_v30, %v6482_v29  ;;  %v3263_v26 = vcombine.high %v3071_v63, %v3071_v63  ;;  %v9743_v6 = vrot.slane %v3071_v63, %v6482_v29  ;;  %v9749_v50 = vcombine.high %v9737_v53, %v9737_v53 }
 0x464   :  { %v9751_v4 = vpop.permute.xlu0 %3431  ;;  %v3627_v15 = vsel %vm3626_vm11, %v3613_v25, %v9745_v28 }
 0x465   :  { %v9755_v55 = vcombine.high %v9740_v17, %v9740_v17  ;;  %v9758_v58 = vrot.slane %v3263_v26, %v6482_v29  ;;  %v9762_v40 = vcombine.high %v9743_v6, %v9743_v6  ;;  %v3911_v39 = vrot.slane %v9749_v50, %v6482_v29 }
 0x466   :  { %v9768_v59 = vpop.permute.xlu1 %3433 }
 0x467   :  { %v3927_v57 = vrot.slane %v9755_v55, %v6482_v29  ;;  %3447 = vrot.lane.b32.xlu1 %v9762_v40, %s5528_s20  ;;  %v9772_v10 = vcombine.high %v9758_v58, %v9758_v58  ;;  %v3879_v11 = vrot.slane %v9762_v40, %v6482_v29 }
 0x468   :  { %v9776_v45 = vpop.permute.xlu0 %3435 }
 0x469   :  { %v3895_v37 = vrot.slane %v9772_v10, %v6482_v29  ;;  %3449 = vrot.lane.b32.xlu0 %v9772_v10, %s5528_s20  ;;  %v5142_v21 = vcombine.low %v3911_v39, %v3927_v57  ;;  %v3676_v48 = vsel %vm3626_vm11, %v3660_v42, %v9776_v45 }
 0x46a   :  { %v9786_v61 = vpop.permute.xlu1 %3468 }
 0x46b   :  { %3451 = vrot.lane.b32.xlu1 %v9749_v50, %s5528_s20  ;;  %v5140_v23 = vcombine.low %v3879_v11, %v3895_v37  ;;  %v4137_v8 = vrot.slane %v5142_v21, %v6482_v29  ;;  %v3641_v12 = vsel %vm3640_vm12, %v3627_v15, %v9786_v61 }
 0x46c   :  { %v3471_v19 = vpop.permute.xlu0 %3470 }
 0x46d   :  { %3482 = vrot.lane.b32.xlu0 %v9554_v3, %s5529_s15  ;;  %v4123_v7 = vrot.slane %v5140_v23, %v6482_v29  ;;  %v10834_v3 = vld [vmem:[#allocation60_spill] sm:$0xff]  ;;  %v3642_v24 = vsel %vm3640_vm12, %v3627_v15, %v3471_v19 }
 0x46e   :  { %v3473_v9 = vpop.permute.xlu1 %3472  ;;  %v3657_v35 = vsel %vm3612_vm10, %v10834_v3, %v3508_v18 }
 0x46f   :  { %3484 = vrot.lane.b32.xlu1 %v9567_v44, %s5529_s15  ;;  %v4140_v62 = vcombine.low %v4123_v7, %v4137_v8  ;;  %v10835_v44 = vld [vmem:[#allocation62_spill] sm:$0xff]  ;;  %v3673_v54 = vsel %vm3626_vm11, %v3657_v35, %v9745_v28  ;;  %v3643_v63 = vsel %vm3640_vm12, %v3627_v15, %v3473_v9 }
 0x470   :  { %v3475_v43 = vpop.permute.xlu0 %3474  ;;  %v3658_v47 = vsel %vm3612_vm10, %v10835_v44, %v3510_v51  ;;  %v3659_v51 = vsel %vm3612_vm10, %v10836_v1, %v3512_v13 }
 0x471   :  { %5352 = vmatprep.mubr.msk.f32.mxu0 %vm3612_vm10, %v4140_v62  ;;  %3486 = vrot.lane.b32.xlu0 %v9573_v16, %s5529_s15  ;;  %v3674_v20 = vsel %vm3626_vm11, %v3658_v47, %v9751_v4  ;;  %v3675_v36 = vsel %vm3626_vm11, %v3659_v51, %v9768_v59  ;;  %v3644_v39 = vsel %vm3640_vm12, %v3627_v15, %v3475_v43 }
 0x472   :  { %v3565_v33 = vpop.permute.xlu1 %3564 }
 0x473   :  { %3580 = vrot.lane.b32.xlu1 %v9743_v6, %s5529_s15  ;;  %v3689_v16 = vsel %vm3640_vm12, %v3673_v54, %v3565_v33 }
 0x474   :  { %v3567_v22 = vpop.permute.xlu0 %3566  ;;  %v3737_v5 = vcombine.low %v3641_v12, %v3689_v16 }
 0x475   :  { %v3690_v18 = vsel %vm3640_vm12, %v3674_v20, %v3567_v22  ;;  %3582 = vrot.lane.b32.xlu0 %v9758_v58, %s5529_s15 }
 0x476   :  { %v3753_v2 = vcombine.low %v3642_v24, %v3690_v18  ;;  %v3569_v30 = vpop.permute.xlu1 %3568  ;;  %v3744_v26 = vrot.slane %v3737_v5, %v6482_v29  ;;  %v10838_v18 = vld [vmem:[#allocation16_spill] sm:$0xff] }
 0x477   :  { %3584 = vrot.lane.b32.xlu1 %v9737_v53, %s5529_s15  ;;  %v3691_v57 = vsel %vm3640_vm12, %v3675_v36, %v3569_v30 }
 0x478   :  { %v3760_v13 = vrot.slane %v3753_v2, %v6482_v29  ;;  %v3571_v60 = vpop.permute.xlu0 %3570  ;;  %v3769_v11 = vcombine.low %v3643_v63, %v3691_v57  ;;  %v10839_v2 = vld [vmem:[#allocation39_spill] sm:$0xff] }
 0x479   :  { %v3692_v37 = vsel %vm3640_vm12, %v3676_v48, %v3571_v60  ;;  %3586 = vrot.lane.b32.xlu0 %v9740_v17, %s5529_s15 }
 0x47a   :  { %v3785_v21 = vcombine.low %v3644_v39, %v3692_v37  ;;  %v3776_v23 = vrot.slane %v3769_v11, %v6482_v29  ;;  %v3393_v19 = vpop.permute.xlu1 %3392  ;;  %v5131_v7 = vcombine.low %v3744_v26, %v3760_v13 }
 0x47b   :  { %3408 = vrot.lane.b32.xlu1 %v9743_v6, %s5527_s14  ;;  %v3614_v24 = vsel %vm3612_vm10, 0.0, %v3393_v19 }
 0x47c   :  { %v3792_v8 = vrot.slane %v3785_v21, %v6482_v29  ;;  %v3395_v25 = vpop.permute.xlu0 %3394  ;;  %v4046_v15 = vrot.slane %v5131_v7, %v6482_v29  ;;  %v3628_v41 = vsel %vm3626_vm11, %v3614_v24, %v9751_v4 }
 0x47d   :  { %3410 = vrot.lane.b32.xlu0 %v9758_v58, %s5527_s14  ;;  %v3615_v1 = vsel %vm3612_vm10, %v10838_v18, %v3395_v25 }
 0x47e   :  { %v5133_v9 = vcombine.low %v3776_v23, %v3792_v8  ;;  %v3397_v62 = vpop.permute.xlu1 %3396  ;;  %v3629_v4 = vsel %vm3626_vm11, %v3615_v1, %v9768_v59  ;;  %v10840_v59 = vld [vmem:[#allocation80_spill] sm:$0xff] }
 0x47f   :  { %3412 = vrot.lane.b32.xlu1 %v9737_v53, %s5527_s14  ;;  %v3616_v36 = vsel %vm3612_vm10, %v10839_v2, %v3397_v62 }
 0x480   :  { %v3399_v43 = vpop.permute.xlu0 %3398  ;;  %v4060_v3 = vrot.slane %v5133_v9, %v6482_v29 }
 0x481   :  { %3414 = vrot.lane.b32.xlu0 %v9740_v17, %s5527_s14  ;;  %v3617_v23 = vsel %vm3612_vm10, %v10840_v59, %v3399_v43 }
 0x482   :  { %v4068_v6 = vcombine.low %v4046_v15, %v4060_v3  ;;  %v4069_v35 = vcombine.high %v4046_v15, %v4060_v3  ;;  %v3516_v12 = vpop.permute.xlu1 %3515 }
 0x483   :  { %v3661_v17 = vsel %vm3612_vm10, %v9375_v56, %v3516_v12 }
 0x484   :  { %4256 = vmatprep.mubr.f32.mxu1 %v4069_v35  ;;  %v3518_v44 = vpop.permute.xlu0 %3517  ;;  %v3677_v42 = vsel %vm3626_vm11, %v3661_v17, %v9745_v28 }
 0x485   :  { %4257 = vmatmul.mubr.f32.vlgmr.msra.gmra.mxu1 %v4068_v6  ;;  %v3662_v48 = vsel %vm3612_vm10, %v9380_v27, %v3518_v44  ;;  %v3645_v27 = vsel %vm3640_vm12, %v3628_v41, %v9786_v61 }
 0x486   :  { %v3520_v58 = vpop.permute.xlu1 %3519 }
 0x487   :  { %v3663_v56 = vsel %vm3612_vm10, %v9391_v52, %v3520_v58  ;;  %v3630_v52 = vsel %vm3626_vm11, %v3616_v36, %v9776_v45 }
 0x488   :  { %v3522_v47 = vpop.permute.xlu0 %3521 }
 0x489   :  { %v3664_v19 = vsel %vm3612_vm10, %v9400_v49, %v3522_v47 }
 0x48a   :  { %v3438_v54 = vpop.permute.xlu1 %3437 }
 0x48b   :  { %v3631_v8 = vsel %vm3626_vm11, %v3617_v23, %v3438_v54 }
 0x48c   :  { %v9847_v33 = vpop.permute.xlu0 %3439 }
 0x48d   :  { %v3678_v63 = vsel %vm3626_vm11, %v3662_v48, %v9847_v33 }
 0x48e   :  { %v9849_v53 = vpop.permute.xlu1 %3441 }
 0x48f   :  { %v3679_v13 = vsel %vm3626_vm11, %v3663_v56, %v9849_v53 }
 0x490   :  { %v9851_v20 = vpop.permute.xlu0 %3443 }
 0x491   :  { %v3680_v25 = vsel %vm3626_vm11, %v3664_v19, %v9851_v20 }
 0x492   :  { %v3477_v16 = vpop.permute.xlu1 %3476 }
 0x493   :  { %v3646_v57 = vsel %vm3640_vm12, %v3629_v4, %v3477_v16 }
 0x494   :  { %v3479_v22 = vpop.permute.xlu0 %3478 }
 0x495   :  { %v3647_v7 = vsel %vm3640_vm12, %v3630_v52, %v3479_v22 }
 0x496   :  { %v3481_v5 = vpop.permute.xlu1 %3480 }
 0x497   :  { %v3648_v15 = vsel %vm3640_vm12, %v3631_v8, %v3481_v5 }
 0x498   :  { %v3573_v51 = vpop.permute.xlu0 %3572 }
 0x499   :  { %v3693_v30 = vsel %vm3640_vm12, %v3677_v42, %v3573_v51 }
 0x49a   :  { %v3575_v26 = vpop.permute.xlu1 %3574  ;;  %v3801_v11 = vcombine.low %v3645_v27, %v3693_v30 }
 0x49b   :  { %v3694_v60 = vsel %vm3640_vm12, %v3678_v63, %v3575_v26 }
 0x49c   :  { %v3577_v39 = vpop.permute.xlu0 %3576  ;;  %v3817_v37 = vcombine.low %v3646_v57, %v3694_v60  ;;  %v3808_v43 = vrot.slane %v3801_v11, %v6482_v29 }
 0x49d   :  { %v3695_v21 = vsel %vm3640_vm12, %v3679_v13, %v3577_v39 }
 0x49e   :  { %v3824_v9 = vrot.slane %v3817_v37, %v6482_v29  ;;  %v3833_v45 = vcombine.low %v3647_v7, %v3695_v21  ;;  %v3579_v62 = vpop.permute.xlu1 %3578 }
 0x49f   :  { %v3696_v3 = vsel %vm3640_vm12, %v3680_v25, %v3579_v62  ;;  %v5444_v25 = vld [vmem:[%s10397_s2] ss:$0 sm:$0xff] }
 0x4a0   :  { %v3849_v6 = vcombine.low %v3648_v15, %v3696_v3  ;;  %v5135_v35 = vcombine.low %v3808_v43, %v3824_v9  ;;  %v3840_v49 = vrot.slane %v3833_v45, %v6482_v29  ;;  %v3401_v22 = vpop.permute.xlu0 %3400 }
 0x4a1   :  { %v3618_v56 = vsel %vm3612_vm10, 0.0, %v3401_v22 }
 0x4a2   :  { %v3856_v12 = vrot.slane %v3849_v6, %v6482_v29  ;;  %v4081_v58 = vrot.slane %v5135_v35, %v6482_v29  ;;  %v3403_v24 = vpop.permute.xlu1 %3402  ;;  %v3632_v26 = vsel %vm3626_vm11, %v3618_v56, %v9847_v33 }
 0x4a3   :  { %v3619_v57 = vsel %vm3612_vm10, %v8890_v46, %v3403_v24 }
 0x4a4   :  { %v5137_v44 = vcombine.low %v3840_v49, %v3856_v12  ;;  %v3405_v17 = vpop.permute.xlu0 %3404  ;;  %v3633_v46 = vsel %vm3626_vm11, %v3619_v57, %v9849_v53 }
 0x4a5   :  { %v3620_v27 = vsel %vm3612_vm10, %v10807_v34, %v3405_v17 }
 0x4a6   :  { %v4095_v47 = vrot.slane %v5137_v44, %v6482_v29  ;;  %v3407_v5 = vpop.permute.xlu1 %3406 }
 0x4a7   :  { %v3621_v45 = vsel %vm3612_vm10, %v10808_v14, %v3407_v5 }
 0x4a8   :  { %v4104_v54 = vcombine.high %v4081_v58, %v4095_v47  ;;  %v4103_v16 = vcombine.low %v4081_v58, %v4095_v47  ;;  %v3524_v18 = vpop.permute.xlu0 %3523 }
 0x4a9   :  { %v3665_v4 = vsel %vm3612_vm10, %v9536_v31, %v3524_v18  ;;  %v3649_v31 = vsel %vm3640_vm12, %v3632_v26, %v9786_v61 }
 0x4aa   :  { %4261 = vmatprep.mubr.f32.mxu1 %v4104_v54  ;;  %v3526_v1 = vpop.permute.xlu1 %3525  ;;  %v3681_v39 = vsel %vm3626_vm11, %v3665_v4, %v9745_v28 }
 0x4ab   :  { %4262 = vmatmul.mubr.f32.gmra.mxu1 %v4103_v16  ;;  %v3666_v52 = vsel %vm3612_vm10, %v9545_v0, %v3526_v1  ;;  %v3634_v0 = vsel %vm3626_vm11, %v3620_v27, %v9851_v20 }
 0x4ac   :  { %v3528_v51 = vpop.permute.xlu0 %3527 }
 0x4ad   :  { %v3667_v21 = vsel %vm3612_vm10, %v9550_v32, %v3528_v51 }
 0x4ae   :  { %v3530_v41 = vpop.permute.xlu1 %3529 }
 0x4af   :  { %v3668_v7 = vsel %vm3612_vm10, %v9563_v38, %v3530_v41 }
 0x4b0   :  { %v3446_v42 = vpop.permute.xlu0 %3445 }
 0x4b1   :  { %v3635_v12 = vsel %vm3626_vm11, %v3621_v45, %v3446_v42 }
 0x4d9   :  { %v9898_v2 = vpop.permute.xlu1 %3447 }
 0x4da   :  { %v3682_v33 = vsel %vm3626_vm11, %v3666_v52, %v9898_v2 }
 0x4db   :  { %v9900_v36 = vpop.permute.xlu0 %3449 }
 0x4dc   :  { %v3683_v8 = vsel %vm3626_vm11, %v3667_v21, %v9900_v36 }
 0x4dd   :  { %v9902_v48 = vpop.permute.xlu1 %3451 }
 0x4de   :  { %v3684_v20 = vsel %vm3626_vm11, %v3668_v7, %v9902_v48 }
 0x4df   :  { %v3483_v30 = vpop.permute.xlu0 %3482 }
 0x4e0   :  { %v3650_v59 = vsel %vm3640_vm12, %v3633_v46, %v3483_v30 }
 0x4e1   :  { %v3485_v63 = vpop.permute.xlu1 %3484 }
 0x4e2   :  { %v3651_v62 = vsel %vm3640_vm12, %v3634_v0, %v3485_v63 }
 0x4e3   :  { %v3487_v13 = vpop.permute.xlu0 %3486 }
 0x4e4   :  { %v3652_v58 = vsel %vm3640_vm12, %v3635_v12, %v3487_v13 }
 0x4e5   :  { %v3581_v60 = vpop.permute.xlu1 %3580 }
 0x4e6   :  { %v3697_v11 = vsel %vm3640_vm12, %v3681_v39, %v3581_v60 }
 0x4e7   :  { %v3865_v37 = vcombine.low %v3649_v31, %v3697_v11  ;;  %v3583_v34 = vpop.permute.xlu0 %3582 }
 0x4e8   :  { %v3698_v23 = vsel %vm3640_vm12, %v3682_v33, %v3583_v34  ;;  %v5337_v19 = vpop.f32.mrf.mxu1 }
 0x4e9   :  { %v3881_v53 = vcombine.low %v3650_v59, %v3698_v23  ;;  %v3048_v32 = vadd.f32 %v5444_v25, %v5337_v19  ;;  %v3585_v9 = vpop.permute.xlu1 %3584  ;;  %v3872_v3 = vrot.slane %v3865_v37, %v6482_v29 }
 0x4ea   :  { %v3699_v38 = vsel %vm3640_vm12, %v3683_v8, %v3585_v9  ;;  %v3042_v15 = vpop.f32.mrf.mxu1 }
 0x4eb   :  { %v3888_v43 = vrot.slane %v3881_v53, %v6482_v29  ;;  %v3074_v6 = vmax.f32 %v3048_v32, 0.0  ;;  %v3043_v35 = vadd.f32 %v5444_v25, %v3042_v15  ;;  %v3587_v49 = vpop.permute.xlu0 %3586  ;;  %v3897_v44 = vcombine.low %v3651_v62, %v3699_v38 }
 0x4ec   :  { %v3700_v14 = vsel %vm3640_vm12, %v3684_v20, %v3587_v49 }
 0x4ed   :  { %v5139_v47 = vcombine.low %v3872_v3, %v3888_v43  ;;  %v3073_v54 = vmax.f32 %v3043_v35, 0.0  ;;  %v3913_v16 = vcombine.low %v3652_v58, %v3700_v14  ;;  %v3314_v22 = vcombine.high %v3074_v6, %v3074_v6  ;;  %v5351_v35 = vpop.f32.mrf.mxu0 }
 0x4ee   :  { %v3904_v24 = vrot.slane %v3897_v44, %v6482_v29  ;;  %v9954_v1 = vrot.slane %v3074_v6, %v6482_v29  ;;  %v10002_v6 = vld [vmem:[%s10399_s4] ss:$0 sm:$0xff] }
 0x4ef   :  { %v3297_v17 = vcombine.high %v3073_v54, %v3073_v54  ;;  %v9950_v5 = vrot.slane %v3073_v54, %v6482_v29  ;;  %v3920_v18 = vrot.slane %v3913_v16, %v6482_v29  ;;  %v9962_v30 = vrot.slane %v3314_v22, %v6482_v29  ;;  %v4343_v44 = vpop.f32.mrf.mxu0 }
 0x4f0   :  { %v4116_v63 = vrot.slane %v5139_v47, %v6482_v29  ;;  %v3329_v26 = vcombine.high %v9954_v1, %v9954_v1 }
 0x4f1   :  { %v9957_v51 = vrot.slane %v3297_v17, %v6482_v29  ;;  %v3312_v41 = vcombine.high %v9950_v5, %v9950_v5  ;;  %v5141_v42 = vcombine.low %v3904_v24, %v3920_v18  ;;  %v3330_v27 = vcombine.high %v9962_v30, %v9962_v30 }
 0x4f3   :  { %v3313_v56 = vcombine.high %v9957_v51, %v9957_v51  ;;  %3531 = vrot.lane.b32.xlu1 %v3312_v41, %s5527_s14  ;;  %v4130_v4 = vrot.slane %v5141_v42, %v6482_v29 }
 0x4f5   :  { %3533 = vrot.lane.b32.xlu0 %v3313_v56, %s5527_s14  ;;  %v4139_v13 = vcombine.high %v4116_v63, %v4130_v4  ;;  %v4138_v57 = vcombine.low %v4116_v63, %v4130_v4 }
 0x4f7   :  { %3535 = vrot.lane.b32.xlu1 %v3329_v26, %s5527_s14  ;;  %4266 = vmatprep.mubr.f32.mxu1 %v4139_v13 }
 0x4f8   :  { %4267 = vmatmul.mubr.f32.gmra.mxu1 %v4138_v57 }
 0x4f9   :  { %3537 = vrot.lane.b32.xlu0 %v3330_v27, %s5527_s14 }
 0x4fb   :  { %3453 = vrot.lane.b32.xlu1 %v9755_v55, %s5528_s20 }
 0x51e   :  { %v5340_v60 = vpop.f32.mrf.mxu1 }
 0x51f   :  { %v3058_v39 = vadd.f32 %v5444_v25, %v5340_v60 }
 0x520   :  { %v3052_v52 = vpop.f32.mrf.mxu1 }
 0x521   :  { %v3076_v31 = vmax.f32 %v3058_v39, 0.0  ;;  %v3053_v11 = vadd.f32 %v5444_v25, %v3052_v52  ;;  %v4620_v52 = vld [vmem:[%s10400_s5 + $0xf8] sm:$0xff] }
 0x522   :  { %5230 = vmatprep.subr.mxu1 %v4620_v52 }
 0x523   :  { %v3348_v33 = vcombine.high %v3076_v31, %v3076_v31  ;;  %v3355_v46 = vrot.slane %v3076_v31, %v6482_v29  ;;  %v3075_v37 = vmax.f32 %v3053_v11, 0.0  ;;  %v4604_v31 = vld [vmem:[%s10400_s5 + $0x78] sm:$0xff]  ;;  %v4619_v11 = vld [vmem:[%s10400_s5 + $0xf0] sm:$0xff] }
 0x524   :  { %5231 = vmatpush3.msra.mxu1 %v4604_v31 }
 0x525   :  { %v3362_v34 = vrot.slane %v3348_v33, %v6482_v29  ;;  %v3363_v21 = vcombine.high %v3355_v46, %v3355_v46  ;;  %v3331_v59 = vcombine.high %v3075_v37, %v3075_v37  ;;  %v3338_v0 = vrot.slane %v3075_v37, %v6482_v29  ;;  %v3409_v33 = vpop.permute.xlu1 %3408  ;;  %v4618_v37 = vld [vmem:[%s10400_s5 + $0xe8] sm:$0xff]  ;;  %5232 = vmatprep.subr.mxu1 %v4619_v11 }
 0x527   :  { %v3364_v23 = vcombine.high %v3362_v34, %v3362_v34  ;;  %v3345_v19 = vrot.slane %v3331_v59, %v6482_v29  ;;  %v3346_v7 = vcombine.high %v3338_v0, %v3338_v0  ;;  %v3975_v55 = vrot.slane %v3363_v21, %v6482_v29  ;;  %v3411_v59 = vpop.permute.xlu0 %3410 }
 0x529   :  { %v3991_v8 = vrot.slane %v3364_v23, %v6482_v29  ;;  %v3347_v53 = vcombine.high %v3345_v19, %v3345_v19  ;;  %3555 = vrot.lane.b32.xlu0 %v3346_v7, %s5528_s20  ;;  %v3943_v32 = vrot.slane %v3346_v7, %v6482_v29  ;;  %v4616_v23 = vld [vmem:[%s10400_s5 + $0xd8] sm:$0xff] }
 0x52a   :  { %v4600_v7 = vld [vmem:[%s10400_s5 + $0x58] sm:$0xff] }
 0x52b   :  { %v5146_v25 = vcombine.low %v3975_v55, %v3991_v8  ;;  %v3959_v9 = vrot.slane %v3347_v53, %v6482_v29  ;;  %3557 = vrot.lane.b32.xlu1 %v3347_v53, %s5528_s20  ;;  %v4615_v55 = vld [vmem:[%s10400_s5 + $0xd0] sm:$0xff]  ;;  %v4614_v53 = vld [vmem:[%s10400_s5 + $0xc8] sm:$0xff] }
 0x52c   :  { %v4599_v8 = vld [vmem:[%s10400_s5 + $0x50] sm:$0xff] }
 0x52d   :  { %v5144_v45 = vcombine.low %v3943_v32, %v3959_v9  ;;  %3559 = vrot.lane.b32.xlu0 %v3363_v21, %s5528_s20  ;;  %v4172_v62 = vrot.slane %v5146_v25, %v6482_v29  ;;  %v4617_v21 = vld [vmem:[%s10400_s5 + $0xe0] sm:$0xff]  ;;  %v3415_v25 = vpop.permute.xlu0 %3414  ;;  %v4598_v9 = vld [vmem:[%s10400_s5 + $0x48] sm:$0xff] }
 0x52f   :  { %3488 = vrot.lane.b32.xlu1 %v3312_v41, %s5529_s15  ;;  %v4158_v20 = vrot.slane %v5144_v45, %v6482_v29  ;;  %v4613_v45 = vld [vmem:[%s10400_s5 + $0xc0] sm:$0xff] }
 0x531   :  { %3490 = vrot.lane.b32.xlu0 %v3313_v56, %s5529_s15  ;;  %v4175_v38 = vcombine.low %v4158_v20, %v4172_v62  ;;  %v4597_v20 = vld [vmem:[%s10400_s5 + $0x40] sm:$0xff]  ;;  %v4612_v62 = vld [vmem:[%s10400_s5 + $0xb8] sm:$0xff] }
 0x533   :  { %3492 = vrot.lane.b32.xlu1 %v3329_v26, %s5529_s15  ;;  %5353 = vmatmul.mubr.msk.f32.gmra.mxu0 %vm3612_vm10, %v4175_v38 }
 0x535   :  { %3588 = vrot.lane.b32.xlu0 %v3338_v0, %s5529_s15  ;;  %v4601_v0 = vld [vmem:[%s10400_s5 + $0x60] sm:$0xff] }
 0x537   :  { %3590 = vrot.lane.b32.xlu1 %v3345_v19, %s5529_s15  ;;  %v3413_v19 = vpop.permute.xlu1 %3412 }
 0x539   :  { %3592 = vrot.lane.b32.xlu0 %v3355_v46, %s5529_s15  ;;  %v4603_v46 = vld [vmem:[%s10400_s5 + $0x70] sm:$0xff] }
 0x53a   :  { %5233 = vmatpush3.msra.mxu1 %v4603_v46 }
 0x53b   :  { %3594 = vrot.lane.b32.xlu1 %v3362_v34, %s5529_s15  ;;  %v4602_v34 = vld [vmem:[%s10400_s5 + $0x68] sm:$0xff]  ;;  %5234 = vmatprep.subr.mxu1 %v4618_v37 }
 0x53c   :  { %5235 = vmatpush3.msra.mxu1 %v4602_v34 }
 0x53d   :  { %5236 = vmatprep.subr.mxu1 %v4617_v21 }
 0x53e   :  { %5237 = vmatpush3.msra.mxu1 %v4601_v0 }
 0x53f   :  { %5238 = vmatprep.subr.mxu1 %v4616_v23 }
 0x540   :  { %5239 = vmatpush3.msra.mxu1 %v4600_v7 }
 0x541   :  { %5240 = vmatprep.subr.mxu1 %v4615_v55 }
 0x542   :  { %5241 = vmatpush3.msra.mxu1 %v4599_v8 }
 0x543   :  { %5242 = vmatprep.subr.mxu1 %v4614_v53 }
 0x544   :  { %5243 = vmatpush3.msra.mxu1 %v4598_v9 }
 0x545   :  { %v5210_v15 = vpop.f32.mrf.mxu1  ;;  %5244 = vmatprep.subr.mxu1 %v4613_v45 }
 0x546   :  { %5245 = vmatpush3.msra.mxu1 %v4597_v20 }
 0x547   :  { %v5211_v3 = vpop.f32.mrf.mxu1  ;;  %5246 = vmatprep.subr.mxu1 %v4612_v62 }
 0x548   :  { %v5212_v43 = vadd.f32 %v5211_v3, %v5210_v15  ;;  %v4596_v15 = vld [vmem:[%s10400_s5 + $0x38] sm:$0xff]  ;;  %v4611_v3 = vld [vmem:[%s10400_s5 + $0xb0] sm:$0xff] }
 0x549   :  { %5247 = vmatpush3.msra.mxu1 %v4596_v15 }
 0x54a   :  { %v4259_v49 = vadd.f32 %v5212_v43, %v10002_v6  ;;  %5248 = vmatprep.subr.mxu1 %v4611_v3 }
 0x54c   :  { %v4344_v58 = vadd.f32 %v4343_v44, %v4259_v49 }
 0x54e   :  { %v4362_v16 = vmax.f32 %v4344_v58, 0.0 }
 0x550   :  { %v4370_v17 = vcombine.high %v4362_v16, %v4362_v16  ;;  %v10007_v18 = vrot.slane %v4362_v16, %v6482_v29 }
 0x552   :  { %v10015_v4 = vrot.slane %v4370_v17, %v6482_v29  ;;  %v4385_v26 = vcombine.high %v10007_v18, %v10007_v18 }
 0x554   :  { %v4386_v60 = vcombine.high %v10015_v4, %v10015_v4 }
 0x565   :  { %v3532_v32 = vpop.permute.xlu1 %3531 }
 0x567   :  { %v3534_v38 = vpop.permute.xlu0 %3533 }
 0x569   :  { %v3536_v43 = vpop.permute.xlu1 %3535 }
 0x56a   :  { %v3671_v31 = vsel %vm3612_vm10, %v9954_v1, %v3536_v43 }
 0x56b   :  { %v5213_v12 = vpop.f32.mrf.mxu1  ;;  %v3538_v49 = vpop.permute.xlu0 %3537 }
 0x56d   :  { %v5214_v14 = vpop.f32.mrf.mxu1 }
 0x56e   :  { %v5215_v47 = vadd.f32 %v5214_v14, %v5213_v12  ;;  %v3454_v12 = vpop.permute.xlu1 %3453 }
 0x570   :  { %v4264_v54 = vadd.f32 %v5215_v47, %v10002_v6 }
 0x572   :  { %v4349_v22 = vadd.f32 %v5351_v35, %v4264_v54  ;;  %v4595_v35 = vld [vmem:[%s10400_s5 + $0x30] sm:$0xff]  ;;  %v3622_v54 = vsel %vm3612_vm10, 0.0, %v3409_v33 }
 0x573   :  { %5249 = vmatpush3.msra.mxu1 %v4595_v35 }
 0x574   :  { %v4363_v24 = vmax.f32 %v4349_v22, 0.0  ;;  %v3669_v22 = vsel %vm3612_vm10, %v9950_v5, %v3532_v32 }
 0x576   :  { %v4387_v41 = vcombine.high %v4363_v24, %v4363_v24  ;;  %v4394_v42 = vrot.slane %v4363_v24, %v6482_v29  ;;  %v3636_v24 = vsel %vm3626_vm11, %v3622_v54, %v9898_v2 }
 0x577   :  { %v3653_v5 = vsel %vm3640_vm12, %v3636_v24, %v9786_v61  ;;  %v4608_v24 = vld [vmem:[%s10400_s5 + $0x98] sm:$0xff] }
 0x578   :  { %4445 = vrot.lane.b32.xlu0 %v4394_v42, %s5528_s20  ;;  %v4401_v56 = vrot.slane %v4387_v41, %v6482_v29  ;;  %v10012_v63 = vcombine.high %v4394_v42, %v4394_v42  ;;  %v3623_v41 = vsel %vm3612_vm10, %v9762_v40, %v3411_v59  ;;  %v3685_v42 = vsel %vm3626_vm11, %v3669_v22, %v9745_v28 }
 0x579   :  { %v3637_v40 = vsel %vm3626_vm11, %v3623_v41, %v9900_v36  ;;  %v3672_v36 = vsel %vm3612_vm10, %v9962_v30, %v3538_v49  ;;  %v4607_v41 = vld [vmem:[%s10400_s5 + $0x90] sm:$0xff] }
 0x57a   :  { %4447 = vrot.lane.b32.xlu1 %v4401_v56, %s5528_s20  ;;  %v10020_v13 = vcombine.high %v4401_v56, %v4401_v56  ;;  %v4516_v57 = vrot.slane %v10012_v63, %v6482_v29 }
 0x57c   :  { %4451 = vrot.lane.b32.xlu0 %v4385_v26, %s5528_s20  ;;  %v4540_v27 = vrot.slane %v10020_v13, %v6482_v29  ;;  %v3624_v26 = vsel %vm3612_vm10, %v9772_v10, %v3413_v19 }
 0x57d   :  { %v3638_v33 = vsel %vm3626_vm11, %v3624_v26, %v9902_v48  ;;  %v4606_v26 = vld [vmem:[%s10400_s5 + $0x88] sm:$0xff] }
 0x57e   :  { %v10029_v39 = vcombine.low %v4516_v57, %v4540_v27  ;;  %v3670_v57 = vsel %vm3612_vm10, %v9957_v51, %v3534_v38  ;;  %v3625_v51 = vsel %vm3612_vm10, %v9749_v50, %v3415_v25 }
 0x57f   :  { %v3639_v34 = vsel %vm3626_vm11, %v3625_v51, %v3454_v12  ;;  %v4636_v51 = vld [vmem:[%s10400_s5 + $0x178] sm:$0xff] }
 0x580   :  { %4457 = vrot.lane.b32.xlu0 %v4386_v60, %s5528_s20 }
 0x59b   :  { %v3556_v44 = vpop.permute.xlu0 %3555 }
 0x59c   :  { %v3686_v2 = vsel %vm3626_vm11, %v3670_v57, %v3556_v44  ;;  %v4610_v44 = vld [vmem:[%s10400_s5 + $0xa8] sm:$0xff] }
 0x59d   :  { %v3558_v14 = vpop.permute.xlu1 %3557  ;;  %5250 = vmatprep.subr.mxu1 %v4610_v44 }
 0x59e   :  { %v3687_v61 = vsel %vm3626_vm11, %v3671_v31, %v3558_v14  ;;  %v10841_v31 = vmov 0.0  }
 0x59f   :  { %v3560_v58 = vpop.permute.xlu0 %3559 }
 0x5a0   :  { %v3688_v59 = vsel %vm3626_vm11, %v3672_v36, %v3560_v58  ;;  %v4594_v58 = vld [vmem:[%s10400_s5 + $0x28] sm:$0xff]  ;;  %v4649_v36 = vld [vmem:[%s10400_s5 + $0x1e0] sm:$0xff] }
 0x5a1   :  { %v3489_v47 = vpop.permute.xlu1 %3488  ;;  %5251 = vmatpush3.msra.mxu1 %v4594_v58 }
 0x5a2   :  { %v3654_v10 = vsel %vm3640_vm12, %v3637_v40, %v3489_v47 }
 0x5a3   :  { %v3491_v16 = vpop.permute.xlu0 %3490 }
 0x5a4   :  { %v3655_v1 = vsel %vm3640_vm12, %v3638_v33, %v3491_v16  ;;  %v4593_v16 = vld [vmem:[%s10400_s5 + $0x20] sm:$0xff]  ;;  %v4635_v33 = vld [vmem:[%s10400_s5 + $0x170] sm:$0xff] }
 0x5a5   :  { %v3493_v17 = vpop.permute.xlu1 %3492 }
 0x5a6   :  { %v3656_v48 = vsel %vm3640_vm12, %v3639_v34, %v3493_v17  ;;  %v4592_v17 = vld [vmem:[%s10400_s5 + $0x18] sm:$0xff]  ;;  %v4633_v34 = vld [vmem:[%s10400_s5 + $0x160] sm:$0xff] }
 0x5a7   :  { %v3589_v56 = vpop.permute.xlu0 %3588 }
 0x5a8   :  { %v3701_v27 = vsel %vm3640_vm12, %v3685_v42, %v3589_v56  ;;  %v4591_v42 = vld [vmem:[%s10400_s5 + $0x10] sm:$0xff] }
 0x5a9   :  { %v3929_v60 = vcombine.low %v3653_v5, %v3701_v27  ;;  %v3591_v52 = vpop.permute.xlu1 %3590  ;;  %v4590_v27 = vld [vmem:[%s10400_s5 + $0x8] sm:$0xff] }
 0x5aa   :  { %v3702_v11 = vsel %vm3640_vm12, %v3686_v2, %v3591_v52  ;;  %v4605_v2 = vld [vmem:[%s10400_s5 + $0x80] sm:$0xff] }
 0x5ab   :  { %v3945_v46 = vcombine.low %v3654_v10, %v3702_v11  ;;  %v3593_v37 = vpop.permute.xlu0 %3592  ;;  %v3936_v50 = vrot.slane %v3929_v60, %v6482_v29  ;;  %v4589_v52 = vld [vmem:[%s10400_s5] sm:$0xff]  ;;  %v4652_v11 = vld [vmem:[%s10400_s5 + $0x1f8] sm:$0xff] }
 0x5ac   :  { %v3703_v21 = vsel %vm3640_vm12, %v3687_v61, %v3593_v37  ;;  %v4651_v61 = vld [vmem:[%s10400_s5 + $0x1f0] sm:$0xff]  ;;  %5265 = vmatprep.subr.mxu0 %v4652_v11  ;;  %v4634_v37 = vld [vmem:[%s10400_s5 + $0x168] sm:$0xff]  ;;  %v4640_v11 = vld [vmem:[%s10400_s5 + $0x198] sm:$0xff] }
 0x5ad   :  { %v3952_v0 = vrot.slane %v3945_v46, %v6482_v29  ;;  %v3961_v23 = vcombine.low %v3655_v1, %v3703_v21  ;;  %v3595_v19 = vpop.permute.xlu1 %3594  ;;  %5266 = vmatpush3.msra.mxu0 %v4636_v51  ;;  %v4650_v46 = vld [vmem:[%s10400_s5 + $0x1e8] sm:$0xff]  ;;  %v4648_v1 = vld [vmem:[%s10400_s5 + $0x1d8] sm:$0xff] }
 0x5ae   :  { %v3704_v7 = vsel %vm3640_vm12, %v3688_v59, %v3595_v19  ;;  %5267 = vmatprep.subr.mxu0 %v4651_v61  ;;  %v4632_v21 = vld [vmem:[%s10400_s5 + $0x158] sm:$0xff]  ;;  %v4647_v59 = vld [vmem:[%s10400_s5 + $0x1d0] sm:$0xff]  ;;  %v4645_v19 = vld [vmem:[%s10400_s5 + $0x1c0] sm:$0xff] }
 0x5af   :  { %v5143_v55 = vcombine.low %v3936_v50, %v3952_v0  ;;  %v3977_v30 = vcombine.low %v3656_v48, %v3704_v7  ;;  %v3968_v8 = vrot.slane %v3961_v23, %v6482_v29  ;;  %5268 = vmatpush3.msra.mxu0 %v4635_v33  ;;  %v4631_v50 = vld [vmem:[%s10400_s5 + $0x150] sm:$0xff]  ;;  %v4646_v0 = vld [vmem:[%s10400_s5 + $0x1c8] sm:$0xff]  ;;  %v4629_v48 = vld [vmem:[%s10400_s5 + $0x140] sm:$0xff] }
 0x5b0   :  { %5269 = vmatprep.subr.mxu0 %v4650_v46  ;;  %v4630_v23 = vld [vmem:[%s10400_s5 + $0x148] sm:$0xff]  ;;  %v4644_v7 = vld [vmem:[%s10400_s5 + $0x1b8] sm:$0xff]  ;;  %v4623_v46 = vld [vmem:[%s10400_s5 + $0x110] sm:$0xff] }
 0x5b1   :  { %v3984_v53 = vrot.slane %v3977_v30, %v6482_v29  ;;  %v4151_v32 = vrot.slane %v5143_v55, %v6482_v29  ;;  %5270 = vmatpush3.msra.mxu0 %v4634_v37  ;;  %v4628_v55 = vld [vmem:[%s10400_s5 + $0x138] sm:$0xff] }
 0x5b2   :  { %5271 = vmatprep.subr.mxu0 %v4649_v36  ;;  %v4624_v51 = vld [vmem:[%s10400_s5 + $0x118] sm:$0xff] }
 0x5b3   :  { %v5145_v25 = vcombine.low %v3968_v8, %v3984_v53  ;;  %5272 = vmatpush3.msra.mxu0 %v4633_v34  ;;  %v4469_v8 = vsel %vm3626_vm11, 0.0, %v9745_v28  ;;  %v4656_v33 = vld [vmem:[%s10400_s5 + $0x218] sm:$0xff]  ;;  %v4655_v34 = vld [vmem:[%s10400_s5 + $0x210] sm:$0xff] }
 0x5b4   :  { %5273 = vmatprep.subr.mxu0 %v4648_v1  ;;  %v4638_v1 = vld [vmem:[%s10400_s5 + $0x188] sm:$0xff] }
 0x5b5   :  { %v4165_v9 = vrot.slane %v5145_v25, %v6482_v29  ;;  %5274 = vmatpush3.msra.mxu0 %v4632_v21 }
 0x5b6   :  { %5275 = vmatprep.subr.mxu0 %v4647_v59 }
 0x5b7   :  { %v4174_v45 = vcombine.high %v4151_v32, %v4165_v9  ;;  %v4173_v20 = vcombine.low %v4151_v32, %v4165_v9  ;;  %5276 = vmatpush3.msra.mxu0 %v4631_v50  ;;  %v4493_v32 = vcombine.low %v4469_v8, %v4469_v8  ;;  %v4473_v9 = vsel %vm3626_vm11, %v10012_v63, %v9745_v28  ;;  %v4654_v50 = vld [vmem:[%s10400_s5 + $0x208] sm:$0xff] }
 0x5b8   :  { %v5216_v62 = vpop.f32.mrf.mxu1  ;;  %5277 = vmatprep.subr.mxu0 %v4646_v0  ;;  %v4622_v0 = vld [vmem:[%s10400_s5 + $0x108] sm:$0xff] }
 0x5b9   :  { %4271 = vmatprep.mubr.f32.mxu1 %v4174_v45  ;;  %5278 = vmatpush3.msra.mxu0 %v4630_v23  ;;  %v4637_v23 = vld [vmem:[%s10400_s5 + $0x180] sm:$0xff] }
 0x5ba   :  { %4272 = vmatmul.mubr.f32.gmra.mxu1 %v4173_v20  ;;  %v5217_v15 = vpop.f32.mrf.mxu1  ;;  %5279 = vmatprep.subr.mxu0 %v4645_v19 }
 0x5bb   :  { %v5218_v49 = vadd.f32 %v5217_v15, %v5216_v62  ;;  %5280 = vmatpush3.msra.mxu0 %v4629_v48  ;;  %v4653_v48 = vld [vmem:[%s10400_s5 + $0x200] sm:$0xff] }
 0x5bc   :  { %5281 = vmatprep.subr.mxu0 %v4644_v7  ;;  %v4621_v7 = vld [vmem:[%s10400_s5 + $0x100] sm:$0xff] }
 0x5bd   :  { %v4269_v47 = vadd.f32 %v5218_v49, %v10002_v6  ;;  %5282 = vmatpush3.msra.mxu0 %v4628_v55 }
 0x5ea   :  { %v4446_v38 = vpop.permute.xlu0 %4445 }
 0x5eb   :  { %v10137_v43 = vsel %vm3626_vm11, 0.0, %v4446_v38 }
 0x5ec   :  { %v4448_v53 = vpop.permute.xlu1 %4447  ;;  %v4541_v45 = vcombine.low %v10137_v43, %v4473_v9  ;;  %v5000_v9 = vld [vmem:[#allocation5 + $0xf8] sm:$0xff] }
 0x5ed   :  { %v10265_v38 = vsel %vm3626_vm11, %v10012_v63, %v4448_v53  ;;  %v4712_v53 = vrot.slane %v10029_v39, %v6482_v29 }
 0x5ee   :  { %v10134_v3 = vpop.permute.xlu0 %4451  ;;  %v4549_v28 = vrot.slane %v4541_v45, %v6482_v29 }
 0x5ef   :  { %v10142_v35 = vsel %vm3626_vm11, %v10007_v18, %v10134_v3  ;;  %v4609_v18 = vld [vmem:[%s10400_s5 + $0xa0] sm:$0xff]  ;;  %v4472_v30 = vsel %vm3626_vm11, 0.0, %v10134_v3  ;;  %v4501_v3 = vrot.slane %v4493_v32, %v6482_v29 }
 0x5f0   :  { %v4494_v12 = vcombine.low %v10142_v35, %v10137_v43  ;;  %5252 = vmatprep.subr.mxu1 %v4609_v18  ;;  %v4517_v25 = vcombine.low %v4469_v8, %v4472_v30  ;;  %v4996_v43 = vld [vmem:[#allocation5 + $0xd8] sm:$0xff]  ;;  %v4995_v35 = vld [vmem:[#allocation5 + $0xd0] sm:$0xff] }
 0x5f1   :  { %5253 = vmatpush3.msra.mxu1 %v4593_v16 }
 0x5f2   :  { %5254 = vmatprep.subr.mxu1 %v4608_v24  ;;  %v4525_v20 = vrot.slane %v4517_v25, %v6482_v29  ;;  %v4643_v24 = vld [vmem:[%s10400_s5 + $0x1b0] sm:$0xff]  ;;  %v4458_v45 = vpop.permute.xlu0 %4457 }
 0x5f3   :  { %v10149_v14 = vpop.f32.mrf.mxu0  ;;  %5255 = vmatpush3.msra.mxu1 %v4592_v17  ;;  %5283 = vmatprep.subr.mxu0 %v4643_v24 }
 0x5f4   :  { %5256 = vmatprep.subr.mxu1 %v4607_v41  ;;  %v5152_v44 = vcombine.low %v4501_v3, %v4525_v20  ;;  %v4627_v41 = vld [vmem:[%s10400_s5 + $0x130] sm:$0xff]  ;;  %v4476_v20 = vsel %vm3626_vm11, %v10015_v4, %v4458_v45  ;;  %v4508_v4 = vrot.slane %v4494_v12, %v6482_v29  ;;  %v4994_v12 = vld [vmem:[#allocation5 + $0xc8] sm:$0xff] }
 0x5f5   :  { %v4353_v54 = vpop.f32.mrf.mxu0  ;;  %5257 = vmatpush3.msra.mxu1 %v4591_v42  ;;  %5284 = vmatpush3.msra.mxu0 %v4627_v41  ;;  %v4998_v41 = vld [vmem:[#allocation5 + $0xe8] sm:$0xff] }
 0x5f6   :  { %v4354_v22 = vadd.f32 %v4353_v54, %v4269_v47  ;;  %5258 = vmatprep.subr.mxu1 %v4606_v26  ;;  %v4678_v18 = vrot.slane %v5152_v44, %v6482_v29  ;;  %v4642_v26 = vld [vmem:[%s10400_s5 + $0x1a8] sm:$0xff] }
 0x5f7   :  { %5259 = vmatpush3.msra.mxu1 %v4590_v27  ;;  %5285 = vmatprep.subr.mxu0 %v4642_v26 }
 0x5f8   :  { %v4364_v56 = vmax.f32 %v4354_v22, 0.0  ;;  %5260 = vmatprep.subr.mxu1 %v4605_v2  ;;  %v4658_v2 = vld [vmem:[%s10400_s5 + $0x228] sm:$0xff] }
 0x5f9   :  { %5261 = vmatpush3.msra.mxu1 %v4589_v52  ;;  %v4625_v52 = vld [vmem:[%s10400_s5 + $0x120] sm:$0xff] }
 0x5fa   :  { %v4404_v57 = vcombine.high %v4364_v56, %v4364_v56  ;;  %v10177_v5 = vrot.slane %v4364_v56, %v6482_v29  ;;  %5355 = vmatprep.subr.mxu1 %v10841_v31  ;;  %v4659_v56 = vld [vmem:[%s10400_s5 + $0x230] sm:$0xff] }
 0x5fc   :  { %v10186_v40 = vrot.slane %v4404_v57, %v6482_v29  ;;  %v4419_v60 = vcombine.high %v10177_v5, %v10177_v5  ;;  %v4626_v57 = vld [vmem:[%s10400_s5 + $0x128] sm:$0xff] }
 0x5fd   :  { %5286 = vmatpush3.msra.mxu0 %v4626_v57 }
 0x5fe   :  { %4453 = vrot.lane.b32.xlu1 %v4419_v60, %s5528_s20  ;;  %v4420_v10 = vcombine.high %v10186_v40, %v10186_v40  ;;  %v4641_v60 = vld [vmem:[%s10400_s5 + $0x1a0] sm:$0xff] }
 0x5ff   :  { %5287 = vmatprep.subr.mxu0 %v4641_v60  ;;  %v4991_v60 = vld [vmem:[#allocation5 + $0xb0] sm:$0xff] }
 0x600   :  { %5288 = vmatpush3.msra.mxu0 %v4625_v52  ;;  %v4990_v52 = vld [vmem:[#allocation5 + $0xa8] sm:$0xff] }
 0x601   :  { %5289 = vmatprep.subr.mxu0 %v4640_v11  ;;  %v4986_v11 = vld [vmem:[#allocation5 + $0x88] sm:$0xff] }
 0x602   :  { %4459 = vrot.lane.b32.xlu1 %v4420_v10, %s5528_s20  ;;  %5290 = vmatpush3.msra.mxu0 %v4624_v51  ;;  %v4985_v51 = vld [vmem:[#allocation5 + $0x80] sm:$0xff] }
 0x670   :  { %v10261_v62 = vpop.permute.xlu1 %4453 }
 0x671   :  { %v4474_v15 = vsel %vm3626_vm11, %v10020_v13, %v10261_v62  ;;  %v4660_v13 = vld [vmem:[%s10400_s5 + $0x238] sm:$0xff] }
 0x672   :  { %v4565_v49 = vcombine.low %v10265_v38, %v4474_v15  ;;  %v4518_v15 = vcombine.low %v4476_v20, %v10265_v38 }
 0x674   :  { %v4573_v58 = vrot.slane %v4565_v49, %v6482_v29  ;;  %v4460_v3 = vpop.permute.xlu1 %4459  ;;  %v4532_v44 = vrot.slane %v4518_v15, %v6482_v29 }
 0x676   :  { %v5154_v47 = vcombine.low %v4549_v28, %v4573_v58  ;;  %v4477_v28 = vsel %vm3626_vm11, %v10177_v5, %v10261_v62 }
 0x678   :  { %v4692_v54 = vrot.slane %v5154_v47, %v6482_v29 }
 0x67a   :  { %v5219_v63 = vpop.f32.mrf.mxu1  ;;  %v4700_v16 = vcombine.low %v4678_v18, %v4692_v54  ;;  %v4701_v22 = vcombine.high %v4678_v18, %v4692_v54  ;;  %v4478_v18 = vsel %vm3626_vm11, %v10186_v40, %v4460_v3 }
 0x67c   :  { %v5220_v17 = vpop.f32.mrf.mxu1  ;;  %4791 = vmatprep.mubr.f32.mxu1 %v4701_v22 }
 0x67d   :  { %v5221_v42 = vadd.f32 %v5220_v17, %v5219_v63  ;;  %4792 = vmatmul.mubr.f32.vlgmr.msra.gmra.mxu1 %v4700_v16  ;;  %v5153_v63 = vcombine.low %v4508_v4, %v4532_v44  ;;  %v4999_v17 = vld [vmem:[#allocation5 + $0xf0] sm:$0xff] }
 0x67e   :  { %5356 = vmatpush3.msra.mxu1 %v4660_v13  ;;  %5371 = vmatprep.mubr.msk.f32.mxu1 %vm5530_vm13, %v10841_v31 }
 0x67f   :  { %v4274_v27 = vadd.f32 %v5221_v42, %v10002_v6  ;;  %5357 = vmatprep.subr.mxu1 %v10841_v31  ;;  %v4657_v6 = vld [vmem:[%s10400_s5 + $0x220] sm:$0xff]  ;;  %v4685_v22 = vrot.slane %v5153_v63, %v6482_v29 }
 0x680   :  { %5358 = vmatpush3.msra.mxu1 %v4659_v56  ;;  %v4997_v42 = vld [vmem:[#allocation5 + $0xe0] sm:$0xff] }
 0x681   :  { %v4359_v10 = vadd.f32 %v10149_v14, %v4274_v27  ;;  %5359 = vmatprep.subr.mxu1 %v10841_v31  ;;  %v4639_v14 = vld [vmem:[%s10400_s5 + $0x190] sm:$0xff]  ;;  %v4993_v56 = vld [vmem:[#allocation5 + $0xc0] sm:$0xff] }
 0x682   :  { %5360 = vmatpush3.msra.mxu1 %v4658_v2  ;;  %5291 = vmatprep.subr.mxu0 %v4639_v14  ;;  %v4992_v2 = vld [vmem:[#allocation5 + $0xb8] sm:$0xff] }
 0x683   :  { %v4365_v61 = vmax.f32 %v4359_v10, 0.0  ;;  %5361 = vmatprep.subr.mxu1 %v10841_v31  ;;  %5292 = vmatpush3.msra.mxu0 %v4623_v46  ;;  %v4989_v10 = vld [vmem:[#allocation5 + $0xa0] sm:$0xff]  ;;  %v4984_v14 = vld [vmem:[#allocation5 + $0x78] sm:$0xff]  ;;  %v4982_v46 = vld [vmem:[#allocation5 + $0x68] sm:$0xff] }
 0x684   :  { %5362 = vmatpush3.msra.mxu1 %v4657_v6  ;;  %5293 = vmatprep.subr.mxu0 %v4638_v1  ;;  %v4987_v6 = vld [vmem:[#allocation5 + $0x90] sm:$0xff] }
 0x685   :  { %v4421_v37 = vcombine.high %v4365_v61, %v4365_v61  ;;  %v4428_v36 = vrot.slane %v4365_v61, %v6482_v29  ;;  %5363 = vmatprep.subr.mxu1 %v10841_v31  ;;  %5294 = vmatpush3.msra.mxu0 %v4622_v0  ;;  %v4983_v61 = vld [vmem:[#allocation5 + $0x70] sm:$0xff] }
 0x686   :  { %5364 = vmatpush3.msra.mxu1 %v4656_v33  ;;  %5295 = vmatprep.subr.mxu0 %v4637_v23  ;;  %v4979_v1 = vld [vmem:[#allocation5 + $0x50] sm:$0xff]  ;;  %v4974_v23 = vld [vmem:[#allocation5 + $0x28] sm:$0xff] }
 0x687   :  { %v4436_v21 = vcombine.high %v4428_v36, %v4428_v36  ;;  %4463 = vrot.lane.b32.xlu0 %v4428_v36, %s5528_s20  ;;  %v4435_v59 = vrot.slane %v4421_v37, %v6482_v29  ;;  %5365 = vmatprep.subr.mxu1 %v10841_v31  ;;  %v4981_v37 = vld [vmem:[#allocation5 + $0x60] sm:$0xff]  ;;  %v4975_v0 = vld [vmem:[#allocation5 + $0x30] sm:$0xff] }
 0x688   :  { %5366 = vmatpush3.msra.mxu1 %v4655_v34  ;;  %5296 = vmatpush3.msra.mxu0 %v4621_v7  ;;  %v4980_v34 = vld [vmem:[#allocation5 + $0x58] sm:$0xff]  ;;  %v4971_v7 = vld [vmem:[#allocation5 + $0x10] sm:$0xff] }
 0x689   :  { %4465 = vrot.lane.b32.xlu1 %v4435_v59, %s5528_s20  ;;  %v4437_v19 = vcombine.high %v4435_v59, %v4435_v59  ;;  %5367 = vmatprep.subr.mxu1 %v10841_v31  ;;  %v4564_v55 = vrot.slane %v4436_v21, %v6482_v29  ;;  %v4977_v59 = vld [vmem:[#allocation5 + $0x40] sm:$0xff] }
 0x68a   :  { %5368 = vmatpush3.msra.mxu1 %v4654_v50  ;;  %5013 = vmatprep.subr.mxu0 %v5000_v9  ;;  %v4976_v50 = vld [vmem:[#allocation5 + $0x38] sm:$0xff] }
 0x68b   :  { %v4588_v30 = vrot.slane %v4437_v19, %v6482_v29  ;;  %5369 = vmatprep.subr.mxu1 %v10841_v31  ;;  %v4973_v19 = vld [vmem:[#allocation5 + $0x20] sm:$0xff] }
 0x68c   :  { %5370 = vmatpush3.msra.mxu1 %v4653_v48  ;;  %v4972_v48 = vld [vmem:[#allocation5 + $0x18] sm:$0xff] }
 0x68d   :  { %v4705_v8 = vcombine.low %v4564_v55, %v4588_v30  ;;  %v4970_v55 = vld [vmem:[#allocation5 + $0x8] sm:$0xff]  ;;  %v4969_v30 = vld [vmem:[#allocation5] sm:$0xff] }
 0x68f   :  { %v4719_v25 = vrot.slane %v4705_v8, %v6482_v29  ;;  %v5151_v8 = vld [vmem:[%s10401_s6] ss:$0 sm:$0xff] }
 0x691   :  { %v4720_v32 = vcombine.low %v4712_v53, %v4719_v25 }
 0x693   :  { %5372 = vmatmul.mubr.msk.f32.vlgmr.msra.gmra.mxu1 %vm3626_vm11, %v4720_v32 }
 0x6f9   :  { %v4464_v49 = vpop.permute.xlu0 %4463 }
 0x6fa   :  { %v4479_v39 = vsel %vm3626_vm11, 0.0, %v4464_v49 }
 0x6fb   :  { %v4542_v58 = vcombine.low %v4477_v28, %v4479_v39  ;;  %v4466_v47 = vpop.permute.xlu1 %4465 }
 0x6fc   :  { %v4480_v54 = vsel %vm3626_vm11, %v4436_v21, %v4466_v47  ;;  %v4978_v21 = vld [vmem:[#allocation5 + $0x48] sm:$0xff] }
 0x6fd   :  { %v4566_v38 = vcombine.low %v4478_v18, %v4480_v54  ;;  %v4556_v5 = vrot.slane %v4542_v58, %v6482_v29 }
 0x6ff   :  { %v4580_v62 = vrot.slane %v4566_v38, %v6482_v29 }
 0x701   :  { %v5155_v16 = vcombine.low %v4556_v5, %v4580_v62  ;;  %v10842_v62 = vld [vmem:[#allocation74_spill] sm:$0xff] }
 0x703   :  { %v4699_v13 = vrot.slane %v5155_v16, %v6482_v29  ;;  %v5005_v16 = vsub.s32 0, %v10842_v62 }
 0x705   :  { %v4702_v24 = vcombine.low %v4685_v22, %v4699_v13  ;;  %v4703_v40 = vcombine.high %v4685_v22, %v4699_v13  ;;  %v5009_v22 = vsub.s32 1, %v10842_v62  ;;  %v5001_v13 = vld [vmem:[%s10403_s8] sm:$0x3] }
 0x707   :  { %4861 = vmatprep.mubr.f32.mxu0 %v4703_v40 }
 0x708   :  { %4862 = vmatmul.mubr.f32.vlgmr.msra.gmra.mxu0 %v4702_v24  ;;  %v5010_v24 = vrot.slane %v5001_v13, %v5009_v22 }
 0x709   :  { %5014 = vmatpush1.msra.mxu0 %v4999_v17  ;;  %5077 = vmatprep.mubr.f32.mxu0 %v10841_v31  ;;  %v4988_v31 = vld [vmem:[#allocation5 + $0x98] sm:$0xff] }
 0x70a   :  { %5015 = vmatprep.subr.mxu0 %v4998_v41 }
 0x70b   :  { %5016 = vmatpush1.msra.mxu0 %v4997_v42 }
 0x70c   :  { %5017 = vmatprep.subr.mxu0 %v4996_v43 }
 0x70d   :  { %5018 = vmatpush1.msra.mxu0 %v4995_v35 }
 0x70e   :  { %5019 = vmatprep.subr.mxu0 %v4994_v12 }
 0x70f   :  { %5020 = vmatpush1.msra.mxu0 %v4993_v56 }
 0x710   :  { %5021 = vmatprep.subr.mxu0 %v4992_v2 }
 0x711   :  { %5022 = vmatpush1.msra.mxu0 %v4991_v60 }
 0x712   :  { %5023 = vmatprep.subr.mxu0 %v4990_v52 }
 0x713   :  { %5024 = vmatpush1.msra.mxu0 %v4989_v10 }
 0x714   :  { %5025 = vmatprep.subr.mxu0 %v4988_v31 }
 0x715   :  { %5026 = vmatpush1.msra.mxu0 %v4987_v6 }
 0x716   :  { %5027 = vmatprep.subr.mxu0 %v4986_v11 }
 0x717   :  { %5028 = vmatpush1.msra.mxu0 %v4985_v51 }
 0x718   :  { %5029 = vmatprep.subr.mxu0 %v4984_v14 }
 0x719   :  { %5030 = vmatpush1.msra.mxu0 %v4983_v61 }
 0x71a   :  { %5031 = vmatprep.subr.mxu0 %v4982_v46 }
 0x71b   :  { %5032 = vmatpush1.msra.mxu0 %v4981_v37 }
 0x71c   :  { %5033 = vmatprep.subr.mxu0 %v4980_v34 }
 0x71d   :  { %5034 = vmatpush1.msra.mxu0 %v4979_v1 }
 0x71e   :  { %5035 = vmatprep.subr.mxu0 %v4978_v21 }
 0x71f   :  { %5036 = vmatpush1.msra.mxu0 %v4977_v59 }
 0x720   :  { %5037 = vmatprep.subr.mxu0 %v4976_v50 }
 0x721   :  { %5038 = vmatpush1.msra.mxu0 %v4975_v0 }
 0x722   :  { %5039 = vmatprep.subr.mxu0 %v4974_v23 }
 0x723   :  { %5040 = vmatpush1.msra.mxu0 %v4973_v19 }
 0x724   :  { %5041 = vmatprep.subr.mxu0 %v4972_v48 }
 0x725   :  { %5042 = vmatpush1.msra.mxu0 %v4971_v7 }
 0x726   :  { %5043 = vmatprep.subr.mxu0 %v4970_v55 }
 0x727   :  { %5044 = vmatpush1.msra.mxu0 %v4969_v30 }
 0x73d   :  { %v5262_v26 = vpop.f32.mrf.mxu1 }
 0x73f   :  { %v5263_v57 = vpop.f32.mrf.mxu1 }
 0x740   :  { %v5264_v27 = vadd.f32 %v5263_v57, %v5262_v26 }
 0x742   :  { %v4794_v32 = vadd.f32 %v5264_v27, %v5151_v8 }
 0x753   :  { %v4933_v33 = vpop.f32.mrf.mxu1 }
 0x755   :  { %v5373_v36 = vpop.f32.mrf.mxu1 }
 0x7c8   :  { %v5297_v53 = vpop.f32.mrf.mxu0 }
 0x7ca   :  { %v5298_v25 = vpop.f32.mrf.mxu0 }
 0x7cb   :  { %v5299_v9 = vadd.f32 %v5298_v25, %v5297_v53 }
 0x7cd   :  { %v4864_v45 = vadd.f32 %v5299_v9, %v4794_v32 }
 0x7cf   :  { %v4934_v20 = vadd.f32 %v4933_v33, %v4864_v45 }
 0x7d1   :  { %v4937_v15 = vmax.f32 %v4934_v20, 0.0 }
 0x7d3   :  { %v4939_v3 = vcombine.high %v4937_v15, %v4937_v15  ;;  %v4946_v49 = vrot.slane %v4937_v15, %v6482_v29 }
 0x7d5   :  { %v4953_v28 = vrot.slane %v4939_v3, %v6482_v29  ;;  %v4954_v39 = vcombine.high %v4946_v49, %v4946_v49  ;;  %v4961_v44 = vsel %vm4960_vm14, %v4946_v49, 0.0  ;;  %v5006_v29 = vrot.slane %v5001_v13, %v5005_v16 }
 0x7d7   :  { %v4962_v58 = vsel %vm4960_vm14, %v4954_v39, 0.0  ;;  %v4955_v47 = vcombine.high %v4953_v28, %v4953_v28  ;;  %v4964_v54 = vsel %vm4960_vm14, %v4953_v28, 0.0 }
 0x7d8   :  { %v4963_v18 = vadd.f32 %v4962_v58, %v4961_v44 }
 0x7d9   :  { %v4966_v38 = vsel %vm4960_vm14, %v4955_v47, 0.0 }
 0x7da   :  { %v4965_v4 = vadd.f32 %v4964_v54, %v4963_v18 }
 0x7dc   :  { %v4967_v63 = vadd.f32 %v4966_v38, %v4965_v4 }
 0x7de   :  { %v4968_v5 = vmul.f32 0.25, %v4967_v63 }
 0x7e0   :  { %5078 = vmatmul.mubr.f32.vlgmr.msra.gmra.mxu0 %v4968_v5 }
 0x8a0   :  { %v5079_v40 = vpop.f32.mrf.mxu0 }
 0x8a1   :  { %v5080_v41 = vadd.f32 %v5079_v40, %v5006_v29 }
 0x8a2   :  { %v5081_v17 = vpop.f32.mrf.mxu0 }
 0x8a3   :  { %v5082_v42 = vadd.f32 %v5081_v17, %v5010_v24 }
 0x8a5   :  { %v5086_v43 = vcombine.low %v5080_v41, %v5082_v42 }
 0x8a7   :  { %5157 = vst.sshfl [vmem:[#allocation7] sm:$0x33 pattern:$0x76325410] %v5086_v43 }
 0x8a8   :  { %5496 = shalt.err (!%p5493_p0)
}
 0x8a9   :  { %5105 = dma.vmem_to_hbm [thread:$0]  %s5103_s21, 64, %s10404_s9, [#allocation4]  }
 0x8aa   :  { %5509 = dma.done.wait [#allocation4], 64  }
 0x8ab   :  { %5510 = vsyncadd [#allocation4], 4294967232 }
 0x8ac   :  { %5109 = vsyncpa [#allocation3], 1 }
 0x8ad   :  { %5110 = vsyncpa [#allocation6], 1 }
 0x8ae   :  { %5111 = vsyncpa [#allocation4], 1 }

</bundles_post_ra>
